<compile_context>
chip_gen: v7x
topology: tpu7x:2x2x1
jax: 0.10.0
libtpu: 0.0.40
codegen_flags: <defaults>
</compile_context>

<pallas_src>
import functools

import jax
import jax.numpy as jnp
from jax.experimental import pallas as pl
from jax.experimental.pallas import tpu as pltpu


# ----------------------------- Pallas kernel -----------------------------


def _the_dilation_kernel(
    x_ref, w_ref,            # inputs : (1, H, W, C) f32 ; (3, 9, C, C) bf16
    o_ref,                   # output : (1, H, W, C) f32
    pad_ref,                 # scratch: (H + 2P, W, C) f32, H-padded activation window
    *, H, W, C, P, dils, eps,
):
    HW = H * W
    f32 = jnp.float32

    # Zero only the H-border rows (top P, bottom P); the center rows are fully
    # rewritten for every layer.  Re-done each grid step for megacore safety.
    zrows = jnp.zeros((P, W, C), f32)
    pad_ref[0:P] = zrows
    pad_ref[P + H:2 * P + H] = zrows

    # Column index of every flattened row position (for masking rolled-in columns).
    wcol = jax.lax.broadcasted_iota(jnp.int32, (H, W, C), 1).reshape(HW, C)

    # Layer-0 input goes into the window center (x_ref is re-read for the residual).
    pad_ref[P:P + H] = x_ref[0]

    y = None
    for layer, d in enumerate(dils):
        # W-shift validity masks for this dilation (shared by all ki / both layers
        # with the same d; recomputed per layer to bound live ranges).
        ok_plus = wcol < (W - d)    # source column w + d is in-bounds
        ok_minus = wcol >= d        # source column w - d is in-bounds

        acc = jnp.zeros((HW, C), f32)
        for ki in range(3):
            oy = P + (ki - 1) * d
            # Contiguous, tile-aligned slab load (H rows starting at oy); the
            # reshape only collapses leading dims (W % 8 == 0) -> no relayout.
            slab = pad_ref[oy:oy + H].reshape(HW, C)
            for kj in range(3):
                s = (kj - 1) * d
                if s == 0:
                    xt = slab
                else:
                    # x[h, w + s] == flat roll by -s (wrapped positions are exactly
                    # the out-of-range columns, zeroed by the mask -> W zero-padding).
                    rolled = pltpu.roll(slab, (-s) % HW, axis=0)
                    xt = jnp.where(ok_plus if s > 0 else ok_minus, rolled, 0.0)
                acc = acc + jnp.dot(
                    xt.astype(jnp.bfloat16),
                    w_ref[layer, ki * 3 + kj],
                    preferred_element_type=f32,
                )
        # (conv bias omitted: cancelled exactly by affine=False InstanceNorm)

        # InstanceNorm2d (affine=False, biased var) -- single-pass statistics.
        inv_n = 1.0 / float(HW)
        mu = jnp.sum(acc, axis=0, keepdims=True) * inv_n
        ex2 = jnp.sum(acc * acc, axis=0, keepdims=True) * inv_n
        var = ex2 - mu * mu
        y = jnp.maximum((acc - mu) * jax.lax.rsqrt(var + eps), 0.0)   # ReLU fused

        if layer < 2:
            pad_ref[P:P + H] = y.reshape(H, W, C)

    # Residual connection (re-read x from VMEM instead of keeping it live in vregs).
    o_ref[0] = x_ref[0] + y.reshape(H, W, C)


# ----------------------------- wrappers -----------------------------


def the_dilation_forward_nhwc(x_nhwc, w_stack):
    """Core entry point: x (B, H, W, C) f32, w_stack (3, 9, C, C) bf16 -> (B, H, W, C) f32."""
    B, H, W, C = x_nhwc.shape
    P = 4  # max padding/dilation among the three layers
    assert C % 128 == 0, "channels must be lane-aligned (multiple of 128)"
    assert W % 8 == 0, "width must be sublane-aligned (multiple of 8)"

    kern = functools.partial(
        _the_dilation_kernel, H=H, W=W, C=C, P=P, dils=(2, 4, 4), eps=1e-5
    )
    img_spec = pl.BlockSpec((1, H, W, C), lambda b: (b, 0, 0, 0))
    w_spec = pl.BlockSpec((3, 9, C, C), lambda b: (0, 0, 0, 0))

    # Explicit scoped-VMEM budget from the actual block + scratch sizes
    # (double-buffered activations/weights + the pad scratch), with headroom.
    io_block = H * W * C * 4
    w_bytes = 3 * 9 * C * C * 2
    pad_bytes = (H + 2 * P) * W * C * 4
    need = 2 * (2 * io_block + w_bytes) + pad_bytes
    vmem_limit = int(min(max(2 * need, 32 << 20), 64 << 20))

    return pl.pallas_call(
        kern,
        out_shape=jax.ShapeDtypeStruct((B, H, W, C), jnp.float32),
        grid_spec=pltpu.PrefetchScalarGridSpec(
            num_scalar_prefetch=0,
            grid=(B,),
            in_specs=[img_spec, w_spec],
            out_specs=img_spec,
            scratch_shapes=[pltpu.VMEM((H + 2 * P, W, C), jnp.float32)],
        ),
        compiler_params=pltpu.CompilerParams(
            dimension_semantics=("parallel",),
            vmem_limit_bytes=vmem_limit,
        ),
    )(x_nhwc, w_stack)


def the_dilation_forward(x_nchw, w_stack):
    """PyTorch-layout wrapper: x (B, C, H, W) -> (B, C, H, W).

    NOTE(perf): keep the surrounding model in NHWC and call
    the_dilation_forward_nhwc directly to avoid these two HBM-round-trip transposes.
    """
    x = jnp.transpose(x_nchw, (0, 2, 3, 1)).astype(jnp.float32)
    y = the_dilation_forward_nhwc(x, w_stack)
    return jnp.transpose(y, (0, 3, 1, 2))


# ------------------------- params & pure-JAX reference -------------------------


def init_params(key, C):
    """Deterministic synthetic weights.

    Returns (w_stack, b_stack):
      w_stack: (3 layers, 9 taps, Cin, Cout) bf16 for the kernel.
      b_stack: (3, C) f32 conv biases -- used ONLY by the reference (they are
               mathematically cancelled by affine=False InstanceNorm).
    """
    kw, kb = jax.random.split(key)
    w = 0.02 * jax.random.normal(kw, (3, C, C, 3, 3), jnp.float32)   # (layer,Cout,Cin,kh,kw)
    w = jnp.transpose(w, (0, 3, 4, 2, 1)).reshape(3, 9, C, C)        # (layer,tap,Cin,Cout)
    w = w.astype(jnp.bfloat16)
    b = 0.02 * jax.random.normal(kb, (3, C), jnp.float32)
    return w, b


def the_dilation_reference(x_nchw, w_stack, b_stack):
    """Pure-JAX f32 reference (dilated conv + bias -> InstanceNorm -> ReLU, residual)."""
    x = jnp.transpose(x_nchw, (0, 2, 3, 1)).astype(jnp.float32)
    B, H, W, C = x.shape

    def layer(act, w9, b, d):
        p = jnp.pad(act, ((0, 0), (d, d), (d, d), (0, 0)))
        wf = w9.astype(jnp.float32)
        acc = jnp.zeros((B, H, W, C), jnp.float32)
        for ki in range(3):
            for kj in range(3):
                xs = p[:, ki * d:ki * d + H, kj * d:kj * d + W, :]
                acc = acc + jnp.einsum("bhwc,cd->bhwd", xs, wf[ki * 3 + kj],
                                       precision=jax.lax.Precision.HIGHEST)
        acc = acc + b.reshape(1, 1, 1, C)
        mu = jnp.mean(acc, axis=(1, 2), keepdims=True)
        var = jnp.var(acc, axis=(1, 2), keepdims=True)
        return jnp.maximum((acc - mu) * jax.lax.rsqrt(var + 1e-5), 0.0)

    y = x
    for l, d in enumerate((2, 4, 4)):
        y = layer(y, w_stack[l], b_stack[l], d)
    return jnp.transpose(x + y, (0, 3, 1, 2))


# --------------------------------- driver ---------------------------------


if __name__ == "__main__":
    # Small test config: ndf=16 -> 8*ndf = 128 channels (exactly one lane tile).
    NDF = 16
    C = 8 * NDF
    B, H, W = 2, 16, 16

    key = jax.random.PRNGKey(0)
    k_param, k_input = jax.random.split(key)
    w_stack, b_stack = init_params(k_param, C)
    x = jax.random.normal(k_input, (B, C, H, W), dtype=jnp.float32)  # NCHW, like PyTorch

    fwd = jax.jit(the_dilation_forward)
    out = jax.block_until_ready(fwd(x, w_stack))

    assert out.shape == (B, C, H, W)
    assert bool(jnp.all(jnp.isfinite(out)))

    # Numerical check vs. the f32 reference (reference keeps the conv bias, the
    # kernel drops it -- identical math since InstanceNorm cancels it).
    ref = jax.block_until_ready(jax.jit(the_dilation_reference)(x, w_stack, b_stack))
    max_err = float(jnp.max(jnp.abs(out - ref)))
    assert max_err < 0.2, f"max abs error vs reference too large: {max_err}"

    print("KERNEL_OK")
</pallas_src>

<mosaic_0001>
module attributes {stable_mosaic.version = 11 : i64} {
  func.func @_the_dilation_kernel(%arg0: i32, %arg1: memref<1x16x16x128xf32, #tpu.memory_space<vmem>>, %arg2: memref<3x9x128x128xbf16, #tpu.memory_space<vmem>>, %arg3: memref<1x16x16x128xf32, #tpu.memory_space<vmem>>, %arg4: memref<24x16x128xf32, #tpu.memory_space<vmem>>) attributes {dimension_semantics = [#tpu.dimension_semantics<parallel>], iteration_bounds = array<i64: 2>, scalar_prefetch = 0 : i64, scratch_operands = 1 : i64, tpu.core_type = #tpu.core_type<tc>, window_params = [{transform_indices = @transform_0, window_bounds = array<i64: 1, 16, 16, 128>}, {pipeline_mode = #tpu.pipeline_mode<synchronous>, transform_indices = @transform_1, window_bounds = array<i64: 3, 9, 128, 128>}, {transform_indices = @transform_2, window_bounds = array<i64: 1, 16, 16, 128>}]} {
    %cst = arith.constant 0.000000e+00 : f32
    %0 = vector.broadcast %cst : f32 to vector<4x16x128xf32>
    %c0 = arith.constant 0 : index
    %c0_0 = arith.constant 0 : index
    %c0_1 = arith.constant 0 : index
    %1 = vector.load %arg4[%c0, %c0_0, %c0_1] : memref<24x16x128xf32, #tpu.memory_space<vmem>>, vector<4x16x128xf32>
    tpu.vector_store %arg4[%c0, %c0_0, %c0_1], %0 {strides = array<i32>} : memref<24x16x128xf32, #tpu.memory_space<vmem>>, vector<4x16x128xf32>,
    %c20 = arith.constant 20 : index
    %c0_2 = arith.constant 0 : index
    %c0_3 = arith.constant 0 : index
    %2 = vector.load %arg4[%c20, %c0_2, %c0_3] : memref<24x16x128xf32, #tpu.memory_space<vmem>>, vector<4x16x128xf32>
    tpu.vector_store %arg4[%c20, %c0_2, %c0_3], %0 {strides = array<i32>} : memref<24x16x128xf32, #tpu.memory_space<vmem>>, vector<4x16x128xf32>,
    %3 = tpu.iota {dimensions = array<i32: 1>} : vector<16x16x128xi32>
    %4 = vector.shape_cast %3 : vector<16x16x128xi32> to vector<256x128xi32>
    %c0_4 = arith.constant 0 : index
    %c0_5 = arith.constant 0 : index
    %c0_6 = arith.constant 0 : index
    %c0_7 = arith.constant 0 : index
    %5 = vector.load %arg1[%c0_4, %c0_5, %c0_6, %c0_7] : memref<1x16x16x128xf32, #tpu.memory_space<vmem>>, vector<1x16x16x128xf32>
    %6 = vector.shape_cast %5 : vector<1x16x16x128xf32> to vector<16x16x128xf32>
    %c4 = arith.constant 4 : index
    %c0_8 = arith.constant 0 : index
    %c0_9 = arith.constant 0 : index
    %7 = vector.load %arg4[%c4, %c0_8, %c0_9] : memref<24x16x128xf32, #tpu.memory_space<vmem>>, vector<16x16x128xf32>
    tpu.vector_store %arg4[%c4, %c0_8, %c0_9], %6 {strides = array<i32>} : memref<24x16x128xf32, #tpu.memory_space<vmem>>, vector<16x16x128xf32>,
    %c14_i32 = arith.constant 14 : i32
    %8 = vector.broadcast %c14_i32 : i32 to vector<256x128xi32>
    %9 = arith.cmpi slt, %4, %8 : vector<256x128xi32>
    %c2_i32 = arith.constant 2 : i32
    %10 = vector.broadcast %c2_i32 : i32 to vector<256x128xi32>
    %11 = arith.cmpi sge, %4, %10 : vector<256x128xi32>
    %cst_10 = arith.constant 0.000000e+00 : f32
    %12 = vector.broadcast %cst_10 : f32 to vector<256x128xf32>
    %c2 = arith.constant 2 : index
    %c0_11 = arith.constant 0 : index
    %c0_12 = arith.constant 0 : index
    %13 = vector.load %arg4[%c2, %c0_11, %c0_12] : memref<24x16x128xf32, #tpu.memory_space<vmem>>, vector<16x16x128xf32>
    %14 = vector.shape_cast %13 : vector<16x16x128xf32> to vector<256x128xf32>
    %c2_i32_13 = arith.constant 2 : i32
    %15 = tpu.dynamic_rotate %14 by %c2_i32_13 dim 0 : vector<256x128xf32>, i32 -> vector<256x128xf32>
    %cst_14 = arith.constant 0.000000e+00 : f32
    %16 = vector.broadcast %cst_14 : f32 to vector<256x128xf32>
    %17 = arith.select %11, %15, %16 : vector<256x128xi1>, vector<256x128xf32>
    %18 = arith.truncf %17 : vector<256x128xf32> to vector<256x128xbf16>
    %c0_15 = arith.constant 0 : index
    %c0_16 = arith.constant 0 : index
    %c0_17 = arith.constant 0 : index
    %c0_18 = arith.constant 0 : index
    %19 = vector.load %arg2[%c0_15, %c0_16, %c0_17, %c0_18] : memref<3x9x128x128xbf16, #tpu.memory_space<vmem>>, vector<1x1x128x128xbf16>
    %20 = vector.shape_cast %19 : vector<1x1x128x128xbf16> to vector<128x128xbf16>
    %cst_19 = arith.constant dense<0.000000e+00> : vector<256x128xf32>
    %21 = tpu.matmul %18, %20, %cst_19 {dimension_numbers = #tpu.dot_dimension_numbers<[1], [0], [0], [1], [0, 0, 1, 1], [], []>} : vector<256x128xbf16>, vector<128x128xbf16>, vector<256x128xf32> -> vector<256x128xf32>
    %22 = arith.addf %12, %21 : vector<256x128xf32>
    %23 = arith.truncf %14 : vector<256x128xf32> to vector<256x128xbf16>
    %c0_20 = arith.constant 0 : index
    %c1 = arith.constant 1 : index
    %c0_21 = arith.constant 0 : index
    %c0_22 = arith.constant 0 : index
    %24 = vector.load %arg2[%c0_20, %c1, %c0_21, %c0_22] : memref<3x9x128x128xbf16, #tpu.memory_space<vmem>>, vector<1x1x128x128xbf16>
    %25 = vector.shape_cast %24 : vector<1x1x128x128xbf16> to vector<128x128xbf16>
    %cst_23 = arith.constant dense<0.000000e+00> : vector<256x128xf32>
    %26 = tpu.matmul %23, %25, %cst_23 {dimension_numbers = #tpu.dot_dimension_numbers<[1], [0], [0], [1], [0, 0, 1, 1], [], []>} : vector<256x128xbf16>, vector<128x128xbf16>, vector<256x128xf32> -> vector<256x128xf32>
    %27 = arith.addf %22, %26 : vector<256x128xf32>
    %c254_i32 = arith.constant 254 : i32
    %28 = tpu.dynamic_rotate %14 by %c254_i32 dim 0 : vector<256x128xf32>, i32 -> vector<256x128xf32>
    %cst_24 = arith.constant 0.000000e+00 : f32
    %29 = vector.broadcast %cst_24 : f32 to vector<256x128xf32>
    %30 = arith.select %9, %28, %29 : vector<256x128xi1>, vector<256x128xf32>
    %31 = arith.truncf %30 : vector<256x128xf32> to vector<256x128xbf16>
    %c0_25 = arith.constant 0 : index
    %c2_26 = arith.constant 2 : index
    %c0_27 = arith.constant 0 : index
    %c0_28 = arith.constant 0 : index
    %32 = vector.load %arg2[%c0_25, %c2_26, %c0_27, %c0_28] : memref<3x9x128x128xbf16, #tpu.memory_space<vmem>>, vector<1x1x128x128xbf16>
    %33 = vector.shape_cast %32 : vector<1x1x128x128xbf16> to vector<128x128xbf16>
    %cst_29 = arith.constant dense<0.000000e+00> : vector<256x128xf32>
    %34 = tpu.matmul %31, %33, %cst_29 {dimension_numbers = #tpu.dot_dimension_numbers<[1], [0], [0], [1], [0, 0, 1, 1], [], []>} : vector<256x128xbf16>, vector<128x128xbf16>, vector<256x128xf32> -> vector<256x128xf32>
    %35 = arith.addf %27, %34 : vector<256x128xf32>
    %c4_30 = arith.constant 4 : index
    %c0_31 = arith.constant 0 : index
    %c0_32 = arith.constant 0 : index
    %36 = vector.load %arg4[%c4_30, %c0_31, %c0_32] : memref<24x16x128xf32, #tpu.memory_space<vmem>>, vector<16x16x128xf32>
    %37 = vector.shape_cast %36 : vector<16x16x128xf32> to vector<256x128xf32>
    %c2_i32_33 = arith.constant 2 : i32
    %38 = tpu.dynamic_rotate %37 by %c2_i32_33 dim 0 : vector<256x128xf32>, i32 -> vector<256x128xf32>
    %cst_34 = arith.constant 0.000000e+00 : f32
    %39 = vector.broadcast %cst_34 : f32 to vector<256x128xf32>
    %40 = arith.select %11, %38, %39 : vector<256x128xi1>, vector<256x128xf32>
    %41 = arith.truncf %40 : vector<256x128xf32> to vector<256x128xbf16>
    %c0_35 = arith.constant 0 : index
    %c3 = arith.constant 3 : index
    %c0_36 = arith.constant 0 : index
    %c0_37 = arith.constant 0 : index
    %42 = vector.load %arg2[%c0_35, %c3, %c0_36, %c0_37] : memref<3x9x128x128xbf16, #tpu.memory_space<vmem>>, vector<1x1x128x128xbf16>
    %43 = vector.shape_cast %42 : vector<1x1x128x128xbf16> to vector<128x128xbf16>
    %cst_38 = arith.constant dense<0.000000e+00> : vector<256x128xf32>
    %44 = tpu.matmul %41, %43, %cst_38 {dimension_numbers = #tpu.dot_dimension_numbers<[1], [0], [0], [1], [0, 0, 1, 1], [], []>} : vector<256x128xbf16>, vector<128x128xbf16>, vector<256x128xf32> -> vector<256x128xf32>
    %45 = arith.addf %35, %44 : vector<256x128xf32>
    %46 = arith.truncf %37 : vector<256x128xf32> to vector<256x128xbf16>
    %c0_39 = arith.constant 0 : index
    %c4_40 = arith.constant 4 : index
    %c0_41 = arith.constant 0 : index
    %c0_42 = arith.constant 0 : index
    %47 = vector.load %arg2[%c0_39, %c4_40, %c0_41, %c0_42] : memref<3x9x128x128xbf16, #tpu.memory_space<vmem>>, vector<1x1x128x128xbf16>
    %48 = vector.shape_cast %47 : vector<1x1x128x128xbf16> to vector<128x128xbf16>
    %cst_43 = arith.constant dense<0.000000e+00> : vector<256x128xf32>
    %49 = tpu.matmul %46, %48, %cst_43 {dimension_numbers = #tpu.dot_dimension_numbers<[1], [0], [0], [1], [0, 0, 1, 1], [], []>} : vector<256x128xbf16>, vector<128x128xbf16>, vector<256x128xf32> -> vector<256x128xf32>
    %50 = arith.addf %45, %49 : vector<256x128xf32>
    %c254_i32_44 = arith.constant 254 : i32
    %51 = tpu.dynamic_rotate %37 by %c254_i32_44 dim 0 : vector<256x128xf32>, i32 -> vector<256x128xf32>
    %cst_45 = arith.constant 0.000000e+00 : f32
    %52 = vector.broadcast %cst_45 : f32 to vector<256x128xf32>
    %53 = arith.select %9, %51, %52 : vector<256x128xi1>, vector<256x128xf32>
    %54 = arith.truncf %53 : vector<256x128xf32> to vector<256x128xbf16>
    %c0_46 = arith.constant 0 : index
    %c5 = arith.constant 5 : index
    %c0_47 = arith.constant 0 : index
    %c0_48 = arith.constant 0 : index
    %55 = vector.load %arg2[%c0_46, %c5, %c0_47, %c0_48] : memref<3x9x128x128xbf16, #tpu.memory_space<vmem>>, vector<1x1x128x128xbf16>
    %56 = vector.shape_cast %55 : vector<1x1x128x128xbf16> to vector<128x128xbf16>
    %cst_49 = arith.constant dense<0.000000e+00> : vector<256x128xf32>
    %57 = tpu.matmul %54, %56, %cst_49 {dimension_numbers = #tpu.dot_dimension_numbers<[1], [0], [0], [1], [0, 0, 1, 1], [], []>} : vector<256x128xbf16>, vector<128x128xbf16>, vector<256x128xf32> -> vector<256x128xf32>
    %58 = arith.addf %50, %57 : vector<256x128xf32>
    %c6 = arith.constant 6 : index
    %c0_50 = arith.constant 0 : index
    %c0_51 = arith.constant 0 : index
    %59 = vector.load %arg4[%c6, %c0_50, %c0_51] : memref<24x16x128xf32, #tpu.memory_space<vmem>>, vector<16x16x128xf32>
    %60 = vector.shape_cast %59 : vector<16x16x128xf32> to vector<256x128xf32>
    %c2_i32_52 = arith.constant 2 : i32
    %61 = tpu.dynamic_rotate %60 by %c2_i32_52 dim 0 : vector<256x128xf32>, i32 -> vector<256x128xf32>
    %cst_53 = arith.constant 0.000000e+00 : f32
    %62 = vector.broadcast %cst_53 : f32 to vector<256x128xf32>
    %63 = arith.select %11, %61, %62 : vector<256x128xi1>, vector<256x128xf32>
    %64 = arith.truncf %63 : vector<256x128xf32> to vector<256x128xbf16>
    %c0_54 = arith.constant 0 : index
    %c6_55 = arith.constant 6 : index
    %c0_56 = arith.constant 0 : index
    %c0_57 = arith.constant 0 : index
    %65 = vector.load %arg2[%c0_54, %c6_55, %c0_56, %c0_57] : memref<3x9x128x128xbf16, #tpu.memory_space<vmem>>, vector<1x1x128x128xbf16>
    %66 = vector.shape_cast %65 : vector<1x1x128x128xbf16> to vector<128x128xbf16>
    %cst_58 = arith.constant dense<0.000000e+00> : vector<256x128xf32>
    %67 = tpu.matmul %64, %66, %cst_58 {dimension_numbers = #tpu.dot_dimension_numbers<[1], [0], [0], [1], [0, 0, 1, 1], [], []>} : vector<256x128xbf16>, vector<128x128xbf16>, vector<256x128xf32> -> vector<256x128xf32>
    %68 = arith.addf %58, %67 : vector<256x128xf32>
    %69 = arith.truncf %60 : vector<256x128xf32> to vector<256x128xbf16>
    %c0_59 = arith.constant 0 : index
    %c7 = arith.constant 7 : index
    %c0_60 = arith.constant 0 : index
    %c0_61 = arith.constant 0 : index
    %70 = vector.load %arg2[%c0_59, %c7, %c0_60, %c0_61] : memref<3x9x128x128xbf16, #tpu.memory_space<vmem>>, vector<1x1x128x128xbf16>
    %71 = vector.shape_cast %70 : vector<1x1x128x128xbf16> to vector<128x128xbf16>
    %cst_62 = arith.constant dense<0.000000e+00> : vector<256x128xf32>
    %72 = tpu.matmul %69, %71, %cst_62 {dimension_numbers = #tpu.dot_dimension_numbers<[1], [0], [0], [1], [0, 0, 1, 1], [], []>} : vector<256x128xbf16>, vector<128x128xbf16>, vector<256x128xf32> -> vector<256x128xf32>
    %73 = arith.addf %68, %72 : vector<256x128xf32>
    %c254_i32_63 = arith.constant 254 : i32
    %74 = tpu.dynamic_rotate %60 by %c254_i32_63 dim 0 : vector<256x128xf32>, i32 -> vector<256x128xf32>
    %cst_64 = arith.constant 0.000000e+00 : f32
    %75 = vector.broadcast %cst_64 : f32 to vector<256x128xf32>
    %76 = arith.select %9, %74, %75 : vector<256x128xi1>, vector<256x128xf32>
    %77 = arith.truncf %76 : vector<256x128xf32> to vector<256x128xbf16>
    %c0_65 = arith.constant 0 : index
    %c8 = arith.constant 8 : index
    %c0_66 = arith.constant 0 : index
    %c0_67 = arith.constant 0 : index
    %78 = vector.load %arg2[%c0_65, %c8, %c0_66, %c0_67] : memref<3x9x128x128xbf16, #tpu.memory_space<vmem>>, vector<1x1x128x128xbf16>
    %79 = vector.shape_cast %78 : vector<1x1x128x128xbf16> to vector<128x128xbf16>
    %cst_68 = arith.constant dense<0.000000e+00> : vector<256x128xf32>
    %80 = tpu.matmul %77, %79, %cst_68 {dimension_numbers = #tpu.dot_dimension_numbers<[1], [0], [0], [1], [0, 0, 1, 1], [], []>} : vector<256x128xbf16>, vector<128x128xbf16>, vector<256x128xf32> -> vector<256x128xf32>
    %81 = arith.addf %73, %80 : vector<256x128xf32>
    %cst_69 = arith.constant dense<0.000000e+00> : vector<128xf32>
    %82 = vector.multi_reduction <add>, %81, %cst_69 [0] : vector<256x128xf32> to vector<128xf32>
    %83 = vector.shape_cast %82 : vector<128xf32> to vector<1x128xf32>
    %cst_70 = arith.constant 3.906250e-03 : f32
    %84 = vector.broadcast %cst_70 : f32 to vector<1x128xf32>
    %85 = arith.mulf %83, %84 : vector<1x128xf32>
    %86 = arith.mulf %81, %81 : vector<256x128xf32>
    %cst_71 = arith.constant dense<0.000000e+00> : vector<128xf32>
    %87 = vector.multi_reduction <add>, %86, %cst_71 [0] : vector<256x128xf32> to vector<128xf32>
    %88 = vector.shape_cast %87 : vector<128xf32> to vector<1x128xf32>
    %cst_72 = arith.constant 3.906250e-03 : f32
    %89 = vector.broadcast %cst_72 : f32 to vector<1x128xf32>
    %90 = arith.mulf %88, %89 : vector<1x128xf32>
    %91 = arith.mulf %85, %85 : vector<1x128xf32>
    %92 = arith.subf %90, %91 : vector<1x128xf32>
    %93 = vector.broadcast %85 : vector<1x128xf32> to vector<256x128xf32>
    %94 = arith.subf %81, %93 : vector<256x128xf32>
    %cst_73 = arith.constant 9.99999974E-6 : f32
    %95 = vector.broadcast %cst_73 : f32 to vector<1x128xf32>
    %96 = arith.addf %92, %95 : vector<1x128xf32>
    %97 = math.rsqrt %96 : vector<1x128xf32>
    %98 = vector.broadcast %97 : vector<1x128xf32> to vector<256x128xf32>
    %99 = arith.mulf %94, %98 : vector<256x128xf32>
    %cst_74 = arith.constant 0.000000e+00 : f32
    %100 = vector.broadcast %cst_74 : f32 to vector<256x128xf32>
    %101 = arith.maximumf %99, %100 : vector<256x128xf32>
    %102 = vector.shape_cast %101 : vector<256x128xf32> to vector<16x16x128xf32>
    %c4_75 = arith.constant 4 : index
    %c0_76 = arith.constant 0 : index
    %c0_77 = arith.constant 0 : index
    %103 = vector.load %arg4[%c4_75, %c0_76, %c0_77] : memref<24x16x128xf32, #tpu.memory_space<vmem>>, vector<16x16x128xf32>
    tpu.vector_store %arg4[%c4_75, %c0_76, %c0_77], %102 {strides = array<i32>} : memref<24x16x128xf32, #tpu.memory_space<vmem>>, vector<16x16x128xf32>,
    %c12_i32 = arith.constant 12 : i32
    %104 = vector.broadcast %c12_i32 : i32 to vector<256x128xi32>
    %105 = arith.cmpi slt, %4, %104 : vector<256x128xi32>
    %c4_i32 = arith.constant 4 : i32
    %106 = vector.broadcast %c4_i32 : i32 to vector<256x128xi32>
    %107 = arith.cmpi sge, %4, %106 : vector<256x128xi32>
    %cst_78 = arith.constant 0.000000e+00 : f32
    %108 = vector.broadcast %cst_78 : f32 to vector<256x128xf32>
    %c0_79 = arith.constant 0 : index
    %c0_80 = arith.constant 0 : index
    %c0_81 = arith.constant 0 : index
    %109 = vector.load %arg4[%c0_79, %c0_80, %c0_81] : memref<24x16x128xf32, #tpu.memory_space<vmem>>, vector<16x16x128xf32>
    %110 = vector.shape_cast %109 : vector<16x16x128xf32> to vector<256x128xf32>
    %c4_i32_82 = arith.constant 4 : i32
    %111 = tpu.dynamic_rotate %110 by %c4_i32_82 dim 0 : vector<256x128xf32>, i32 -> vector<256x128xf32>
    %cst_83 = arith.constant 0.000000e+00 : f32
    %112 = vector.broadcast %cst_83 : f32 to vector<256x128xf32>
    %113 = arith.select %107, %111, %112 : vector<256x128xi1>, vector<256x128xf32>
    %114 = arith.truncf %113 : vector<256x128xf32> to vector<256x128xbf16>
    %c1_84 = arith.constant 1 : index
    %c0_85 = arith.constant 0 : index
    %c0_86 = arith.constant 0 : index
    %c0_87 = arith.constant 0 : index
    %115 = vector.load %arg2[%c1_84, %c0_85, %c0_86, %c0_87] : memref<3x9x128x128xbf16, #tpu.memory_space<vmem>>, vector<1x1x128x128xbf16>
    %116 = vector.shape_cast %115 : vector<1x1x128x128xbf16> to vector<128x128xbf16>
    %cst_88 = arith.constant dense<0.000000e+00> : vector<256x128xf32>
    %117 = tpu.matmul %114, %116, %cst_88 {dimension_numbers = #tpu.dot_dimension_numbers<[1], [0], [0], [1], [0, 0, 1, 1], [], []>} : vector<256x128xbf16>, vector<128x128xbf16>, vector<256x128xf32> -> vector<256x128xf32>
    %118 = arith.addf %108, %117 : vector<256x128xf32>
    %119 = arith.truncf %110 : vector<256x128xf32> to vector<256x128xbf16>
    %c1_89 = arith.constant 1 : index
    %c1_90 = arith.constant 1 : index
    %c0_91 = arith.constant 0 : index
    %c0_92 = arith.constant 0 : index
    %120 = vector.load %arg2[%c1_89, %c1_90, %c0_91, %c0_92] : memref<3x9x128x128xbf16, #tpu.memory_space<vmem>>, vector<1x1x128x128xbf16>
    %121 = vector.shape_cast %120 : vector<1x1x128x128xbf16> to vector<128x128xbf16>
    %cst_93 = arith.constant dense<0.000000e+00> : vector<256x128xf32>
    %122 = tpu.matmul %119, %121, %cst_93 {dimension_numbers = #tpu.dot_dimension_numbers<[1], [0], [0], [1], [0, 0, 1, 1], [], []>} : vector<256x128xbf16>, vector<128x128xbf16>, vector<256x128xf32> -> vector<256x128xf32>
    %123 = arith.addf %118, %122 : vector<256x128xf32>
    %c252_i32 = arith.constant 252 : i32
    %124 = tpu.dynamic_rotate %110 by %c252_i32 dim 0 : vector<256x128xf32>, i32 -> vector<256x128xf32>
    %cst_94 = arith.constant 0.000000e+00 : f32
    %125 = vector.broadcast %cst_94 : f32 to vector<256x128xf32>
    %126 = arith.select %105, %124, %125 : vector<256x128xi1>, vector<256x128xf32>
    %127 = arith.truncf %126 : vector<256x128xf32> to vector<256x128xbf16>
    %c1_95 = arith.constant 1 : index
    %c2_96 = arith.constant 2 : index
    %c0_97 = arith.constant 0 : index
    %c0_98 = arith.constant 0 : index
    %128 = vector.load %arg2[%c1_95, %c2_96, %c0_97, %c0_98] : memref<3x9x128x128xbf16, #tpu.memory_space<vmem>>, vector<1x1x128x128xbf16>
    %129 = vector.shape_cast %128 : vector<1x1x128x128xbf16> to vector<128x128xbf16>
    %cst_99 = arith.constant dense<0.000000e+00> : vector<256x128xf32>
    %130 = tpu.matmul %127, %129, %cst_99 {dimension_numbers = #tpu.dot_dimension_numbers<[1], [0], [0], [1], [0, 0, 1, 1], [], []>} : vector<256x128xbf16>, vector<128x128xbf16>, vector<256x128xf32> -> vector<256x128xf32>
    %131 = arith.addf %123, %130 : vector<256x128xf32>
    %c4_100 = arith.constant 4 : index
    %c0_101 = arith.constant 0 : index
    %c0_102 = arith.constant 0 : index
    %132 = vector.load %arg4[%c4_100, %c0_101, %c0_102] : memref<24x16x128xf32, #tpu.memory_space<vmem>>, vector<16x16x128xf32>
    %133 = vector.shape_cast %132 : vector<16x16x128xf32> to vector<256x128xf32>
    %c4_i32_103 = arith.constant 4 : i32
    %134 = tpu.dynamic_rotate %133 by %c4_i32_103 dim 0 : vector<256x128xf32>, i32 -> vector<256x128xf32>
    %cst_104 = arith.constant 0.000000e+00 : f32
    %135 = vector.broadcast %cst_104 : f32 to vector<256x128xf32>
    %136 = arith.select %107, %134, %135 : vector<256x128xi1>, vector<256x128xf32>
    %137 = arith.truncf %136 : vector<256x128xf32> to vector<256x128xbf16>
    %c1_105 = arith.constant 1 : index
    %c3_106 = arith.constant 3 : index
    %c0_107 = arith.constant 0 : index
    %c0_108 = arith.constant 0 : index
    %138 = vector.load %arg2[%c1_105, %c3_106, %c0_107, %c0_108] : memref<3x9x128x128xbf16, #tpu.memory_space<vmem>>, vector<1x1x128x128xbf16>
    %139 = vector.shape_cast %138 : vector<1x1x128x128xbf16> to vector<128x128xbf16>
    %cst_109 = arith.constant dense<0.000000e+00> : vector<256x128xf32>
    %140 = tpu.matmul %137, %139, %cst_109 {dimension_numbers = #tpu.dot_dimension_numbers<[1], [0], [0], [1], [0, 0, 1, 1], [], []>} : vector<256x128xbf16>, vector<128x128xbf16>, vector<256x128xf32> -> vector<256x128xf32>
    %141 = arith.addf %131, %140 : vector<256x128xf32>
    %142 = arith.truncf %133 : vector<256x128xf32> to vector<256x128xbf16>
    %c1_110 = arith.constant 1 : index
    %c4_111 = arith.constant 4 : index
    %c0_112 = arith.constant 0 : index
    %c0_113 = arith.constant 0 : index
    %143 = vector.load %arg2[%c1_110, %c4_111, %c0_112, %c0_113] : memref<3x9x128x128xbf16, #tpu.memory_space<vmem>>, vector<1x1x128x128xbf16>
    %144 = vector.shape_cast %143 : vector<1x1x128x128xbf16> to vector<128x128xbf16>
    %cst_114 = arith.constant dense<0.000000e+00> : vector<256x128xf32>
    %145 = tpu.matmul %142, %144, %cst_114 {dimension_numbers = #tpu.dot_dimension_numbers<[1], [0], [0], [1], [0, 0, 1, 1], [], []>} : vector<256x128xbf16>, vector<128x128xbf16>, vector<256x128xf32> -> vector<256x128xf32>
    %146 = arith.addf %141, %145 : vector<256x128xf32>
    %c252_i32_115 = arith.constant 252 : i32
    %147 = tpu.dynamic_rotate %133 by %c252_i32_115 dim 0 : vector<256x128xf32>, i32 -> vector<256x128xf32>
    %cst_116 = arith.constant 0.000000e+00 : f32
    %148 = vector.broadcast %cst_116 : f32 to vector<256x128xf32>
    %149 = arith.select %105, %147, %148 : vector<256x128xi1>, vector<256x128xf32>
    %150 = arith.truncf %149 : vector<256x128xf32> to vector<256x128xbf16>
    %c1_117 = arith.constant 1 : index
    %c5_118 = arith.constant 5 : index
    %c0_119 = arith.constant 0 : index
    %c0_120 = arith.constant 0 : index
    %151 = vector.load %arg2[%c1_117, %c5_118, %c0_119, %c0_120] : memref<3x9x128x128xbf16, #tpu.memory_space<vmem>>, vector<1x1x128x128xbf16>
    %152 = vector.shape_cast %151 : vector<1x1x128x128xbf16> to vector<128x128xbf16>
    %cst_121 = arith.constant dense<0.000000e+00> : vector<256x128xf32>
    %153 = tpu.matmul %150, %152, %cst_121 {dimension_numbers = #tpu.dot_dimension_numbers<[1], [0], [0], [1], [0, 0, 1, 1], [], []>} : vector<256x128xbf16>, vector<128x128xbf16>, vector<256x128xf32> -> vector<256x128xf32>
    %154 = arith.addf %146, %153 : vector<256x128xf32>
    %c8_122 = arith.constant 8 : index
    %c0_123 = arith.constant 0 : index
    %c0_124 = arith.constant 0 : index
    %155 = vector.load %arg4[%c8_122, %c0_123, %c0_124] : memref<24x16x128xf32, #tpu.memory_space<vmem>>, vector<16x16x128xf32>
    %156 = vector.shape_cast %155 : vector<16x16x128xf32> to vector<256x128xf32>
    %c4_i32_125 = arith.constant 4 : i32
    %157 = tpu.dynamic_rotate %156 by %c4_i32_125 dim 0 : vector<256x128xf32>, i32 -> vector<256x128xf32>
    %cst_126 = arith.constant 0.000000e+00 : f32
    %158 = vector.broadcast %cst_126 : f32 to vector<256x128xf32>
    %159 = arith.select %107, %157, %158 : vector<256x128xi1>, vector<256x128xf32>
    %160 = arith.truncf %159 : vector<256x128xf32> to vector<256x128xbf16>
    %c1_127 = arith.constant 1 : index
    %c6_128 = arith.constant 6 : index
    %c0_129 = arith.constant 0 : index
    %c0_130 = arith.constant 0 : index
    %161 = vector.load %arg2[%c1_127, %c6_128, %c0_129, %c0_130] : memref<3x9x128x128xbf16, #tpu.memory_space<vmem>>, vector<1x1x128x128xbf16>
    %162 = vector.shape_cast %161 : vector<1x1x128x128xbf16> to vector<128x128xbf16>
    %cst_131 = arith.constant dense<0.000000e+00> : vector<256x128xf32>
    %163 = tpu.matmul %160, %162, %cst_131 {dimension_numbers = #tpu.dot_dimension_numbers<[1], [0], [0], [1], [0, 0, 1, 1], [], []>} : vector<256x128xbf16>, vector<128x128xbf16>, vector<256x128xf32> -> vector<256x128xf32>
    %164 = arith.addf %154, %163 : vector<256x128xf32>
    %165 = arith.truncf %156 : vector<256x128xf32> to vector<256x128xbf16>
    %c1_132 = arith.constant 1 : index
    %c7_133 = arith.constant 7 : index
    %c0_134 = arith.constant 0 : index
    %c0_135 = arith.constant 0 : index
    %166 = vector.load %arg2[%c1_132, %c7_133, %c0_134, %c0_135] : memref<3x9x128x128xbf16, #tpu.memory_space<vmem>>, vector<1x1x128x128xbf16>
    %167 = vector.shape_cast %166 : vector<1x1x128x128xbf16> to vector<128x128xbf16>
    %cst_136 = arith.constant dense<0.000000e+00> : vector<256x128xf32>
    %168 = tpu.matmul %165, %167, %cst_136 {dimension_numbers = #tpu.dot_dimension_numbers<[1], [0], [0], [1], [0, 0, 1, 1], [], []>} : vector<256x128xbf16>, vector<128x128xbf16>, vector<256x128xf32> -> vector<256x128xf32>
    %169 = arith.addf %164, %168 : vector<256x128xf32>
    %c252_i32_137 = arith.constant 252 : i32
    %170 = tpu.dynamic_rotate %156 by %c252_i32_137 dim 0 : vector<256x128xf32>, i32 -> vector<256x128xf32>
    %cst_138 = arith.constant 0.000000e+00 : f32
    %171 = vector.broadcast %cst_138 : f32 to vector<256x128xf32>
    %172 = arith.select %105, %170, %171 : vector<256x128xi1>, vector<256x128xf32>
    %173 = arith.truncf %172 : vector<256x128xf32> to vector<256x128xbf16>
    %c1_139 = arith.constant 1 : index
    %c8_140 = arith.constant 8 : index
    %c0_141 = arith.constant 0 : index
    %c0_142 = arith.constant 0 : index
    %174 = vector.load %arg2[%c1_139, %c8_140, %c0_141, %c0_142] : memref<3x9x128x128xbf16, #tpu.memory_space<vmem>>, vector<1x1x128x128xbf16>
    %175 = vector.shape_cast %174 : vector<1x1x128x128xbf16> to vector<128x128xbf16>
    %cst_143 = arith.constant dense<0.000000e+00> : vector<256x128xf32>
    %176 = tpu.matmul %173, %175, %cst_143 {dimension_numbers = #tpu.dot_dimension_numbers<[1], [0], [0], [1], [0, 0, 1, 1], [], []>} : vector<256x128xbf16>, vector<128x128xbf16>, vector<256x128xf32> -> vector<256x128xf32>
    %177 = arith.addf %169, %176 : vector<256x128xf32>
    %cst_144 = arith.constant dense<0.000000e+00> : vector<128xf32>
    %178 = vector.multi_reduction <add>, %177, %cst_144 [0] : vector<256x128xf32> to vector<128xf32>
    %179 = vector.shape_cast %178 : vector<128xf32> to vector<1x128xf32>
    %cst_145 = arith.constant 3.906250e-03 : f32
    %180 = vector.broadcast %cst_145 : f32 to vector<1x128xf32>
    %181 = arith.mulf %179, %180 : vector<1x128xf32>
    %182 = arith.mulf %177, %177 : vector<256x128xf32>
    %cst_146 = arith.constant dense<0.000000e+00> : vector<128xf32>
    %183 = vector.multi_reduction <add>, %182, %cst_146 [0] : vector<256x128xf32> to vector<128xf32>
    %184 = vector.shape_cast %183 : vector<128xf32> to vector<1x128xf32>
    %cst_147 = arith.constant 3.906250e-03 : f32
    %185 = vector.broadcast %cst_147 : f32 to vector<1x128xf32>
    %186 = arith.mulf %184, %185 : vector<1x128xf32>
    %187 = arith.mulf %181, %181 : vector<1x128xf32>
    %188 = arith.subf %186, %187 : vector<1x128xf32>
    %189 = vector.broadcast %181 : vector<1x128xf32> to vector<256x128xf32>
    %190 = arith.subf %177, %189 : vector<256x128xf32>
    %cst_148 = arith.constant 9.99999974E-6 : f32
    %191 = vector.broadcast %cst_148 : f32 to vector<1x128xf32>
    %192 = arith.addf %188, %191 : vector<1x128xf32>
    %193 = math.rsqrt %192 : vector<1x128xf32>
    %194 = vector.broadcast %193 : vector<1x128xf32> to vector<256x128xf32>
    %195 = arith.mulf %190, %194 : vector<256x128xf32>
    %cst_149 = arith.constant 0.000000e+00 : f32
    %196 = vector.broadcast %cst_149 : f32 to vector<256x128xf32>
    %197 = arith.maximumf %195, %196 : vector<256x128xf32>
    %198 = vector.shape_cast %197 : vector<256x128xf32> to vector<16x16x128xf32>
    %c4_150 = arith.constant 4 : index
    %c0_151 = arith.constant 0 : index
    %c0_152 = arith.constant 0 : index
    %199 = vector.load %arg4[%c4_150, %c0_151, %c0_152] : memref<24x16x128xf32, #tpu.memory_space<vmem>>, vector<16x16x128xf32>
    tpu.vector_store %arg4[%c4_150, %c0_151, %c0_152], %198 {strides = array<i32>} : memref<24x16x128xf32, #tpu.memory_space<vmem>>, vector<16x16x128xf32>,
    %c12_i32_153 = arith.constant 12 : i32
    %200 = vector.broadcast %c12_i32_153 : i32 to vector<256x128xi32>
    %201 = arith.cmpi slt, %4, %200 : vector<256x128xi32>
    %c4_i32_154 = arith.constant 4 : i32
    %202 = vector.broadcast %c4_i32_154 : i32 to vector<256x128xi32>
    %203 = arith.cmpi sge, %4, %202 : vector<256x128xi32>
    %cst_155 = arith.constant 0.000000e+00 : f32
    %204 = vector.broadcast %cst_155 : f32 to vector<256x128xf32>
    %c0_156 = arith.constant 0 : index
    %c0_157 = arith.constant 0 : index
    %c0_158 = arith.constant 0 : index
    %205 = vector.load %arg4[%c0_156, %c0_157, %c0_158] : memref<24x16x128xf32, #tpu.memory_space<vmem>>, vector<16x16x128xf32>
    %206 = vector.shape_cast %205 : vector<16x16x128xf32> to vector<256x128xf32>
    %c4_i32_159 = arith.constant 4 : i32
    %207 = tpu.dynamic_rotate %206 by %c4_i32_159 dim 0 : vector<256x128xf32>, i32 -> vector<256x128xf32>
    %cst_160 = arith.constant 0.000000e+00 : f32
    %208 = vector.broadcast %cst_160 : f32 to vector<256x128xf32>
    %209 = arith.select %203, %207, %208 : vector<256x128xi1>, vector<256x128xf32>
    %210 = arith.truncf %209 : vector<256x128xf32> to vector<256x128xbf16>
    %c2_161 = arith.constant 2 : index
    %c0_162 = arith.constant 0 : index
    %c0_163 = arith.constant 0 : index
    %c0_164 = arith.constant 0 : index
    %211 = vector.load %arg2[%c2_161, %c0_162, %c0_163, %c0_164] : memref<3x9x128x128xbf16, #tpu.memory_space<vmem>>, vector<1x1x128x128xbf16>
    %212 = vector.shape_cast %211 : vector<1x1x128x128xbf16> to vector<128x128xbf16>
    %cst_165 = arith.constant dense<0.000000e+00> : vector<256x128xf32>
    %213 = tpu.matmul %210, %212, %cst_165 {dimension_numbers = #tpu.dot_dimension_numbers<[1], [0], [0], [1], [0, 0, 1, 1], [], []>} : vector<256x128xbf16>, vector<128x128xbf16>, vector<256x128xf32> -> vector<256x128xf32>
    %214 = arith.addf %204, %213 : vector<256x128xf32>
    %215 = arith.truncf %206 : vector<256x128xf32> to vector<256x128xbf16>
    %c2_166 = arith.constant 2 : index
    %c1_167 = arith.constant 1 : index
    %c0_168 = arith.constant 0 : index
    %c0_169 = arith.constant 0 : index
    %216 = vector.load %arg2[%c2_166, %c1_167, %c0_168, %c0_169] : memref<3x9x128x128xbf16, #tpu.memory_space<vmem>>, vector<1x1x128x128xbf16>
    %217 = vector.shape_cast %216 : vector<1x1x128x128xbf16> to vector<128x128xbf16>
    %cst_170 = arith.constant dense<0.000000e+00> : vector<256x128xf32>
    %218 = tpu.matmul %215, %217, %cst_170 {dimension_numbers = #tpu.dot_dimension_numbers<[1], [0], [0], [1], [0, 0, 1, 1], [], []>} : vector<256x128xbf16>, vector<128x128xbf16>, vector<256x128xf32> -> vector<256x128xf32>
    %219 = arith.addf %214, %218 : vector<256x128xf32>
    %c252_i32_171 = arith.constant 252 : i32
    %220 = tpu.dynamic_rotate %206 by %c252_i32_171 dim 0 : vector<256x128xf32>, i32 -> vector<256x128xf32>
    %cst_172 = arith.constant 0.000000e+00 : f32
    %221 = vector.broadcast %cst_172 : f32 to vector<256x128xf32>
    %222 = arith.select %201, %220, %221 : vector<256x128xi1>, vector<256x128xf32>
    %223 = arith.truncf %222 : vector<256x128xf32> to vector<256x128xbf16>
    %c2_173 = arith.constant 2 : index
    %c2_174 = arith.constant 2 : index
    %c0_175 = arith.constant 0 : index
    %c0_176 = arith.constant 0 : index
    %224 = vector.load %arg2[%c2_173, %c2_174, %c0_175, %c0_176] : memref<3x9x128x128xbf16, #tpu.memory_space<vmem>>, vector<1x1x128x128xbf16>
    %225 = vector.shape_cast %224 : vector<1x1x128x128xbf16> to vector<128x128xbf16>
    %cst_177 = arith.constant dense<0.000000e+00> : vector<256x128xf32>
    %226 = tpu.matmul %223, %225, %cst_177 {dimension_numbers = #tpu.dot_dimension_numbers<[1], [0], [0], [1], [0, 0, 1, 1], [], []>} : vector<256x128xbf16>, vector<128x128xbf16>, vector<256x128xf32> -> vector<256x128xf32>
    %227 = arith.addf %219, %226 : vector<256x128xf32>
    %c4_178 = arith.constant 4 : index
    %c0_179 = arith.constant 0 : index
    %c0_180 = arith.constant 0 : index
    %228 = vector.load %arg4[%c4_178, %c0_179, %c0_180] : memref<24x16x128xf32, #tpu.memory_space<vmem>>, vector<16x16x128xf32>
    %229 = vector.shape_cast %228 : vector<16x16x128xf32> to vector<256x128xf32>
    %c4_i32_181 = arith.constant 4 : i32
    %230 = tpu.dynamic_rotate %229 by %c4_i32_181 dim 0 : vector<256x128xf32>, i32 -> vector<256x128xf32>
    %cst_182 = arith.constant 0.000000e+00 : f32
    %231 = vector.broadcast %cst_182 : f32 to vector<256x128xf32>
    %232 = arith.select %203, %230, %231 : vector<256x128xi1>, vector<256x128xf32>
    %233 = arith.truncf %232 : vector<256x128xf32> to vector<256x128xbf16>
    %c2_183 = arith.constant 2 : index
    %c3_184 = arith.constant 3 : index
    %c0_185 = arith.constant 0 : index
    %c0_186 = arith.constant 0 : index
    %234 = vector.load %arg2[%c2_183, %c3_184, %c0_185, %c0_186] : memref<3x9x128x128xbf16, #tpu.memory_space<vmem>>, vector<1x1x128x128xbf16>
    %235 = vector.shape_cast %234 : vector<1x1x128x128xbf16> to vector<128x128xbf16>
    %cst_187 = arith.constant dense<0.000000e+00> : vector<256x128xf32>
    %236 = tpu.matmul %233, %235, %cst_187 {dimension_numbers = #tpu.dot_dimension_numbers<[1], [0], [0], [1], [0, 0, 1, 1], [], []>} : vector<256x128xbf16>, vector<128x128xbf16>, vector<256x128xf32> -> vector<256x128xf32>
    %237 = arith.addf %227, %236 : vector<256x128xf32>
    %238 = arith.truncf %229 : vector<256x128xf32> to vector<256x128xbf16>
    %c2_188 = arith.constant 2 : index
    %c4_189 = arith.constant 4 : index
    %c0_190 = arith.constant 0 : index
    %c0_191 = arith.constant 0 : index
    %239 = vector.load %arg2[%c2_188, %c4_189, %c0_190, %c0_191] : memref<3x9x128x128xbf16, #tpu.memory_space<vmem>>, vector<1x1x128x128xbf16>
    %240 = vector.shape_cast %239 : vector<1x1x128x128xbf16> to vector<128x128xbf16>
    %cst_192 = arith.constant dense<0.000000e+00> : vector<256x128xf32>
    %241 = tpu.matmul %238, %240, %cst_192 {dimension_numbers = #tpu.dot_dimension_numbers<[1], [0], [0], [1], [0, 0, 1, 1], [], []>} : vector<256x128xbf16>, vector<128x128xbf16>, vector<256x128xf32> -> vector<256x128xf32>
    %242 = arith.addf %237, %241 : vector<256x128xf32>
    %c252_i32_193 = arith.constant 252 : i32
    %243 = tpu.dynamic_rotate %229 by %c252_i32_193 dim 0 : vector<256x128xf32>, i32 -> vector<256x128xf32>
    %cst_194 = arith.constant 0.000000e+00 : f32
    %244 = vector.broadcast %cst_194 : f32 to vector<256x128xf32>
    %245 = arith.select %201, %243, %244 : vector<256x128xi1>, vector<256x128xf32>
    %246 = arith.truncf %245 : vector<256x128xf32> to vector<256x128xbf16>
    %c2_195 = arith.constant 2 : index
    %c5_196 = arith.constant 5 : index
    %c0_197 = arith.constant 0 : index
    %c0_198 = arith.constant 0 : index
    %247 = vector.load %arg2[%c2_195, %c5_196, %c0_197, %c0_198] : memref<3x9x128x128xbf16, #tpu.memory_space<vmem>>, vector<1x1x128x128xbf16>
    %248 = vector.shape_cast %247 : vector<1x1x128x128xbf16> to vector<128x128xbf16>
    %cst_199 = arith.constant dense<0.000000e+00> : vector<256x128xf32>
    %249 = tpu.matmul %246, %248, %cst_199 {dimension_numbers = #tpu.dot_dimension_numbers<[1], [0], [0], [1], [0, 0, 1, 1], [], []>} : vector<256x128xbf16>, vector<128x128xbf16>, vector<256x128xf32> -> vector<256x128xf32>
    %250 = arith.addf %242, %249 : vector<256x128xf32>
    %c8_200 = arith.constant 8 : index
    %c0_201 = arith.constant 0 : index
    %c0_202 = arith.constant 0 : index
    %251 = vector.load %arg4[%c8_200, %c0_201, %c0_202] : memref<24x16x128xf32, #tpu.memory_space<vmem>>, vector<16x16x128xf32>
    %252 = vector.shape_cast %251 : vector<16x16x128xf32> to vector<256x128xf32>
    %c4_i32_203 = arith.constant 4 : i32
    %253 = tpu.dynamic_rotate %252 by %c4_i32_203 dim 0 : vector<256x128xf32>, i32 -> vector<256x128xf32>
    %cst_204 = arith.constant 0.000000e+00 : f32
    %254 = vector.broadcast %cst_204 : f32 to vector<256x128xf32>
    %255 = arith.select %203, %253, %254 : vector<256x128xi1>, vector<256x128xf32>
    %256 = arith.truncf %255 : vector<256x128xf32> to vector<256x128xbf16>
    %c2_205 = arith.constant 2 : index
    %c6_206 = arith.constant 6 : index
    %c0_207 = arith.constant 0 : index
    %c0_208 = arith.constant 0 : index
    %257 = vector.load %arg2[%c2_205, %c6_206, %c0_207, %c0_208] : memref<3x9x128x128xbf16, #tpu.memory_space<vmem>>, vector<1x1x128x128xbf16>
    %258 = vector.shape_cast %257 : vector<1x1x128x128xbf16> to vector<128x128xbf16>
    %cst_209 = arith.constant dense<0.000000e+00> : vector<256x128xf32>
    %259 = tpu.matmul %256, %258, %cst_209 {dimension_numbers = #tpu.dot_dimension_numbers<[1], [0], [0], [1], [0, 0, 1, 1], [], []>} : vector<256x128xbf16>, vector<128x128xbf16>, vector<256x128xf32> -> vector<256x128xf32>
    %260 = arith.addf %250, %259 : vector<256x128xf32>
    %261 = arith.truncf %252 : vector<256x128xf32> to vector<256x128xbf16>
    %c2_210 = arith.constant 2 : index
    %c7_211 = arith.constant 7 : index
    %c0_212 = arith.constant 0 : index
    %c0_213 = arith.constant 0 : index
    %262 = vector.load %arg2[%c2_210, %c7_211, %c0_212, %c0_213] : memref<3x9x128x128xbf16, #tpu.memory_space<vmem>>, vector<1x1x128x128xbf16>
    %263 = vector.shape_cast %262 : vector<1x1x128x128xbf16> to vector<128x128xbf16>
    %cst_214 = arith.constant dense<0.000000e+00> : vector<256x128xf32>
    %264 = tpu.matmul %261, %263, %cst_214 {dimension_numbers = #tpu.dot_dimension_numbers<[1], [0], [0], [1], [0, 0, 1, 1], [], []>} : vector<256x128xbf16>, vector<128x128xbf16>, vector<256x128xf32> -> vector<256x128xf32>
    %265 = arith.addf %260, %264 : vector<256x128xf32>
    %c252_i32_215 = arith.constant 252 : i32
    %266 = tpu.dynamic_rotate %252 by %c252_i32_215 dim 0 : vector<256x128xf32>, i32 -> vector<256x128xf32>
    %cst_216 = arith.constant 0.000000e+00 : f32
    %267 = vector.broadcast %cst_216 : f32 to vector<256x128xf32>
    %268 = arith.select %201, %266, %267 : vector<256x128xi1>, vector<256x128xf32>
    %269 = arith.truncf %268 : vector<256x128xf32> to vector<256x128xbf16>
    %c2_217 = arith.constant 2 : index
    %c8_218 = arith.constant 8 : index
    %c0_219 = arith.constant 0 : index
    %c0_220 = arith.constant 0 : index
    %270 = vector.load %arg2[%c2_217, %c8_218, %c0_219, %c0_220] : memref<3x9x128x128xbf16, #tpu.memory_space<vmem>>, vector<1x1x128x128xbf16>
    %271 = vector.shape_cast %270 : vector<1x1x128x128xbf16> to vector<128x128xbf16>
    %cst_221 = arith.constant dense<0.000000e+00> : vector<256x128xf32>
    %272 = tpu.matmul %269, %271, %cst_221 {dimension_numbers = #tpu.dot_dimension_numbers<[1], [0], [0], [1], [0, 0, 1, 1], [], []>} : vector<256x128xbf16>, vector<128x128xbf16>, vector<256x128xf32> -> vector<256x128xf32>
    %273 = arith.addf %265, %272 : vector<256x128xf32>
    %cst_222 = arith.constant dense<0.000000e+00> : vector<128xf32>
    %274 = vector.multi_reduction <add>, %273, %cst_222 [0] : vector<256x128xf32> to vector<128xf32>
    %275 = vector.shape_cast %274 : vector<128xf32> to vector<1x128xf32>
    %cst_223 = arith.constant 3.906250e-03 : f32
    %276 = vector.broadcast %cst_223 : f32 to vector<1x128xf32>
    %277 = arith.mulf %275, %276 : vector<1x128xf32>
    %278 = arith.mulf %273, %273 : vector<256x128xf32>
    %cst_224 = arith.constant dense<0.000000e+00> : vector<128xf32>
    %279 = vector.multi_reduction <add>, %278, %cst_224 [0] : vector<256x128xf32> to vector<128xf32>
    %280 = vector.shape_cast %279 : vector<128xf32> to vector<1x128xf32>
    %cst_225 = arith.constant 3.906250e-03 : f32
    %281 = vector.broadcast %cst_225 : f32 to vector<1x128xf32>
    %282 = arith.mulf %280, %281 : vector<1x128xf32>
    %283 = arith.mulf %277, %277 : vector<1x128xf32>
    %284 = arith.subf %282, %283 : vector<1x128xf32>
    %285 = vector.broadcast %277 : vector<1x128xf32> to vector<256x128xf32>
    %286 = arith.subf %273, %285 : vector<256x128xf32>
    %cst_226 = arith.constant 9.99999974E-6 : f32
    %287 = vector.broadcast %cst_226 : f32 to vector<1x128xf32>
    %288 = arith.addf %284, %287 : vector<1x128xf32>
    %289 = math.rsqrt %288 : vector<1x128xf32>
    %290 = vector.broadcast %289 : vector<1x128xf32> to vector<256x128xf32>
    %291 = arith.mulf %286, %290 : vector<256x128xf32>
    %cst_227 = arith.constant 0.000000e+00 : f32
    %292 = vector.broadcast %cst_227 : f32 to vector<256x128xf32>
    %293 = arith.maximumf %291, %292 : vector<256x128xf32>
    %c0_228 = arith.constant 0 : index
    %c0_229 = arith.constant 0 : index
    %c0_230 = arith.constant 0 : index
    %c0_231 = arith.constant 0 : index
    %294 = vector.load %arg1[%c0_228, %c0_229, %c0_230, %c0_231] : memref<1x16x16x128xf32, #tpu.memory_space<vmem>>, vector<1x16x16x128xf32>
    %295 = vector.shape_cast %294 : vector<1x16x16x128xf32> to vector<16x16x128xf32>
    %296 = vector.shape_cast %293 : vector<256x128xf32> to vector<16x16x128xf32>
    %297 = arith.addf %295, %296 : vector<16x16x128xf32>
    %c0_232 = arith.constant 0 : index
    %c0_233 = arith.constant 0 : index
    %c0_234 = arith.constant 0 : index
    %c0_235 = arith.constant 0 : index
    %298 = vector.load %arg3[%c0_232, %c0_233, %c0_234, %c0_235] : memref<1x16x16x128xf32, #tpu.memory_space<vmem>>, vector<1x16x16x128xf32>
    %299 = vector.shape_cast %298 : vector<1x16x16x128xf32> to vector<16x16x128xf32>
    %300 = vector.shape_cast %297 : vector<16x16x128xf32> to vector<1x16x16x128xf32>
    tpu.vector_store %arg3[%c0_232, %c0_233, %c0_234, %c0_235], %300 {strides = array<i32>} : memref<1x16x16x128xf32, #tpu.memory_space<vmem>>, vector<1x16x16x128xf32>,
    return
  }
  func.func @transform_0(%arg0: i32) -> (i32, i32, i32, i32) {
    %c0_i32 = arith.constant 0 : i32
    %c0_i32_0 = arith.constant 0 : i32
    %c0_i32_1 = arith.constant 0 : i32
    %c0_i32_2 = arith.constant 0 : i32
    return %arg0, %c0_i32, %c0_i32_0, %c0_i32_1 : i32, i32, i32, i32
  }
  func.func @transform_1(%arg0: i32) -> (i32, i32, i32, i32) {
    %c0_i32 = arith.constant 0 : i32
    %c0_i32_0 = arith.constant 0 : i32
    %c0_i32_1 = arith.constant 0 : i32
    %c0_i32_2 = arith.constant 0 : i32
    %c0_i32_3 = arith.constant 0 : i32
    return %c0_i32, %c0_i32_0, %c0_i32_1, %c0_i32_2 : i32, i32, i32, i32
  }
  func.func @transform_2(%arg0: i32) -> (i32, i32, i32, i32) {
    %c0_i32 = arith.constant 0 : i32
    %c0_i32_0 = arith.constant 0 : i32
    %c0_i32_1 = arith.constant 0 : i32
    %c0_i32_2 = arith.constant 0 : i32
    return %arg0, %c0_i32, %c0_i32_0, %c0_i32_1 : i32, i32, i32, i32
  }
}

</mosaic_0001>

<bundles_post_ra>
// kernel: the_dilation_forward.1
= control target key start
LH: loop header
LB: loop body
LE: loop exit
PB: predicated region body
PF: predicated region fallthrough
CT: control target
= control target key end

     0   :  { %7 = vsyncpa [#allocation4], 0  ;;  %s17855_s0 = inlined_call_operand.hbm [shape: f32[2,16,16,128], index: 0, kind: input, shape index: {}]   ;;  %s17856_s1 = inlined_call_operand.hbm [shape: bf16[3,9,128,128], index: 1, kind: input, shape index: {}]   ;;  %s17857_s2 = inlined_call_operand.hbm [shape: f32[2,16,16,128], index: 2, kind: output, shape index: {}]  }
   0x1   :  { %9 = vsyncpa [#allocation4 + $0x1], 0 }
   0x2   :  { %10 = vsyncpa [#allocation7], 0 }
   0x3   :  { %11 = vsyncpa [#allocation5], 0 }
   0x4   :  { %13 = vsyncpa [#allocation5 + $0x1], 0  ;;  %s14274_s9 = smov 0   ;;  %s14276_s10 = smov 0  }
   0x5   :  { %s14278_s11 = smov 0   ;;  %s14280_s12 = smov 0  }
   0x6 LB: > { %s14295_s13 = sadd.s32 4294967295, %s14245_s12   ;;  %s9995_s14 = sadd.s32 4294967294, %s14245_s12   ;;  %s14245_s12 = sphi %s14280_s12, %s18183_s12   ;;  %s14241_s11 = sphi %s14278_s11, %s18182_s11   ;;  %s14237_s10 = sphi %s14276_s10, %s18181_s10   ;;  %s14233_s9 = sphi %s14274_s9, %s18180_s9  }
   0x7   : > { %p39_p0 = scmp.ne.s32.totalorder %s14237_s10, %s14233_s9  ;;  %p17858_p1 = scmp.eq.s32.totalorder %s14295_s13, 0 }
   0x8   : > { %p90_p3 = scmp.eq.s32.totalorder %s9995_s14, 1  ;;  %p9996_p5 = scmp.ge.s32.totalorder %s14245_s12, 1 }
   0x9   : > { %p14304_p4 = por %p17858_p1, %p39_p0  ;;  %p97_p7 = scmp.lt.s32.totalorder %s14245_s12, 3 }
   0xa   : > { %p14309_p6 = por %p90_p3, %p39_p0  ;;  %s14247_s18 = smov [#allocation6]  }
   0xb   : > { %s17957_s15 = scalar_select %p14304_p4, 1, 0 }
   0xc   : > { %s17958_s16 = scalar_select %p14309_p6, 1, 0 }
   0xd   : > { %p14314_p8 = pnand %p9996_p5, %p97_p7  ;;  %s109_s19 = sshll.u32 %s14247_s18, 4  ;;  %s14318_s19 = int_to_ptr.vmem [resolvable:$true] %s109_s19 }
   0xe   : > { %s14330_s21 = sadd.s32 1, %s14245_s12   ;;  %s26_s22 = sadd.s32 1, %s14241_s11 }
   0xf   : > { %s17959_s17 = scalar_select %p14314_p8, 1, 0 }
  0x10   : > { %p13829_p9 = pneg %p14314_p8  ;;  %s23_s23 = ssub.s32 %s14245_s12, %s14330_s21 }
  0x11   : > { %s14117_s26 = scalar_lea.hbm %s17856_s1, 27648 }
  0x12   : > { %p14325_p11 = pnand %p13829_p9, %p17858_p1  ;;  %p14118_p12 = scmp.ne.s32.totalorder %s17856_s1, %s14117_s26 }
  0x13   : > { %p14124_p5 = scmp.lt.u32.totalorder %s14117_s26, %s17856_s1 }
  0x14   : > { %p14119_p13 = pneg %p14325_p11 }
  0x16   : > { %p14120_p0 = pnand %p14119_p13, %p14118_p12 }
  0x18   : > { %p14121_p3 = pneg %p14120_p0 }
  0x1a   : > { %p14126_p7 = pnand %p14124_p5, %p14121_p3 }
  0x1c   : > { %14129 = shalt.err (!%p14126_p7)
}
  0x1d   : > { %s14130_s3 = scalar_lea.vmem %s14318_s19, 27648  ;;  %p14138_p2 = scmp.lt.s32.totalorder %s14318_s19, %s14318_s19 }
  0x1e   : > { %p14131_p9 = scmp.ne.s32.totalorder %s14318_s19, %s14130_s3  ;;  %p14139_p6 = scmp.lt.s32.totalorder %s14130_s3, %s14130_s3 }
  0x20   : > { %p14133_p10 = pnand %p14131_p9, %p14119_p13  ;;  %p14140_p4 = por %p14139_p6, %p14138_p2 }
  0x22   : > { %p14134_p1 = pneg %p14133_p10 }
  0x24   : > { %p14141_p8 = pnand %p14140_p4, %p14134_p1 }
  0x26   : > { %14144 = shalt.err (!%p14141_p8)
}
  0x27   : > { %s14248_s4 = smov 64   ;;  %s14249_s5 = smov 4  }
  0x28   : > { %13832 = dma.hbm_to_vmem [thread:$0]  (!%p14325_p11), %s17856_s1, 27648, %s14318_s19, [#allocation7], %s14248_s4, %s14248_s4, %s14249_s5  }
  0x29   : > { %p24_p2 = scmp.eq.s32.totalorder %s23_s23, 0  ;;  %p33_p1 = scmp.ne.s32.totalorder %s14241_s11, %s14237_s10 }
  0x2a   : > { %p34_p4 = scmp.eq.s32.totalorder %s14245_s12, 0  ;;  %p13842_p6 = scmp.lt.s32.totalorder %s14245_s12, 2 }
  0x2b   : > { %s14361_s8 = scalar_select %p24_p2, %s14241_s11, %s26_s22  }
  0x2c   : > { %p35_p8 = por %p34_p4, %p33_p1  ;;  %p17961_p10 = scmp.eq.s32.totalorder %s14295_s13, 1 }
  0x2d   : > { %s123_s18 = sand.u32 1, %s14241_s11   ;;  %s11091_s24 = sshll.u32 %s14245_s12, 12 }
  0x2e   : > { %p14365_p12 = por %p17961_p10, %p33_p1  ;;  %s9999_s25 = sshll.u32 %s123_s18, 8 }
  0x2f   : > { %s14374_s27 = scalar_lea.hbm %s17855_s0, %s11091_s24  ;;  %s127_s19 = scalar_lea.vmem [#allocation3], %s9999_s25 }
  0x30   : > { %s134_s22 = sshll.u32 %s127_s19, 4  ;;  %p14376_p11 = pnand %p13842_p6, %p35_p8  ;;  %s14380_s22 = int_to_ptr.vmem [resolvable:$true] %s134_s22 }
  0x31   : > { %s14382_s28 = scalar_lea.sflag [#allocation4], %s123_s18  ;;  %s14145_s29 = scalar_lea.hbm %s14374_s27, 4096 }
  0x32   : > { %p14146_p13 = scmp.ne.s32.totalorder %s14374_s27, %s14145_s29  ;;  %p14147_p0 = pneg %p14376_p11 }
  0x33   : > { %s14150_s4 = scalar_lea.hbm %s17855_s0, 8192  ;;  %p14151_p7 = scmp.lt.u32.totalorder %s14374_s27, %s17855_s0 }
  0x34   : > { %p14148_p3 = pnand %p14147_p0, %p14146_p13  ;;  %p14152_p9 = scmp.lt.u32.totalorder %s14150_s4, %s14145_s29 }
  0x35   : > { %p14154_p1 = scmp.lt.u32.totalorder %s14145_s29, %s14374_s27 }
  0x36   : > { %p14149_p5 = pneg %p14148_p3  ;;  %p14153_p2 = por %p14152_p9, %p14151_p7 }
  0x38   : > { %p14155_p4 = por %p14154_p1, %p14153_p2 }
  0x3a   : > { %p14156_p6 = pnand %p14155_p4, %p14149_p5 }
  0x3c   : > { %14159 = shalt.err (!%p14156_p6)
}
  0x3d   : > { %s14160_s7 = scalar_lea.vmem %s14380_s22, 4096  ;;  %s14250_s18 = smov [#allocation3]  }
  0x3e   : > { %p14161_p8 = scmp.ne.s32.totalorder %s14380_s22, %s14160_s7  ;;  %s14165_s24 = sshll.u32 %s14250_s18, 4  ;;  %s14166_s24 = int_to_ptr.vmem [resolvable:$false] %s14165_s24 }
  0x3f   : > { %s14167_s25 = scalar_lea.vmem %s14166_s24, 8192  ;;  %p14168_p3 = scmp.lt.s32.totalorder %s14380_s22, %s14166_s24 }
  0x40   : > { %p14163_p10 = pnand %p14161_p8, %p14147_p0  ;;  %p14169_p7 = scmp.lt.s32.totalorder %s14167_s25, %s14160_s7 }
  0x42   : > { %p14164_p13 = pneg %p14163_p10  ;;  %p14170_p9 = por %p14169_p7, %p14168_p3 }
  0x44   : > { %p14171_p2 = pnand %p14170_p9, %p14164_p13 }
  0x46   : > { %14174 = shalt.err (!%p14171_p2)
}
  0x47   : > { %s14251_s20 = smov 128   ;;  %s14252_s26 = smov 8  }
  0x48   : > { %13836 = dma.hbm_to_vmem [thread:$0]  (!%p14376_p11), %s14374_s27, 4096, %s14380_s22, %s14382_s28, %s14251_s20, %s14251_s20, %s14252_s26  }
  0x49   : > { %p17964_p0 = scmp.ne.s32.totalorder %s17959_s17, 0 }
  0x4b   : > { %146 = sbr.rel (%p17964_p0) target bundleno = 2341 (0x925), region = 28 }
  0x52   : > { %s14413_s19 = sand.u32 1, %s14237_s10   ;;  %p17965_p5 = scmp.ne.s32.totalorder %s17957_s15, 0 }
  0x53   : > { %s10003_s29 = sshll.u32 %s14413_s19, 8  ;;  %s149_s30 = scalar_lea.sflag [#allocation4], %s14413_s19 }
  0x54   : > { %s14419_s3 = scalar_lea.vmem [#allocation3], %s10003_s29 }
  0x55   : > { %14220 = dma.done.wait (%p17965_p5), %s149_s30, 4096  }
  0x56   : > { %14222 = vsyncadd (%p17965_p5), %s149_s30, 4294963200  ;;  %p17966_p11 = scmp.eq.s32.totalorder %s14295_s13, 0 }
  0x58   : > { %14224 = dma.done.wait (%p17966_p11), [#allocation7], 27648   ;;  %p17967_p1 = pmov %p17966_p11 }
  0x59   : > { %v195_v0 = vlaneseq  ;;  %v17862_v1 = vmov 0.0|0.0   ;;  %vm14254_vm1 = vmmov 1   ;;  %v17968_v3 = vmov 0  ;;  %v13887_v4 = vld [vmem:[#allocation6 + $0x40] sm:$0xff]   ;;  %v13889_v6 = vld [vmem:[#allocation6 + $0x48] sm:$0xff]   ;;  %v13891_v8 = vld [vmem:[#allocation6 + $0x50] sm:$0xff]  }
  0x5a   : > { %14226 = vsyncadd (%p17967_p1), [#allocation7], 4294939648  ;;  %11757 = vmatprep.mubr.bf16.mxu1 %v17862_v1  ;;  %v13888_v5 = vld [vmem:[#allocation6 + $0x100] sm:$0xff]   ;;  %11741 = vmatprep.subr.bf16.mxu1 %v13887_v4  ;;  %v13890_v7 = vld [vmem:[#allocation6 + $0x108] sm:$0xff]   ;;  %v17971_v26 = vmov 0  ;;  %s17656_s15 = scalar_lea.vmem [#allocation8], %s10003_s29 }
  0x5b   : > { %v14430_v2 = vshrl.u32 %v195_v0, 7  ;;  %11933 = vmatprep.subr.bf16.mxu0 %v13888_v5  ;;  %11742 = vmatpush3.bf16.msra.mxu1 %v13887_v4  ;;  %v13892_v9 = vld [vmem:[#allocation6 + $0x110] sm:$0xff]   ;;  %v13893_v10 = vld [vmem:[#allocation6 + $0x58] sm:$0xff]   ;;  %v13895_v12 = vld [vmem:[#allocation6 + $0x60] sm:$0xff]   ;;  %s11092_s17 = sshll.u32 %s14295_s13, 12  ;;  %s9912_s27 = sshll.u32 %s17656_s15, 4  ;;  %s17791_s27 = int_to_ptr.vmem [resolvable:$true] %s9912_s27 }
  0x5c   : > { %11934 = vmatpush3.bf16.msra.mxu0 %v13888_v5  ;;  %11743 = vmatprep.subr.bf16.mxu1 %v13889_v6  ;;  %v13894_v11 = vld [vmem:[#allocation6 + $0x118] sm:$0xff]   ;;  %v13896_v13 = vld [vmem:[#allocation6 + $0x120] sm:$0xff]   ;;  %v13897_v14 = vld [vmem:[#allocation6 + $0x68] sm:$0xff]   ;;  %s17787_s28 = scalar_lea.hbm %s17857_s2, %s11092_s17  ;;  %s9899_s13 = scalar_lea.sflag [#allocation5], %s14413_s19 }
  0x5d   : > { %vm3586_vm0 = vcmp.ge.s32.totalorder %v14430_v2, 4  ;;  %11935 = vmatprep.subr.bf16.mxu0 %v13890_v7  ;;  %v14439_v15 = vadd.s32 8, %v14430_v2  ;;  %v14442_v16 = vld [vmem:[%s14419_s3] sm:$0xff]  ;;  %v14445_v17 = vld [vmem:[%s14419_s3 + $0x8] sm:$0xff]  ;;  %v14454_v21 = vld [vmem:[%s14419_s3 + $0x10] sm:$0xff]  ;;  %vm332_vm5 = vcmp.lt.s32.totalorder %v14430_v2, 2 }
  0x5e   : > { %vm14434_vm2 = vmpackc.low %vm14254_vm1, %vm3586_vm0  ;;  %v13898_v18 = vld [vmem:[#allocation6 + $0x128] sm:$0xff]   ;;  %v17865_v19 = vrot.slane %v14445_v17, 6  ;;  %v14450_v20 = vpack.c.bf16 %v14445_v17, %v14442_v16  ;;  %v14457_v22 = vld [vmem:[%s14419_s3 + $0x18] sm:$0xff]  ;;  %v306_v24 = vrot.slane %v14454_v21, 6  ;;  %vm912_vm6 = vcmp.lt.s32.totalorder %v14430_v2, 6  ;;  %s14175_s4 = scalar_lea.vmem %s17791_s27, 4096 }
  0x5f   : > { %v17969_v3 = vsel %vm14434_vm2, 4294967295, %v17968_v3  ;;  %11744 = vmatpush3.bf16.msra.mxu1 %v13889_v6  ;;  %vm3585_vm3 = vcmp.lt.s32.totalorder %v14439_v15, 12  ;;  %v13899_v23 = vld [vmem:[#allocation6 + $0x70] sm:$0xff]   ;;  %v307_v25 = vrot.slane %v14457_v22, 6  ;;  %v13901_v30 = vld [vmem:[#allocation6 + $0x78] sm:$0xff]   ;;  %v14475_v31 = vld [vmem:[%s14419_s3 + $0x20] sm:$0xff]  ;;  %v432_v46 = vpack.c.bf16 %v14457_v22, %v14454_v21  ;;  %p14176_p4 = scmp.ne.s32.totalorder %s17791_s27, %s14175_s4 }
  0x60   : > { %17970 = vst [vmem:[#allocation12_spill] sm:$0xff] %v17969_v3  ;;  %11936 = vmatpush3.bf16.msra.mxu0 %v13890_v7  ;;  %11745 = vmatprep.subr.bf16.mxu1 %v13891_v8  ;;  %vm14463_vm4 = vmpackc.low %vm3585_vm3, %vm14254_vm1  ;;  %v13900_v27 = vld [vmem:[#allocation6 + $0x130] sm:$0xff]   ;;  %v358_v29 = vsel %vm332_vm5, %v17865_v19, %v306_v24  ;;  %v14478_v32 = vld [vmem:[%s14419_s3 + $0x28] sm:$0xff]  ;;  %v14481_v33 = vrot.slane %v14475_v31, 6  ;;  %vm264_vm7 = vcmp.lt.s32.totalorder %v14439_v15, 14  ;;  %vm265_vm9 = vcmp.ge.s32.totalorder %v14430_v2, 2 }
  0x61   : > { %11937 = vmatprep.subr.bf16.mxu0 %v13892_v9  ;;  %11949 = vmatprep.mubr.bf16.mxu0 %v14450_v20  ;;  %v17972_v26 = vsel %vm14463_vm4, 4294967295, %v17971_v26  ;;  %v357_v28 = vsel %vm332_vm5, %v306_v24, %v307_v25  ;;  %v309_v34 = vrot.slane %v14478_v32, 6  ;;  %v13902_v35 = vld [vmem:[#allocation6 + $0x138] sm:$0xff]   ;;  %v14485_v36 = vld [vmem:[%s14419_s3 + $0x30] sm:$0xff]  ;;  %v13903_v40 = vld [vmem:[#allocation6] sm:$0xff]   ;;  %v14527_v57 = vpack.c.bf16 %v14478_v32, %v14475_v31  ;;  %p14177_p6 = pnand %p14176_p4, %p14365_p12  ;;  %s14256_s5 = smov [#allocation8]  }
  0x62   : > { %17973 = vst [vmem:[#allocation13_spill] sm:$0xff] %v17972_v26  ;;  %v14488_v37 = vld [vmem:[%s14419_s3 + $0x38] sm:$0xff]  ;;  %v310_v38 = vrot.slane %v14485_v36, 6  ;;  %v14492_v41 = vpack.c.bf16 %v357_v28, %v358_v29  ;;  %v356_v43 = vsel %vm332_vm5, %v307_v25, %v14481_v33  ;;  %v13904_v44 = vld [vmem:[#allocation6 + $0x140] sm:$0xff]   ;;  %v14508_v47 = vld [vmem:[%s14419_s3 + $0x48] sm:$0xff]  ;;  %vm3652_vm11 = vcmp.lt.s32.totalorder %v14430_v2, 4 }
  0x63   : > { %11746 = vmatpush3.bf16.msra.mxu1 %v13891_v8  ;;  %v311_v39 = vrot.slane %v14488_v37, 6  ;;  %v14497_v42 = vsel %vm332_vm5, %v14481_v33, %v309_v34  ;;  %v14503_v45 = vld [vmem:[%s14419_s3 + $0x40] sm:$0xff]  ;;  %v13905_v49 = vld [vmem:[#allocation6 + $0x148] sm:$0xff]   ;;  %v313_v51 = vrot.slane %v14508_v47, 6  ;;  %v14520_v55 = vld [vmem:[%s14419_s3 + $0x50] sm:$0xff]  ;;  %p14178_p8 = pneg %p14177_p6  ;;  %s14179_s6 = sshll.u32 %s14256_s5, 4  ;;  %s14180_s6 = int_to_ptr.vmem [resolvable:$false] %s14179_s6 }
  0x64   : > { %11938 = vmatpush3.bf16.msra.mxu0 %v13892_v9  ;;  %11747 = vmatprep.subr.bf16.mxu1 %v13893_v10  ;;  %v14511_v48 = vpack.c.bf16 %v14497_v42, %v356_v43  ;;  %v312_v50 = vrot.slane %v14503_v45, 6  ;;  %v354_v53 = vsel %vm332_vm5, %v309_v34, %v310_v38  ;;  %v13906_v54 = vld [vmem:[#allocation6 + $0x8] sm:$0xff]   ;;  %v14523_v56 = vld [vmem:[%s14419_s3 + $0x58] sm:$0xff]  ;;  %v14530_v58 = vld [vmem:[%s14419_s3 + $0x60] sm:$0xff]  ;;  %v314_v61 = vrot.slane %v14520_v55, 6  ;;  %s14181_s7 = scalar_lea.vmem %s14180_s6, 8192  ;;  %p14182_p10 = scmp.lt.s32.totalorder %s17791_s27, %s14180_s6 }
  0x65   : > { %11939 = vmatprep.subr.bf16.mxu0 %v13894_v11  ;;  %v353_v52 = vsel %vm332_vm5, %v310_v38, %v311_v39  ;;  %v14533_v59 = vld [vmem:[%s14419_s3 + $0x68] sm:$0xff]  ;;  %v315_v62 = vrot.slane %v14523_v56, 6  ;;  %v316_v63 = vrot.slane %v14530_v58, 6  ;;  %v13909_v5 = vld [vmem:[#allocation6 + $0x10] sm:$0xff]   ;;  %v13912_v25 = vld [vmem:[#allocation6 + $0x18] sm:$0xff]   ;;  %v885_v38 = vrot.slane %v14445_v17, 2  ;;  %p14183_p13 = scmp.lt.s32.totalorder %s14181_s7, %s14175_s4 }
  0x66   : > { %v14535_v60 = vpack.c.bf16 %v353_v52, %v354_v53  ;;  %v317_v0 = vrot.slane %v14533_v59, 6  ;;  %v351_v4 = vsel %vm332_vm5, %v312_v50, %v313_v51  ;;  %v352_v6 = vsel %vm332_vm5, %v311_v39, %v312_v50  ;;  %v13907_v7 = vld [vmem:[#allocation6 + $0x150] sm:$0xff]   ;;  %v13910_v29 = vld [vmem:[#allocation6 + $0x160] sm:$0xff]   ;;  %v13911_v43 = vld [vmem:[#allocation6 + $0x168] sm:$0xff]  }
  0x67   : > { %11748 = vmatpush3.bf16.msra.mxu1 %v13893_v10  ;;  %v14548_v8 = vpack.c.bf16 %v351_v4, %v352_v6  ;;  %v349_v9 = vsel %vm332_vm5, %v314_v61, %v315_v62  ;;  %v350_v10 = vsel %vm332_vm5, %v313_v51, %v314_v61  ;;  %v14596_v39 = vld [vmem:[%s14419_s3 + $0x70] sm:$0xff]  ;;  %v13917_v51 = vld [vmem:[#allocation6 + $0x28] sm:$0xff]   ;;  %v887_v6 = vrot.slane %v14457_v22, 2  ;;  %vm14648_vm8 = vmpackc.low %vm264_vm7, %vm14254_vm1  ;;  %p14184_p3 = por %p14183_p13, %p14182_p10 }
  0x68   : > { %11940 = vmatpush3.bf16.msra.mxu0 %v13894_v11  ;;  %11749 = vmatprep.subr.bf16.mxu1 %v13895_v12  ;;  %v347_v11 = vsel %vm332_vm5, %v316_v63, %v317_v0  ;;  %v14571_v24 = vpack.c.bf16 %v349_v9, %v350_v10  ;;  %v13913_v52 = vld [vmem:[#allocation6 + $0x170] sm:$0xff]   ;;  %v890_v10 = vrot.slane %v14485_v36, 2  ;;  %v13921_v15 = vld [vmem:[#allocation6 + $0x38] sm:$0xff]   ;;  %vm14823_vm10 = vmpackc.low %vm14254_vm1, %vm265_vm9 }
  0x69   : > { %11941 = vmatprep.subr.bf16.mxu0 %v13896_v13  ;;  %v13928_v26 = vld [vmem:[#allocation6 + $0x1b0] sm:$0xff]   ;;  %v14048_v2 = vld [vmem:[#allocation6 + $0x508] sm:$0xff]   ;;  %p14185_p7 = pnand %p14184_p3, %p14178_p8 }
  0x6b   : > { %11750 = vmatpush3.bf16.msra.mxu1 %v13895_v12  ;;  %v348_v12 = vsel %vm332_vm5, %v315_v62, %v316_v63  ;;  %v13919_v63 = vld [vmem:[#allocation6 + $0x30] sm:$0xff]  }
  0x6c   : > { %11942 = vmatpush3.bf16.msra.mxu0 %v13896_v13  ;;  %11751 = vmatprep.subr.bf16.mxu1 %v13897_v14  ;;  %v14562_v13 = vpack.c.bf16 %v14488_v37, %v14485_v36  ;;  %v894_v36 = vrot.slane %v14520_v55, 2 }
  0x6d   : > { %11943 = vmatprep.subr.bf16.mxu0 %v13898_v18 }
  0x6f   : > { %11752 = vmatpush3.bf16.msra.mxu1 %v13897_v14  ;;  %v14566_v14 = vpack.c.bf16 %v14508_v47, %v14503_v45 }
  0x70   : > { %11944 = vmatpush3.bf16.msra.mxu0 %v13898_v18  ;;  %11753 = vmatprep.subr.bf16.mxu1 %v13899_v23  ;;  %v13908_v18 = vld [vmem:[#allocation6 + $0x158] sm:$0xff]  }
  0x71   : > { %11945 = vmatprep.subr.bf16.mxu0 %v13900_v27  ;;  %17974 = vst [vmem:[#allocation14_spill] sm:$0xff] %v14566_v14 }
  0x73   : > { %11754 = vmatpush3.bf16.msra.mxu1 %v13899_v23 }
  0x74   : > { %11946 = vmatpush3.bf16.msra.mxu0 %v13900_v27  ;;  %11755 = vmatprep.subr.bf16.mxu1 %v13901_v30  ;;  %v14573_v27 = vpack.c.bf16 %v347_v11, %v348_v12  ;;  %v891_v11 = vrot.slane %v14488_v37, 2  ;;  %v13914_v12 = vld [vmem:[#allocation6 + $0x178] sm:$0xff]   ;;  %v895_v37 = vrot.slane %v14523_v56, 2 }
  0x75   : > { %11947 = vmatprep.subr.bf16.mxu0 %v13902_v35 }
  0x77   : > { %11756 = vmatpush3.bf16.msra.mxu1 %v13901_v30  ;;  %v13915_v30 = vld [vmem:[#allocation6 + $0x20] sm:$0xff]  }
  0x78   : > { %11948 = vmatpush3.bf16.msra.mxu0 %v13902_v35  ;;  %11789 = vmatprep.subr.bf16.mxu1 %v13903_v40  ;;  %v14587_v35 = vrot.slane %v14442_v16, 2 }
  0x79   : > { %11981 = vmatprep.subr.bf16.mxu0 %v13904_v44 }
  0x7a   : > { %11758 = vmatmul.mubr.bf16.vlgmr.msra.gmra.mrb[0].mxu1 %v17862_v1  ;;  %v933_v1 = vsel %vm912_vm6, %v890_v10, %v891_v11 }
  0x7b   : > { %11950 = vmatmul.mubr.bf16.vlgmr.msra.gmra.mrb[0].mxu0 %v432_v46  ;;  %11790 = vmatpush3.bf16.msra.mxu1 %v13903_v40  ;;  %v886_v40 = vrot.slane %v14454_v21, 2  ;;  %v939_v21 = vsel %vm912_vm6, %v14587_v35, %v885_v38 }
  0x7c   : > { %11982 = vmatpush3.bf16.msra.mxu0 %v13904_v44  ;;  %11761 = vmatprep.mubr.bf16.mxu1 %v14450_v20  ;;  %v17861_v20 = vmov 0.0   ;;  %v14601_v44 = vpack.c.bf16 %v14533_v59, %v14530_v58 }
  0x7d   : > { %11983 = vmatprep.subr.bf16.mxu0 %v13905_v49  ;;  %11953 = vmatprep.mubr.bf16.mxu0 %v14527_v57  ;;  %v14569_v23 = vrot.slane %v17861_v20, 6  ;;  %v938_v53 = vsel %vm912_vm6, %v885_v38, %v886_v40  ;;  %v14627_v62 = vrot.slane %v17861_v20, 2  ;;  %v17866_v38 = vrot.slane %v14596_v39, 2 }
  0x7e   : > { %11791 = vmatprep.subr.bf16.mxu1 %v13906_v54  ;;  %17976 = vst [vmem:[#allocation16_spill] sm:$0xff] %v14601_v44  ;;  %v14652_v22 = vpack.c.bf16 %v938_v53, %v939_v21  ;;  %v14684_v21 = vld [vmem:[#allocation6 + $0x80] sm:$0xff]  }
  0x7f   : > { %11792 = vmatpush3.bf16.msra.mxu1 %v13906_v54  ;;  %v14581_v28 = vsel %vm332_vm5, %v14569_v23, %v14481_v33  ;;  %v14593_v33 = vpack.c.bf16 %v14523_v56, %v14520_v55  ;;  %v13924_v56 = vld [vmem:[#allocation6 + $0x1a0] sm:$0xff]  }
  0x80   : > { %11984 = vmatpush3.bf16.msra.mxu0 %v13905_v49  ;;  %11793 = vmatprep.subr.bf16.mxu1 %v13909_v5  ;;  %v318_v49 = vrot.slane %v14596_v39, 6 }
  0x81   : > { %11985 = vmatprep.subr.bf16.mxu0 %v13907_v7  ;;  %17975 = vst [vmem:[#allocation15_spill] sm:$0xff] %v14593_v33 }
  0x82   : > { %11762 = vmatmul.mubr.bf16.gmra.mrb[4].mxu1 %v432_v46  ;;  %v14604_v46 = vld [vmem:[%s14419_s3 + $0x78] sm:$0xff]  ;;  %v346_v61 = vsel %vm332_vm5, %v317_v0, %v318_v49  ;;  %v889_v0 = vrot.slane %v14478_v32, 2  ;;  %v893_v32 = vrot.slane %v14508_v47, 2 }
  0x83   : > { %11954 = vmatmul.mubr.bf16.gmra.mrb[4].mxu0 %v14562_v13  ;;  %11765 = vmatprep.mubr.bf16.mxu1 %v14527_v57  ;;  %v17864_v50 = vrot.slane %v14604_v46, 6  ;;  %v14640_v9 = vpack.c.bf16 %v14604_v46, %v14596_v39 }
  0x84   : > { %11986 = vmatpush3.bf16.msra.mxu0 %v13907_v7  ;;  %11957 = vmatprep.mubr.bf16.mxu0 %v14566_v14  ;;  %v14636_v7 = vrot.slane %v14475_v31, 2  ;;  %v892_v31 = vrot.slane %v14503_v45, 2  ;;  %v14663_v45 = vld [vmem:[%s14419_s3 + $0x80] sm:$0xff] }
  0x85   : > { %11987 = vmatprep.subr.bf16.mxu0 %v13908_v18  ;;  %11794 = vmatpush3.bf16.msra.mxu1 %v13909_v5  ;;  %v345_v54 = vsel %vm332_vm5, %v318_v49, %v17864_v50  ;;  %v14632_v5 = vrot.slane %v14442_v16, 6  ;;  %17979 = vst [vmem:[#allocation19_spill] sm:$0xff] %v14640_v9  ;;  %v14724_v50 = vld [vmem:[%s14419_s3 + $0xa8] sm:$0xff] }
  0x86   : > { %11795 = vmatprep.subr.bf16.mxu1 %v13912_v25  ;;  %v14629_v4 = vpack.c.bf16 %v345_v54, %v346_v61  ;;  %17978 = vst [vmem:[#allocation18_spill] sm:$0xff] %v14636_v7  ;;  %v936_v47 = vsel %vm912_vm6, %v887_v6, %v14636_v7  ;;  %v935_v49 = vsel %vm912_vm6, %v14636_v7, %v889_v0  ;;  %v14694_v61 = vld [vmem:[%s14419_s3 + $0x90] sm:$0xff]  ;;  %v13964_v16 = vld [vmem:[#allocation6 + $0x2a8] sm:$0xff]  }
  0x87   : > { %17977 = vst [vmem:[#allocation17_spill] sm:$0xff] %v14632_v5  ;;  %v931_v53 = vsel %vm912_vm6, %v892_v31, %v893_v32 }
  0x88   : > { %11988 = vmatpush3.bf16.msra.mxu0 %v13908_v18  ;;  %v896_v18 = vrot.slane %v14530_v58, 2 }
  0x89   : > { %11989 = vmatprep.subr.bf16.mxu0 %v13910_v29  ;;  %11796 = vmatpush3.bf16.msra.mxu1 %v13912_v25  ;;  %v937_v25 = vsel %vm912_vm6, %v886_v40, %v887_v6  ;;  %v934_v40 = vsel %vm912_vm6, %v889_v0, %v890_v10  ;;  %v14700_v0 = vld [vmem:[%s14419_s3 + $0x98] sm:$0xff]  ;;  %v13920_v6 = vld [vmem:[#allocation6 + $0x190] sm:$0xff]  }
  0x8a   : > { %11766 = vmatmul.mubr.bf16.gmra.mrb[8].mxu1 %v14562_v13  ;;  %11797 = vmatprep.subr.bf16.mxu1 %v13915_v30  ;;  %v14735_v34 = vpack.c.bf16 %v14700_v0, %v14694_v61  ;;  %v225_v10 = vld [vmem:[%s14419_s3 + $0xd8] sm:$0xff] }
  0x8b   : > { %11958 = vmatmul.mubr.bf16.gmra.mrb[8].mxu0 %v14593_v33  ;;  %11769 = vmatprep.mubr.bf16.mxu1 %v14566_v14  ;;  %v14816_v58 = vrot.slane %v225_v10, 2  ;;  %v13925_v14 = vld [vmem:[#allocation6 + $0x88] sm:$0xff]  }
  0x8c   : > { %11990 = vmatpush3.bf16.msra.mxu0 %v13910_v29  ;;  %11961 = vmatprep.mubr.bf16.mxu0 %v14601_v44  ;;  %v897_v29 = vrot.slane %v14533_v59, 2  ;;  %17983 = vst [vmem:[#allocation21_spill] sm:$0xff] %v14735_v34 }
  0x8d   : > { %11991 = vmatprep.subr.bf16.mxu0 %v13911_v43  ;;  %11798 = vmatpush3.bf16.msra.mxu1 %v13915_v30  ;;  %v14675_v30 = vld [vmem:[%s14419_s3 + $0x88] sm:$0xff] }
  0x8e   : > { %11799 = vmatprep.subr.bf16.mxu1 %v13917_v51  ;;  %v14691_v54 = vpack.c.bf16 %v14675_v30, %v14663_v45  ;;  %v927_v55 = vsel %vm912_vm6, %v896_v18, %v897_v29 }
  0x90   : > { %11992 = vmatpush3.bf16.msra.mxu0 %v13911_v43  ;;  %v13916_v43 = vld [vmem:[#allocation6 + $0x180] sm:$0xff]   ;;  %17982 = vst [vmem:[#allocation20_spill] sm:$0xff] %v14691_v54 }
  0x91   : > { %11993 = vmatprep.subr.bf16.mxu0 %v13913_v52  ;;  %11800 = vmatpush3.bf16.msra.mxu1 %v13917_v51  ;;  %v14763_v51 = vld [vmem:[%s14419_s3 + $0xc8] sm:$0xff] }
  0x92   : > { %11770 = vmatmul.mubr.bf16.gmra.mrb[12].mxu1 %v14593_v33  ;;  %11801 = vmatprep.subr.bf16.mxu1 %v13919_v63 }
  0x93   : > { %11962 = vmatmul.mubr.bf16.gmra.mrb[12].mxu0 %v14640_v9  ;;  %11773 = vmatprep.mubr.bf16.mxu1 %v14601_v44 }
  0x94   : > { %11994 = vmatpush3.bf16.msra.mxu0 %v13913_v52  ;;  %11997 = vmatprep.mubr.msk.bf16.mxu0 %vm14648_vm8, %v14652_v22  ;;  %v14686_v52 = vpack.c.bf16 %v936_v47, %v937_v25  ;;  %v17871_v25 = vrot.slane %v14663_v45, 2  ;;  %v13918_v47 = vld [vmem:[#allocation6 + $0x188] sm:$0xff]  }
  0x95   : > { %11995 = vmatprep.subr.bf16.mxu0 %v13914_v12  ;;  %11802 = vmatpush3.bf16.msra.mxu1 %v13919_v63  ;;  %v14697_v63 = vpack.c.bf16 %v934_v40, %v935_v49  ;;  %v14713_v40 = vld [vmem:[%s14419_s3 + $0xa0] sm:$0xff]  ;;  %v932_v49 = vsel %vm912_vm6, %v891_v11, %v892_v31  ;;  %v14754_v11 = vld [vmem:[%s14419_s3 + $0xb8] sm:$0xff] }
  0x96   : > { %11803 = vmatprep.subr.bf16.mxu1 %v13921_v15  ;;  %v14740_v19 = vpack.c.bf16 %v932_v49, %v933_v1  ;;  %v13922_v1 = vld [vmem:[#allocation6 + $0x198] sm:$0xff]   ;;  %v14760_v31 = vld [vmem:[%s14419_s3 + $0xc0] sm:$0xff]  ;;  %v929_v49 = vsel %vm912_vm6, %v894_v36, %v895_v37 }
  0x97   : > { %v14814_v59 = vpack.c.bf16 %v14763_v51, %v14760_v31 }
  0x98   : > { %11996 = vmatpush3.bf16.msra.mxu0 %v13914_v12  ;;  %v14744_v12 = vpack.c.bf16 %v14724_v50, %v14713_v40 }
  0x99   : > { %12029 = vmatprep.subr.bf16.mxu0 %v13916_v43  ;;  %11804 = vmatpush3.bf16.msra.mxu1 %v13921_v15  ;;  %v928_v15 = vsel %vm912_vm6, %v895_v37, %v896_v18  ;;  %v14807_v37 = vrot.slane %v225_v10, 6  ;;  %17986 = vst [vmem:[#allocation24_spill] sm:$0xff] %v14814_v59 }
  0x9a   : > { %11774 = vmatmul.mubr.bf16.gmra.mrb[16].mxu1 %v14640_v9  ;;  %11837 = vmatprep.subr.bf16.mxu1 %v14684_v21  ;;  %17984 = vst [vmem:[#allocation22_spill] sm:$0xff] %v14744_v12 }
  0x9b   : > { %11998 = vmatmul.mubr.msk.bf16.vlgmr.msra.gmra.mrb[0].mxu0 %vm14648_vm8, %v14686_v52  ;;  %11777 = vmatprep.mubr.bf16.mxu1 %v14691_v54  ;;  %v364_v3 = vsel %vm332_vm5, %v14807_v37, %v14569_v23  ;;  %v14888_v54 = vld [vmem:[%s14419_s3 + $0xe8] sm:$0xff] }
  0x9c   : > { %12030 = vmatpush3.bf16.msra.mxu0 %v13916_v43  ;;  %12001 = vmatprep.mubr.msk.bf16.mxu0 %vm14648_vm8, %v14697_v63  ;;  %v930_v43 = vsel %vm912_vm6, %v893_v32, %v894_v36  ;;  %v14748_v32 = vld [vmem:[%s14419_s3 + $0xb0] sm:$0xff] }
  0x9d   : > { %12031 = vmatprep.subr.bf16.mxu0 %v13918_v47  ;;  %v14751_v20 = vpack.c.bf16 %v930_v43, %v931_v53  ;;  %v926_v43 = vsel %vm912_vm6, %v897_v29, %v17866_v38  ;;  %v14805_v36 = vpack.c.bf16 %v14754_v11, %v14748_v32  ;;  %v14810_v53 = vpack.c.bf16 %v928_v15, %v929_v49  ;;  %v13926_v38 = vld [vmem:[#allocation6 + $0x1a8] sm:$0xff]   ;;  %v13965_v29 = vld [vmem:[#allocation6 + $0x2b0] sm:$0xff]  }
  0x9e   : > { %v14818_v18 = vpack.c.bf16 %v926_v43, %v927_v55  ;;  %v17989_v43 = vrot.slane %v14604_v46, 2  ;;  %v17991_v49 = vrot.slane %v14596_v39, 2 }
  0x9f   : > { %17985 = vst [vmem:[#allocation23_spill] sm:$0xff] %v14805_v36 }
  0xa0   : > { %12032 = vmatpush3.bf16.msra.mxu0 %v13918_v47  ;;  %v14771_v47 = vld [vmem:[%s14419_s3 + $0xd0] sm:$0xff]  ;;  %v924_v55 = vsel %vm912_vm6, %v17989_v43, %v17871_v25  ;;  %v17990_v15 = vmov %v17989_v43  ;;  %v17995_v25 = vrot.slane %v14675_v30, 2 }
  0xa1   : > { %12033 = vmatprep.subr.bf16.mxu0 %v13920_v6  ;;  %v17992_v43 = vrot.slane %v14771_v47, 2 }
  0xa2   : > { %11778 = vmatmul.mubr.bf16.gmra.mrb[20].mxu1 %v14735_v34  ;;  %v17996_v7 = vmov %v17995_v25  ;;  %v14885_v34 = vpack.c.bf16 %v225_v10, %v14771_v47  ;;  %v14904_v10 = vld [vmem:[#allocation6 + $0x1c0] sm:$0xff]  }
  0xa3   : > { %12002 = vmatmul.mubr.msk.bf16.gmra.mrb[4].mxu0 %vm14648_vm8, %v14740_v19  ;;  %11781 = vmatprep.mubr.bf16.mxu1 %v14744_v12  ;;  %v14859_v39 = vsel %vm912_vm6, %v17992_v43, %v14816_v58  ;;  %v18004_v12 = vrot.slane %v14445_v17, 6  ;;  %v18009_v17 = vrot.slane %v14713_v40, 2 }
  0xa4   : > { %12005 = vmatprep.mubr.msk.bf16.mxu0 %vm14648_vm8, %v14751_v20  ;;  %12034 = vmatpush3.bf16.msra.mxu0 %v13920_v6  ;;  %v925_v6 = vsel %vm912_vm6, %v17991_v49, %v17990_v15  ;;  %v14865_v15 = vsel %vm912_vm6, %v14816_v58, %v14627_v62  ;;  %v17994_v49 = vrot.slane %v14694_v61, 2  ;;  %17998 = vst [vmem:[#allocation26_spill] sm:$0xff] %v14885_v34 }
  0xa5   : > { %12035 = vmatprep.subr.bf16.mxu0 %v13922_v1  ;;  %17993 = vst [vmem:[#allocation25_spill] sm:$0xff] %v14865_v15  ;;  %v14890_v9 = vpack.c.bf16 %v924_v55, %v925_v6  ;;  %v18001_v6 = vrot.slane %v14700_v0, 2  ;;  %v14949_v15 = vld [vmem:[%s14419_s3 + $0xf0] sm:$0xff] }
  0xa8   : > { %12036 = vmatpush3.bf16.msra.mxu0 %v13922_v1  ;;  %v909_v1 = vrot.slane %v14763_v51, 2 }
  0xa9   : > { %12037 = vmatprep.subr.bf16.mxu0 %v13924_v56 }
  0xaa   : > { %11782 = vmatmul.mubr.bf16.gmra.mrb[24].mxu1 %v14805_v36  ;;  %v14880_v36 = vld [vmem:[%s14419_s3 + $0xe0] sm:$0xff] }
  0xab   : > { %12006 = vmatmul.mubr.msk.bf16.gmra.mrb[8].mxu0 %vm14648_vm8, %v14810_v53  ;;  %11785 = vmatprep.mubr.bf16.mxu1 %v14814_v59  ;;  %v17997_v59 = vrot.slane %v14663_v45, 2 }
  0xac   : > { %12009 = vmatprep.mubr.msk.bf16.mxu0 %vm14648_vm8, %v14818_v18  ;;  %12038 = vmatpush3.bf16.msra.mxu0 %v13924_v56  ;;  %v922_v56 = vsel %vm912_vm6, %v17995_v25, %v17994_v49  ;;  %v10023_v25 = vpack.c.bf16 %v14569_v23, %v364_v3  ;;  %v13930_v49 = vld [vmem:[#allocation6 + $0x1b8] sm:$0xff]   ;;  %v1956_v3 = vrot.slane %v14888_v54, 2 }
  0xad   : > { %v923_v43 = vsel %vm912_vm6, %v17997_v59, %v17996_v7  ;;  %12039 = vmatprep.subr.bf16.mxu0 %v13926_v38  ;;  %v1955_v59 = vrot.slane %v14880_v36, 2  ;;  %v14926_v7 = vsel %vm332_vm5, %v14632_v5, %v18004_v12 }
  0xae   : > { %v14893_v44 = vpack.c.bf16 %v922_v56, %v923_v43  ;;  %v18002_v56 = vmov %v18001_v6  ;;  %v18003_v43 = vrot.slane %v14694_v61, 2  ;;  %18005 = vst [vmem:[#allocation28_spill] sm:$0xff] %v14926_v7 }
  0xb0   : > { %17999 = vst [vmem:[#allocation27_spill] sm:$0xff] %v14893_v44  ;;  %12040 = vmatpush3.bf16.msra.mxu0 %v13926_v38  ;;  %v18000_v38 = vrot.slane %v14713_v40, 2 }
  0xb1   : > { %12041 = vmatprep.subr.bf16.mxu0 %v13928_v26 }
  0xb2   : > { %11786 = vmatmul.mubr.bf16.gmra.mrb[28].mxu1 %v14885_v34  ;;  %v920_v55 = vsel %vm912_vm6, %v18001_v6, %v18000_v38  ;;  %v360_v38 = vsel %vm332_vm5, %v14569_v23, %v14632_v5  ;;  %v18006_v6 = vrot.slane %v14748_v32, 2  ;;  %v18007_v34 = vrot.slane %v14724_v50, 2  ;;  %v229_v5 = vld [vmem:[%s14419_s3 + $0xf8] sm:$0xff] }
  0xb3   : > { %12010 = vmatmul.mubr.msk.bf16.gmra.mrb[12].mxu0 %vm14648_vm8, %v14890_v9  ;;  %11805 = vmatprep.mubr.msk.bf16.mxu1 %vm14823_vm10, %v10023_v25  ;;  %v921_v25 = vsel %vm912_vm6, %v18003_v43, %v18002_v56  ;;  %v14946_v43 = vpack.c.bf16 %v14569_v23, %v14569_v23 }
  0xb4   : > { %12013 = vmatprep.mubr.msk.bf16.mxu0 %vm14648_vm8, %v14893_v44  ;;  %12042 = vmatpush3.bf16.msra.mxu0 %v13928_v26  ;;  %v918_v56 = vsel %vm912_vm6, %v18007_v34, %v18006_v6  ;;  %v18008_v26 = vmov %v18007_v34  ;;  %v14952_v33 = vpack.c.bf16 %v920_v55, %v921_v25  ;;  %v10029_v34 = vpack.c.bf16 %v14926_v7, %v360_v38 }
  0xb5   : > { %v919_v12 = vsel %vm912_vm6, %v18009_v17, %v18008_v26  ;;  %12043 = vmatprep.subr.bf16.mxu0 %v13930_v49  ;;  %v13927_v26 = vld [vmem:[#allocation6 + $0x90] sm:$0xff]   ;;  %v1957_v55 = vrot.slane %v14949_v15, 2  ;;  %v14966_v25 = vrot.slane %v229_v5, 2  ;;  %v18013_v38 = vrot.slane %v14754_v11, 2 }
  0xb6   : > { %18010 = vst [vmem:[#allocation29_spill] sm:$0xff] %v14952_v33  ;;  %v14955_v6 = vpack.c.bf16 %v918_v56, %v919_v12  ;;  %v18015_v17 = vrot.slane %v14748_v32, 2 }
  0xb8   : > { %18011 = vst [vmem:[#allocation30_spill] sm:$0xff] %v14955_v6  ;;  %12044 = vmatpush3.bf16.msra.mxu0 %v13930_v49  ;;  %v18012_v49 = vrot.slane %v14760_v31, 2 }
  0xb9   : > { %12077 = vmatprep.subr.bf16.mxu0 %v14904_v10 }
  0xba   : > { %11806 = vmatmul.mubr.msk.bf16.vlgmr.msra.gmra.mrb[0].mxu1 %vm14823_vm10, %v14946_v43  ;;  %v916_v56 = vsel %vm912_vm6, %v18013_v38, %v18012_v49 }
  0xbb   : > { %12014 = vmatmul.mubr.msk.bf16.gmra.mrb[16].mxu0 %vm14648_vm8, %v14952_v33  ;;  %11838 = vmatpush3.bf16.msra.mxu1 %v14684_v21  ;;  %v18014_v21 = vmov %v18013_v38 }
  0xbc   : > { %11809 = vmatprep.mubr.msk.bf16.mxu1 %vm14823_vm10, %v10029_v34  ;;  %12017 = vmatprep.mubr.msk.bf16.mxu0 %vm14648_vm8, %v14955_v6  ;;  %v917_v12 = vsel %vm912_vm6, %v18015_v17, %v18014_v21  ;;  %v18016_v34 = vrot.slane %v14771_v47, 2  ;;  %v18017_v6 = vmov %v18012_v49  ;;  %v13929_v49 = vld [vmem:[#allocation6 + $0x98] sm:$0xff]   ;;  %v1961_v21 = vsel %vm912_vm6, %v1955_v59, %v1956_v3 }
  0xbd   : > { %11839 = vmatprep.subr.bf16.mxu1 %v13925_v14  ;;  %v915_v33 = vsel %vm912_vm6, %v18017_v6, %v909_v1  ;;  %v14993_v44 = vpack.c.bf16 %v916_v56, %v917_v12  ;;  %v1960_v56 = vsel %vm912_vm6, %v1956_v3, %v1957_v55  ;;  %v13933_v12 = vld [vmem:[#allocation6 + $0xa8] sm:$0xff]   ;;  %v15028_v6 = vpack.c.bf16 %v229_v5, %v14949_v15 }
  0xbe   : > { %v914_v7 = vsel %vm912_vm6, %v909_v1, %v18016_v34  ;;  %v13931_v1 = vld [vmem:[#allocation6 + $0xa0] sm:$0xff]   ;;  %v15025_v34 = vpack.c.bf16 %v1960_v56, %v1961_v21  ;;  %v15046_v3 = vsel %vm912_vm6, %v1957_v55, %v14966_v25  ;;  %v18018_v56 = vpack.c.bf16 %v14497_v42, %v14581_v28  ;;  %v13934_v28 = vld [vmem:[#allocation6 + $0x1c8] sm:$0xff]  }
  0xbf   : > { %11840 = vmatpush3.bf16.msra.mxu1 %v13925_v14  ;;  %v14995_v38 = vpack.c.bf16 %v914_v7, %v915_v33  ;;  %v1312_v14 = vrot.slane %v14888_v54, 6  ;;  %v15010_v33 = vpack.c.bf16 %v14888_v54, %v14880_v36  ;;  %v1962_v7 = vsel %vm912_vm6, %v14816_v58, %v1955_v59  ;;  %v13935_v58 = vld [vmem:[#allocation6 + $0xb0] sm:$0xff]   ;;  %v15061_v55 = vld [vmem:[#allocation6 + $0xc0] sm:$0xff]  }
  0xc0   : > { %11841 = vmatprep.subr.bf16.mxu1 %v13927_v26  ;;  %v15023_v17 = vpack.c.bf16 %v1962_v7, %v14859_v39  ;;  %v13937_v7 = vld [vmem:[#allocation6 + $0xb8] sm:$0xff]   ;;  %v18019_v21 = vrot.slane %v14675_v30, 6  ;;  %v18022_v59 = vrot.slane %v14604_v46, 6  ;;  %v18023_v46 = vrot.slane %v14700_v0, 6  ;;  %v13951_v54 = vld [vmem:[#allocation6 + $0xf0] sm:$0xff]  }
  0xc1   : > { %v18031_v0 = vrot.slane %v14754_v11, 6  ;;  %v18039_v11 = vrot.slane %v14771_v47, 6  ;;  %v13948_v47 = vld [vmem:[#allocation6 + $0x200] sm:$0xff]  }
  0xc2   : > { %11810 = vmatmul.mubr.msk.bf16.gmra.mrb[4].mxu1 %vm14823_vm10, %v14492_v41  ;;  %v18030_v30 = vmov %v18023_v46 }
  0xc3   : > { %12018 = vmatmul.mubr.msk.bf16.gmra.mrb[20].mxu0 %vm14648_vm8, %v14993_v44  ;;  %11813 = vmatprep.mubr.msk.bf16.mxu1 %vm14823_vm10, %v14511_v48 }
  0xc4   : > { %12021 = vmatprep.mubr.msk.bf16.mxu0 %vm14648_vm8, %v14995_v38  ;;  %11842 = vmatpush3.bf16.msra.mxu1 %v13927_v26  ;;  %v1990_v26 = vsel %vm912_vm6, %v14966_v25, %v14587_v35 }
  0xc5   : > { %11843 = vmatprep.subr.bf16.mxu1 %v13929_v49 }
  0xc8   : > { %11844 = vmatpush3.bf16.msra.mxu1 %v13929_v49  ;;  %v10244_v49 = vpack.c.bf16 %v1990_v26, %v15046_v3 }
  0xc9   : > { %11845 = vmatprep.subr.bf16.mxu1 %v13931_v1 }
  0xca   : > { %11814 = vmatmul.mubr.msk.bf16.gmra.mrb[8].mxu1 %vm14823_vm10, %v14535_v60 }
  0xcb   : > { %12022 = vmatmul.mubr.msk.bf16.gmra.mrb[24].mxu0 %vm14648_vm8, %v15023_v17  ;;  %11817 = vmatprep.mubr.msk.bf16.mxu1 %vm14823_vm10, %v14548_v8 }
  0xcc   : > { %12025 = vmatprep.mubr.msk.bf16.mxu0 %vm14648_vm8, %v15025_v34  ;;  %11846 = vmatpush3.bf16.msra.mxu1 %v13931_v1  ;;  %v15063_v1 = vrot.slane %v229_v5, 6 }
  0xcd   : > { %11847 = vmatprep.subr.bf16.mxu1 %v13933_v12 }
  0xd0   : > { %11848 = vmatpush3.bf16.msra.mxu1 %v13933_v12  ;;  %v18020_v12 = vrot.slane %v14663_v45, 6  ;;  %v18024_v45 = vrot.slane %v14694_v61, 6 }
  0xd1   : > { %11849 = vmatprep.subr.bf16.mxu1 %v13935_v58 }
  0xd2   : > { %11818 = vmatmul.mubr.msk.bf16.gmra.mrb[12].mxu1 %vm14823_vm10, %v14571_v24  ;;  %v343_v26 = vsel %vm332_vm5, %v18020_v12, %v18019_v21 }
  0xd3   : > { %12026 = vmatmul.mubr.msk.bf16.gmra.mrb[28].mxu0 %vm14648_vm8, %v10244_v49  ;;  %11821 = vmatprep.mubr.msk.bf16.mxu1 %vm14823_vm10, %v14573_v27  ;;  %v18021_v49 = vmov %v18020_v12  ;;  %v18027_v12 = vrot.slane %v14724_v50, 6  ;;  %v18038_v50 = vmov %v18031_v0 }
  0xd4   : > { %12045 = vmatprep.mubr.msk.bf16.mxu0 %vm14823_vm10, %v18018_v56  ;;  %v344_v5 = vsel %vm332_vm5, %v18022_v59, %v18021_v49  ;;  %11850 = vmatpush3.bf16.msra.mxu1 %v13935_v58  ;;  %v341_v58 = vsel %vm332_vm5, %v18024_v45, %v18023_v46  ;;  %v18025_v59 = vmov %v18024_v45  ;;  %v13938_v45 = vld [vmem:[#allocation6 + $0x1d8] sm:$0xff]  }
  0xd5   : > { %11851 = vmatprep.subr.bf16.mxu1 %v13937_v7  ;;  %v15082_v42 = vpack.c.bf16 %v343_v26, %v344_v5  ;;  %v18028_v26 = vrot.slane %v14713_v40, 6  ;;  %v18032_v40 = vrot.slane %v14748_v32, 6 }
  0xd7   : > { %v339_v49 = vsel %vm332_vm5, %v18028_v26, %v18027_v12  ;;  %v18029_v61 = vmov %v18028_v26  ;;  %v18036_v26 = vrot.slane %v14760_v31, 6  ;;  %v333_v31 = vsel %vm332_vm5, %v18039_v11, %v14807_v37 }
  0xd8   : > { %11852 = vmatpush3.bf16.msra.mxu1 %v13937_v7  ;;  %v18026_v7 = vmov %v18019_v21  ;;  %v13936_v21 = vld [vmem:[#allocation6 + $0x1d0] sm:$0xff]   ;;  %v340_v5 = vsel %vm332_vm5, %v18030_v30, %v18029_v61 }
  0xd9   : > { %11885 = vmatprep.subr.bf16.mxu1 %v15061_v55  ;;  %v342_v56 = vsel %vm332_vm5, %v18026_v7, %v18025_v59  ;;  %v15124_v46 = vpack.c.bf16 %v339_v49, %v340_v5  ;;  %v18034_v59 = vmov %v18027_v12  ;;  %v18035_v12 = vrot.slane %v14763_v51, 6 }
  0xda   : > { %11822 = vmatmul.mubr.msk.bf16.gmra.mrb[16].mxu1 %vm14823_vm10, %v14629_v4  ;;  %v18037_v32 = vmov %v18036_v26  ;;  %v940_v51 = vsel %vm912_vm6, %v14627_v62, %v14587_v35  ;;  %v13943_v35 = vld [vmem:[#allocation6 + $0xd0] sm:$0xff]  }
  0xdb   : > { %12046 = vmatmul.mubr.msk.bf16.vlgmr.msra.gmra.mrb[0].mxu0 %vm14823_vm10, %v14535_v60  ;;  %11825 = vmatprep.mubr.msk.bf16.mxu1 %vm14823_vm10, %v15082_v42  ;;  %v335_v49 = vsel %vm332_vm5, %v18036_v26, %v18035_v12  ;;  %v336_v61 = vsel %vm332_vm5, %v18038_v50, %v18037_v32  ;;  %v18042_v26 = vrot.slane %v14880_v36, 6  ;;  %v13947_v36 = vld [vmem:[#allocation6 + $0xe0] sm:$0xff]  }
  0xdc   : > { %12078 = vmatpush3.bf16.msra.mxu0 %v14904_v10  ;;  %12049 = vmatprep.mubr.msk.bf16.mxu0 %vm14823_vm10, %v14548_v8  ;;  %v15122_v10 = vpack.c.bf16 %v341_v58, %v342_v56  ;;  %v18033_v58 = vmov %v18032_v40  ;;  %v13940_v56 = vld [vmem:[#allocation6 + $0x1e0] sm:$0xff]   ;;  %v15164_v5 = vpack.c.bf16 %v335_v49, %v336_v61 }
  0xdd   : > { %12079 = vmatprep.subr.bf16.mxu0 %v13934_v28  ;;  %v338_v7 = vsel %vm332_vm5, %v18034_v59, %v18033_v58  ;;  %v15193_v59 = vpack.c.bf16 %v14627_v62, %v14627_v62  ;;  %v1317_v49 = vsel %vm332_vm5, %v18042_v26, %v1312_v14  ;;  %v18043_v32 = vmov %v18042_v26  ;;  %v18053_v26 = vld [vmem:[#allocation20_spill] sm:$0xff] }
  0xe0   : > { %12080 = vmatpush3.bf16.msra.mxu0 %v13934_v28  ;;  %v337_v28 = vsel %vm332_vm5, %v18032_v40, %v18031_v0  ;;  %v18041_v0 = vmov %v18035_v12  ;;  %v13941_v12 = vld [vmem:[#allocation6 + $0xc8] sm:$0xff]  }
  0xe1   : > { %12081 = vmatprep.subr.bf16.mxu0 %v13936_v21  ;;  %v15162_v30 = vpack.c.bf16 %v337_v28, %v338_v7  ;;  %v13944_v28 = vld [vmem:[#allocation6 + $0x1f0] sm:$0xff]   ;;  %v13946_v7 = vld [vmem:[#allocation6 + $0x1f8] sm:$0xff]  }
  0xe2   : > { %11826 = vmatmul.mubr.msk.bf16.gmra.mrb[20].mxu1 %vm14823_vm10, %v15122_v10 }
  0xe3   : > { %12050 = vmatmul.mubr.msk.bf16.gmra.mrb[4].mxu0 %vm14823_vm10, %v14571_v24  ;;  %11829 = vmatprep.mubr.msk.bf16.mxu1 %vm14823_vm10, %v15124_v46 }
  0xe4   : > { %12053 = vmatprep.mubr.msk.bf16.mxu0 %vm14823_vm10, %v14573_v27  ;;  %12082 = vmatpush3.bf16.msra.mxu0 %v13936_v21  ;;  %v13942_v21 = vld [vmem:[#allocation6 + $0x1e8] sm:$0xff]  }
  0xe5   : > { %12083 = vmatprep.subr.bf16.mxu0 %v13938_v45 }
  0xe8   : > { %12084 = vmatpush3.bf16.msra.mxu0 %v13938_v45  ;;  %v18040_v45 = vmov %v18039_v11  ;;  %v2365_v11 = vsel %vm332_vm5, %v15063_v1, %v14569_v23 }
  0xe9   : > { %12085 = vmatprep.subr.bf16.mxu0 %v13940_v56  ;;  %v334_v40 = vsel %vm332_vm5, %v18041_v0, %v18040_v45  ;;  %v13949_v45 = vld [vmem:[#allocation6 + $0xe8] sm:$0xff]   ;;  %v10297_v0 = vpack.c.bf16 %v14569_v23, %v2365_v11  ;;  %v13953_v23 = vld [vmem:[#allocation6 + $0xf8] sm:$0xff]  }
  0xea   : > { %11830 = vmatmul.mubr.msk.bf16.gmra.mrb[24].mxu1 %vm14823_vm10, %v15162_v30  ;;  %v15189_v58 = vpack.c.bf16 %v333_v31, %v334_v40  ;;  %v18046_v40 = vld [vmem:[#allocation27_spill] sm:$0xff] }
  0xeb   : > { %12054 = vmatmul.mubr.msk.bf16.gmra.mrb[8].mxu0 %vm14823_vm10, %v14629_v4  ;;  %11833 = vmatprep.mubr.msk.bf16.mxu1 %vm14823_vm10, %v15164_v5  ;;  %v18060_v11 = vld [vmem:[#allocation23_spill] sm:$0xff] }
  0xec   : > { %12057 = vmatprep.mubr.msk.bf16.mxu0 %vm14823_vm10, %v15082_v42  ;;  %12086 = vmatpush3.bf16.msra.mxu0 %v13940_v56  ;;  %v10082_v56 = vpack.c.bf16 %v940_v51, %v14627_v62  ;;  %v18049_v51 = vld [vmem:[#allocation15_spill] sm:$0xff] }
  0xed   : > { %12087 = vmatprep.subr.bf16.mxu0 %v13942_v21 }
  0xf0   : > { %12088 = vmatpush3.bf16.msra.mxu0 %v13942_v21 }
  0xf1   : > { %12089 = vmatprep.subr.bf16.mxu0 %v13944_v28 }
  0xf2   : > { %11834 = vmatmul.mubr.msk.bf16.gmra.mrb[28].mxu1 %vm14823_vm10, %v15189_v58 }
  0xf3   : > { %12058 = vmatmul.mubr.msk.bf16.gmra.mrb[12].mxu0 %vm14823_vm10, %v15122_v10  ;;  %11853 = vmatprep.mubr.msk.bf16.mxu1 %vm14648_vm8, %v15193_v59 }
  0xf4   : > { %12061 = vmatprep.mubr.msk.bf16.mxu0 %vm14823_vm10, %v15124_v46  ;;  %12090 = vmatpush3.bf16.msra.mxu0 %v13944_v28  ;;  %v13954_v28 = vld [vmem:[#allocation6 + $0x218] sm:$0xff]  }
  0xf5   : > { %12091 = vmatprep.subr.bf16.mxu0 %v13946_v7 }
  0xf8   : > { %12092 = vmatpush3.bf16.msra.mxu0 %v13946_v7  ;;  %v18048_v7 = vld [vmem:[#allocation29_spill] sm:$0xff] }
  0xf9   : > { %12125 = vmatprep.subr.bf16.mxu0 %v13948_v47 }
  0xfa   : > { %11854 = vmatmul.mubr.msk.bf16.vlgmr.msra.gmra.mrb[0].mxu1 %vm14648_vm8, %v10082_v56  ;;  %v18050_v56 = vld [vmem:[#allocation30_spill] sm:$0xff] }
  0xfb   : > { %12062 = vmatmul.mubr.msk.bf16.gmra.mrb[16].mxu0 %vm14823_vm10, %v15162_v30  ;;  %11886 = vmatpush3.bf16.msra.mxu1 %v15061_v55  ;;  %v1318_v55 = vsel %vm332_vm5, %v14807_v37, %v18043_v32  ;;  %v18044_v37 = vrot.slane %v14949_v15, 6  ;;  %v13950_v15 = vld [vmem:[#allocation6 + $0x208] sm:$0xff]  }
  0xfc   : > { %11857 = vmatprep.mubr.msk.bf16.mxu1 %vm14648_vm8, %v14652_v22  ;;  %12065 = vmatprep.mubr.msk.bf16.mxu0 %vm14823_vm10, %v15164_v5  ;;  %v13945_v22 = vld [vmem:[#allocation6 + $0xd8] sm:$0xff]   ;;  %v15235_v50 = vpack.c.bf16 %v1317_v49, %v1318_v55  ;;  %v18054_v49 = vld [vmem:[#allocation17_spill] sm:$0xff]  ;;  %v13957_v55 = vld [vmem:[#allocation6 + $0x230] sm:$0xff]  }
  0xfd   : > { %11887 = vmatprep.subr.bf16.mxu1 %v13941_v12  ;;  %v1315_v61 = vsel %vm332_vm5, %v18044_v37, %v15063_v1  ;;  %v1346_v32 = vsel %vm332_vm5, %v15063_v1, %v18054_v49  ;;  %v18059_v1 = vld [vmem:[#allocation22_spill] sm:$0xff] }
  0xff   : > { %11888 = vmatpush3.bf16.msra.mxu1 %v13941_v12  ;;  %v13956_v12 = vld [vmem:[#allocation6 + $0x228] sm:$0xff]  }
 0x100   : > { %11889 = vmatprep.subr.bf16.mxu1 %v13943_v35 }
 0x102   : > { %11858 = vmatmul.mubr.msk.bf16.gmra.mrb[4].mxu1 %vm14648_vm8, %v14686_v52  ;;  %v18045_v52 = vmov %v18044_v37  ;;  %v13958_v37 = vld [vmem:[#allocation6 + $0x238] sm:$0xff]  }
 0x103   : > { %12066 = vmatmul.mubr.msk.bf16.gmra.mrb[20].mxu0 %vm14823_vm10, %v15189_v58  ;;  %11861 = vmatprep.mubr.msk.bf16.mxu1 %vm14648_vm8, %v14697_v63  ;;  %v1316_v21 = vsel %vm332_vm5, %v1312_v14, %v18045_v52  ;;  %v14109_v14 = vld [vmem:[#allocation6 + $0x100] sm:$0xff]  }
 0x104   : > { %12069 = vmatprep.mubr.msk.bf16.mxu0 %vm14823_vm10, %v15235_v50  ;;  %11890 = vmatpush3.bf16.msra.mxu1 %v13943_v35  ;;  %v15264_v31 = vpack.c.bf16 %v1315_v61, %v1316_v21  ;;  %v18052_v35 = vld [vmem:[#allocation19_spill] sm:$0xff]  ;;  %v18056_v61 = vld [vmem:[#allocation25_spill] sm:$0xff] }
 0x105   : > { %11891 = vmatprep.subr.bf16.mxu1 %v13945_v22  ;;  %v18057_v52 = vpack.c.bf16 %v18056_v61, %v14859_v39  ;;  %v18058_v21 = vld [vmem:[#allocation21_spill] sm:$0xff]  ;;  %v18061_v39 = vld [vmem:[#allocation24_spill] sm:$0xff] }
 0x108   : > { %11892 = vmatpush3.bf16.msra.mxu1 %v13945_v22  ;;  %v18055_v22 = vld [vmem:[#allocation28_spill] sm:$0xff] }
 0x109   : > { %11893 = vmatprep.subr.bf16.mxu1 %v13947_v36 }
 0x10a   : > { %11862 = vmatmul.mubr.msk.bf16.gmra.mrb[8].mxu1 %vm14648_vm8, %v14740_v19 }
 0x10b   : > { %12070 = vmatmul.mubr.msk.bf16.gmra.mrb[24].mxu0 %vm14823_vm10, %v15264_v31  ;;  %11865 = vmatprep.mubr.msk.bf16.mxu1 %vm14648_vm8, %v14751_v20 }
 0x10c   : > { %12073 = vmatprep.mubr.msk.bf16.mxu0 %vm14823_vm10, %v10297_v0  ;;  %11894 = vmatpush3.bf16.msra.mxu1 %v13947_v36  ;;  %v10135_v36 = vpack.c.bf16 %v18055_v22, %v1346_v32  ;;  %v14111_v0 = vld [vmem:[#allocation6 + $0x110] sm:$0xff]  }
 0x10d   : > { %11895 = vmatprep.subr.bf16.mxu1 %v13949_v45 }
 0x110   : > { %11896 = vmatpush3.bf16.msra.mxu1 %v13949_v45  ;;  %v14110_v45 = vld [vmem:[#allocation6 + $0x108] sm:$0xff]  }
 0x111   : > { %11897 = vmatprep.subr.bf16.mxu1 %v13951_v54 }
 0x112   : > { %11866 = vmatmul.mubr.msk.bf16.gmra.mrb[12].mxu1 %vm14648_vm8, %v14810_v53 }
 0x113   : > { %12074 = vmatmul.mubr.msk.bf16.gmra.mrb[28].mxu0 %vm14823_vm10, %v14946_v43  ;;  %11869 = vmatprep.mubr.msk.bf16.mxu1 %vm14648_vm8, %v14818_v18  ;;  %v18047_v43 = vld [vmem:[#allocation14_spill] sm:$0xff] }
 0x114   : > { %12093 = vmatprep.mubr.bf16.mxu0 %v14527_v57  ;;  %11898 = vmatpush3.bf16.msra.mxu1 %v13951_v54  ;;  %v13952_v57 = vld [vmem:[#allocation6 + $0x210] sm:$0xff]  }
 0x115   : > { %11899 = vmatprep.subr.bf16.mxu1 %v13953_v23  ;;  %v18062_v54 = vld [vmem:[#allocation26_spill] sm:$0xff] }
 0x118   : > { %11900 = vmatpush3.bf16.msra.mxu1 %v13953_v23  ;;  %v14115_v23 = vld [vmem:[#allocation6 + $0x130] sm:$0xff]  }
 0x119   : > { %13037 = vmatprep.subr.bf16.mxu1 %v14109_v14 }
 0x11a   : > { %11870 = vmatmul.mubr.msk.bf16.gmra.mrb[16].mxu1 %vm14648_vm8, %v14890_v9 }
 0x11b   : > { %12094 = vmatmul.mubr.bf16.vlgmr.msra.gmra.mrb[0].mxu0 %v14562_v13  ;;  %11873 = vmatprep.mubr.msk.bf16.mxu1 %vm14648_vm8, %v18046_v40  ;;  %v18051_v13 = vld [vmem:[#allocation16_spill] sm:$0xff] }
 0x11c   : > { %12126 = vmatpush3.bf16.msra.mxu0 %v13948_v47  ;;  %12097 = vmatprep.mubr.bf16.mxu0 %v18047_v43  ;;  %v13955_v47 = vld [vmem:[#allocation6 + $0x220] sm:$0xff]  }
 0x11d   : > { %12127 = vmatprep.subr.bf16.mxu0 %v13950_v15 }
 0x120   : > { %12128 = vmatpush3.bf16.msra.mxu0 %v13950_v15 }
 0x121   : > { %12129 = vmatprep.subr.bf16.mxu0 %v13952_v57 }
 0x122   : > { %11874 = vmatmul.mubr.msk.bf16.gmra.mrb[20].mxu1 %vm14648_vm8, %v18048_v7 }
 0x123   : > { %12098 = vmatmul.mubr.bf16.gmra.mrb[4].mxu0 %v18049_v51  ;;  %11877 = vmatprep.mubr.msk.bf16.mxu1 %vm14648_vm8, %v18050_v56 }
 0x124   : > { %12101 = vmatprep.mubr.bf16.mxu0 %v18051_v13  ;;  %12130 = vmatpush3.bf16.msra.mxu0 %v13952_v57 }
 0x125   : > { %12131 = vmatprep.subr.bf16.mxu0 %v13954_v28 }
 0x128   : > { %12132 = vmatpush3.bf16.msra.mxu0 %v13954_v28 }
 0x129   : > { %12133 = vmatprep.subr.bf16.mxu0 %v13955_v47 }
 0x12a   : > { %11878 = vmatmul.mubr.msk.bf16.gmra.mrb[24].mxu1 %vm14648_vm8, %v14993_v44 }
 0x12b   : > { %12102 = vmatmul.mubr.bf16.gmra.mrb[8].mxu0 %v18052_v35  ;;  %11881 = vmatprep.mubr.msk.bf16.mxu1 %vm14648_vm8, %v14995_v38 }
 0x12c   : > { %12105 = vmatprep.mubr.bf16.mxu0 %v18053_v26  ;;  %12134 = vmatpush3.bf16.msra.mxu0 %v13955_v47 }
 0x12d   : > { %12135 = vmatprep.subr.bf16.mxu0 %v13956_v12 }
 0x130   : > { %12136 = vmatpush3.bf16.msra.mxu0 %v13956_v12 }
 0x131   : > { %12137 = vmatprep.subr.bf16.mxu0 %v13957_v55 }
 0x132   : > { %11882 = vmatmul.mubr.msk.bf16.gmra.mrb[28].mxu1 %vm14648_vm8, %v18057_v52  ;;  %v13972_v52 = vld [vmem:[#allocation6 + $0x268] sm:$0xff]  }
 0x133   : > { %12106 = vmatmul.mubr.bf16.gmra.mrb[12].mxu0 %v18058_v21  ;;  %11901 = vmatprep.mubr.msk.bf16.mxu1 %vm14823_vm10, %v10135_v36 }
 0x134   : > { %12109 = vmatprep.mubr.bf16.mxu0 %v18059_v1  ;;  %12138 = vmatpush3.bf16.msra.mxu0 %v13957_v55 }
 0x135   : > { %12139 = vmatprep.subr.bf16.mxu0 %v13958_v37 }
 0x138   : > { %12140 = vmatpush3.bf16.msra.mxu0 %v13958_v37 }
 0x13a   : > { %11902 = vmatmul.mubr.msk.bf16.vlgmr.msra.gmra.mrb[0].mxu1 %vm14823_vm10, %v14492_v41  ;;  %v14112_v41 = vld [vmem:[#allocation6 + $0x118] sm:$0xff]  }
 0x13b   : > { %12110 = vmatmul.mubr.bf16.gmra.mrb[16].mxu0 %v18060_v11  ;;  %13045 = vmatpush3.bf16.msra.mxu1 %v14109_v14 }
 0x13c   : > { %11905 = vmatprep.mubr.msk.bf16.mxu1 %vm14823_vm10, %v14511_v48  ;;  %12113 = vmatprep.mubr.bf16.mxu0 %v18061_v39  ;;  %v14113_v48 = vld [vmem:[#allocation6 + $0x120] sm:$0xff]  }
 0x13d   : > { %13038 = vmatprep.subr.bf16.mxu1 %v14110_v45 }
 0x13f   : > { %13046 = vmatpush3.bf16.msra.mxu1 %v14110_v45 }
 0x140   : > { %13039 = vmatprep.subr.bf16.mxu1 %v14111_v0 }
 0x142   : > { %11906 = vmatmul.mubr.msk.bf16.gmra.mrb[4].mxu1 %vm14823_vm10, %v14535_v60  ;;  %v18063_v60 = vmov 0.0|0.0  }
 0x143   : > { %12114 = vmatmul.mubr.bf16.gmra.mrb[20].mxu0 %v18062_v54  ;;  %11909 = vmatprep.mubr.msk.bf16.mxu1 %vm14823_vm10, %v14548_v8  ;;  %v14114_v8 = vld [vmem:[#allocation6 + $0x128] sm:$0xff]  }
 0x144   : > { %12117 = vmatprep.mubr.bf16.mxu0 %v15010_v33  ;;  %13047 = vmatpush3.bf16.msra.mxu1 %v14111_v0 }
 0x145   : > { %13040 = vmatprep.subr.bf16.mxu1 %v14112_v41 }
 0x148   : > { %13048 = vmatpush3.bf16.msra.mxu1 %v14112_v41 }
 0x149   : > { %13041 = vmatprep.subr.bf16.mxu1 %v14113_v48 }
 0x14a   : > { %11910 = vmatmul.mubr.msk.bf16.gmra.mrb[8].mxu1 %vm14823_vm10, %v14571_v24  ;;  %v14116_v24 = vld [vmem:[#allocation6 + $0x138] sm:$0xff]  }
 0x14b   : > { %12118 = vmatmul.mubr.bf16.gmra.mrb[24].mxu0 %v15028_v6  ;;  %11913 = vmatprep.mubr.msk.bf16.mxu1 %vm14823_vm10, %v14573_v27  ;;  %v18064_v27 = vld [vmem:[#allocation18_spill] sm:$0xff] }
 0x14c   : > { %12121 = vmatprep.mubr.bf16.mxu0 %v18063_v60  ;;  %13049 = vmatpush3.bf16.msra.mxu1 %v14113_v48 }
 0x14d   : > { %13042 = vmatprep.subr.bf16.mxu1 %v14114_v8 }
 0x150   : > { %13050 = vmatpush3.bf16.msra.mxu1 %v14114_v8 }
 0x151   : > { %13043 = vmatprep.subr.bf16.mxu1 %v14115_v23 }
 0x152   : > { %11914 = vmatmul.mubr.msk.bf16.gmra.mrb[12].mxu1 %vm14823_vm10, %v14629_v4 }
 0x153   : > { %12122 = vmatmul.mubr.bf16.gmra.mrb[28].mxu0 %v18063_v60  ;;  %11917 = vmatprep.mubr.msk.bf16.mxu1 %vm14823_vm10, %v15082_v42  ;;  %v13967_v42 = vld [vmem:[#allocation6 + $0x240] sm:$0xff]  }
 0x154   : > { %12141 = vmatprep.mubr.msk.bf16.mxu0 %vm14648_vm8, %v14697_v63  ;;  %13051 = vmatpush3.bf16.msra.mxu1 %v14115_v23  ;;  %v13960_v63 = vld [vmem:[#allocation6 + $0x288] sm:$0xff]  }
 0x155   : > { %13044 = vmatprep.subr.bf16.mxu1 %v14116_v24 }
 0x158   : > { %13052 = vmatpush3.bf16.msra.mxu1 %v14116_v24 }
 0x15a   : > { %11918 = vmatmul.mubr.msk.bf16.gmra.mrb[16].mxu1 %vm14823_vm10, %v15122_v10  ;;  %v13968_v10 = vld [vmem:[#allocation6 + $0x248] sm:$0xff]  }
 0x15b   : > { %12142 = vmatmul.mubr.msk.bf16.vlgmr.msra.gmra.mrb[0].mxu0 %vm14648_vm8, %v14740_v19  ;;  %11921 = vmatprep.mubr.msk.bf16.mxu1 %vm14823_vm10, %v15124_v46  ;;  %v3009_v19 = vsel %vm912_vm6, %v14966_v25, %v14627_v62  ;;  %v13966_v25 = vld [vmem:[#allocation6 + $0x2b8] sm:$0xff]  }
 0x15c   : > { %12145 = vmatprep.mubr.msk.bf16.mxu0 %vm14648_vm8, %v14751_v20  ;;  %v10358_v20 = vpack.c.bf16 %v3009_v19, %v15046_v3 }
 0x162   : > { %11922 = vmatmul.mubr.msk.bf16.gmra.mrb[20].mxu1 %vm14823_vm10, %v15162_v30 }
 0x163   : > { %12146 = vmatmul.mubr.msk.bf16.gmra.mrb[4].mxu0 %vm14648_vm8, %v14810_v53  ;;  %11925 = vmatprep.mubr.msk.bf16.mxu1 %vm14823_vm10, %v15164_v5  ;;  %v13961_v53 = vld [vmem:[#allocation6 + $0x290] sm:$0xff]  }
 0x164   : > { %12149 = vmatprep.mubr.msk.bf16.mxu0 %vm14648_vm8, %v14818_v18  ;;  %v13962_v18 = vld [vmem:[#allocation6 + $0x298] sm:$0xff]  }
 0x16a   : > { %11926 = vmatmul.mubr.msk.bf16.gmra.mrb[24].mxu1 %vm14823_vm10, %v15189_v58 }
 0x16b   : > { %12150 = vmatmul.mubr.msk.bf16.gmra.mrb[8].mxu0 %vm14648_vm8, %v14890_v9  ;;  %11929 = vmatprep.mubr.msk.bf16.mxu1 %vm14823_vm10, %v15235_v50  ;;  %v13959_v9 = vld [vmem:[#allocation6 + $0x280] sm:$0xff]  }
 0x16c   : > { %12153 = vmatprep.mubr.msk.bf16.mxu0 %vm14648_vm8, %v18046_v40  ;;  %12173 = vmatprep.subr.bf16.mxu1 %v13959_v9  ;;  %v13970_v40 = vld [vmem:[#allocation6 + $0x258] sm:$0xff]  }
 0x172   : > { %11930 = vmatmul.mubr.msk.bf16.gmra.mrb[28].mxu1 %vm14823_vm10, %v15264_v31 }
 0x173   : > { %12154 = vmatmul.mubr.msk.bf16.gmra.mrb[12].mxu0 %vm14648_vm8, %v18048_v7  ;;  %11965 = vmatprep.mubr.bf16.mxu1 %v18053_v26  ;;  %v13971_v7 = vld [vmem:[#allocation6 + $0x260] sm:$0xff]  }
 0x174   : > { %12157 = vmatprep.mubr.msk.bf16.mxu0 %vm14648_vm8, %v18050_v56 }
 0x17a   : > { %11966 = vmatmul.mubr.bf16.vlgmr.msra.gmra.mrb[16].mxu1 %v18058_v21 }
 0x17b   : > { %12158 = vmatmul.mubr.msk.bf16.gmra.mrb[16].mxu0 %vm14648_vm8, %v14993_v44  ;;  %11969 = vmatprep.mubr.bf16.mxu1 %v18059_v1  ;;  %v3037_v44 = vsel %vm912_vm6, %v14627_v62, %v18064_v27 }
 0x17c   : > { %12161 = vmatprep.mubr.msk.bf16.mxu0 %vm14648_vm8, %v14995_v38  ;;  %v10364_v4 = vpack.c.bf16 %v3037_v44, %v14627_v62  ;;  %12174 = vmatpush3.bf16.msra.mxu1 %v13959_v9  ;;  %v13963_v62 = vld [vmem:[#allocation6 + $0x2a0] sm:$0xff]  }
 0x17d   : > { %12175 = vmatprep.subr.bf16.mxu1 %v13960_v63 }
 0x180   : > { %12176 = vmatpush3.bf16.msra.mxu1 %v13960_v63 }
 0x181   : > { %12177 = vmatprep.subr.bf16.mxu1 %v13961_v53 }
 0x182   : > { %11970 = vmatmul.mubr.bf16.gmra.mrb[20].mxu1 %v18060_v11 }
 0x183   : > { %12162 = vmatmul.mubr.msk.bf16.gmra.mrb[20].mxu0 %vm14648_vm8, %v15023_v17  ;;  %11973 = vmatprep.mubr.bf16.mxu1 %v18061_v39 }
 0x184   : > { %12165 = vmatprep.mubr.msk.bf16.mxu0 %vm14648_vm8, %v15025_v34  ;;  %12178 = vmatpush3.bf16.msra.mxu1 %v13961_v53 }
 0x185   : > { %12179 = vmatprep.subr.bf16.mxu1 %v13962_v18 }
 0x188   : > { %12180 = vmatpush3.bf16.msra.mxu1 %v13962_v18  ;;  %v13973_v18 = vld [vmem:[#allocation6 + $0x270] sm:$0xff]  }
 0x189   : > { %12181 = vmatprep.subr.bf16.mxu1 %v13963_v62 }
 0x18a   : > { %11974 = vmatmul.mubr.bf16.gmra.mrb[24].mxu1 %v18062_v54 }
 0x18b   : > { %12166 = vmatmul.mubr.msk.bf16.gmra.mrb[24].mxu0 %vm14648_vm8, %v10358_v20  ;;  %11977 = vmatprep.mubr.bf16.mxu1 %v15010_v33 }
 0x18c   : > { %12169 = vmatprep.mubr.msk.bf16.mxu0 %vm14648_vm8, %v15193_v59  ;;  %12182 = vmatpush3.bf16.msra.mxu1 %v13963_v62  ;;  %v13969_v59 = vld [vmem:[#allocation6 + $0x250] sm:$0xff]  }
 0x18d   : > { %12183 = vmatprep.subr.bf16.mxu1 %v13964_v16 }
 0x190   : > { %12184 = vmatpush3.bf16.msra.mxu1 %v13964_v16 }
 0x191   : > { %12185 = vmatprep.subr.bf16.mxu1 %v13965_v29 }
 0x192   : > { %11978 = vmatmul.mubr.bf16.gmra.mrb[28].mxu1 %v15028_v6 }
 0x193   : > { %12170 = vmatmul.mubr.msk.bf16.gmra.mrb[28].mxu0 %vm14648_vm8, %v10364_v4  ;;  %12189 = vmatprep.mubr.bf16.mxu1 %v18063_v60 }
 0x194   : > { %12621 = vmatprep.mubr.bf16.mxu0 %v18063_v60  ;;  %12186 = vmatpush3.bf16.msra.mxu1 %v13965_v29 }
 0x195   : > { %12187 = vmatprep.subr.bf16.mxu1 %v13966_v25 }
 0x198   : > { %12188 = vmatpush3.bf16.msra.mxu1 %v13966_v25 }
 0x199   : > { %12221 = vmatprep.subr.bf16.mxu1 %v13967_v42 }
 0x19b   : > { %12190 = vmatmul.mubr.bf16.vlgmr.msra.gmra.mrb[32].mxu1 %v18063_v60 }
 0x19c   : > { %12193 = vmatprep.mubr.bf16.mxu1 %v18063_v60  ;;  %12222 = vmatpush3.bf16.msra.mxu1 %v13967_v42 }
 0x19d   : > { %12223 = vmatprep.subr.bf16.mxu1 %v13968_v10 }
 0x1a0   : > { %12224 = vmatpush3.bf16.msra.mxu1 %v13968_v10 }
 0x1a1   : > { %12225 = vmatprep.subr.bf16.mxu1 %v13969_v59 }
 0x1a3   : > { %12194 = vmatmul.mubr.bf16.gmra.mrb[36].mxu1 %v18063_v60 }
 0x1a4   : > { %12226 = vmatpush3.bf16.msra.mxu1 %v13969_v59 }
 0x1a5   : > { %12227 = vmatprep.subr.bf16.mxu1 %v13970_v40 }
 0x1a8   : > { %12228 = vmatpush3.bf16.msra.mxu1 %v13970_v40 }
 0x1a9   : > { %12229 = vmatprep.subr.bf16.mxu1 %v13971_v7 }
 0x1ac   : > { %12230 = vmatpush3.bf16.msra.mxu1 %v13971_v7  ;;  %v13974_v7 = vld [vmem:[#allocation6 + $0x278] sm:$0xff]  }
 0x1ad   : > { %12231 = vmatprep.subr.bf16.mxu1 %v13972_v52 }
 0x1b0   : > { %12232 = vmatpush3.bf16.msra.mxu1 %v13972_v52 }
 0x1b1   : > { %12233 = vmatprep.subr.bf16.mxu1 %v13973_v18 }
 0x1b4   : > { %12234 = vmatpush3.bf16.msra.mxu1 %v13973_v18 }
 0x1b5   : > { %12235 = vmatprep.subr.bf16.mxu1 %v13974_v7 }
 0x1b8   : > { %12236 = vmatpush3.bf16.msra.mxu1 %v13974_v7 }
 0x20d   : > { %v11903_v38 = vpop.f32.mrb[0].mxu1 }
 0x20e   : > { %v1494_v6 = vpop.f32.mrb[1].mxu1 }
 0x20f   : > { %v11904_v33 = vpop.f32.mrb[2].mxu1 }
 0x210   : > { %v1497_v17 = vpop.f32.mrb[3].mxu1 }
 0x215   : > { %v11907_v34 = vpop.f32.mrb[4].mxu1 }
 0x216   : > { %v1510_v3 = vpop.f32.mrb[5].mxu1 }
 0x217   : > { %v11908_v46 = vpop.f32.mrb[6].mxu1 }
 0x218   : > { %v1513_v30 = vpop.f32.mrb[7].mxu1 }
 0x21d   : > { %v11911_v5 = vpop.f32.mrb[8].mxu1 }
 0x21e   : > { %v1526_v58 = vpop.f32.mrb[9].mxu1 }
 0x21f   : > { %v11912_v50 = vpop.f32.mrb[10].mxu1 }
 0x220   : > { %v15447_v31 = vpop.f32.mrb[11].mxu1 }
 0x225   : > { %v15449_v15 = vpop.f32.mrb[12].mxu1 }
 0x226   : > { %v15451_v14 = vpop.f32.mrb[13].mxu1 }
 0x227   : > { %v15453_v43 = vpop.f32.mrb[14].mxu1 }
 0x228   : > { %v15455_v57 = vpop.f32.mrb[15].mxu1 }
 0x22e   : > { %v12143_v28 = vpop.f32.mrb[0].mxu0 }
 0x22f   : > { %v15457_v51 = vadd.f32 %v12143_v28, %v11903_v38  ;;  %v3185_v56 = vpop.f32.mrb[1].mxu0 }
 0x230   : > { %v15459_v13 = vadd.f32 %v3185_v56, %v1494_v6  ;;  %v12144_v47 = vpop.f32.mrb[2].mxu0 }
 0x231   : > { %v15461_v12 = vadd.f32 %v12144_v47, %v11904_v33  ;;  %v3188_v35 = vpop.f32.mrb[3].mxu0  ;;  %v3384_v22 = vmul.f32 %v15457_v51, %v15457_v51 }
 0x232   : > { %v15463_v26 = vadd.f32 %v3188_v35, %v1497_v17  ;;  %v3382_v49 = vmul.f32 %v15459_v13, %v15459_v13 }
 0x233   : > { %v3385_v11 = vmul.f32 %v15461_v12, %v15461_v12 }
 0x234   : > { %v3344_v32 = vadd.f32 %v15463_v26, %v15459_v13  ;;  %v3383_v55 = vmul.f32 %v15463_v26, %v15463_v26 }
 0x236   : > { %v3345_v36 = vadd.f32 %v15457_v51, %v3344_v32  ;;  %v3414_v37 = vadd.f32 %v3383_v55, %v3382_v49  ;;  %v12147_v61 = vpop.f32.mrb[4].mxu0 }
 0x237   : > { %v15474_v21 = vadd.f32 %v12147_v61, %v11907_v34  ;;  %v3201_v1 = vpop.f32.mrb[5].mxu0 }
 0x238   : > { %v3415_v39 = vadd.f32 %v3414_v37, %v3384_v22  ;;  %v15478_v45 = vadd.f32 %v3201_v1, %v1510_v3  ;;  %v3346_v0 = vadd.f32 %v15461_v12, %v3345_v36  ;;  %v12148_v54 = vpop.f32.mrb[6].mxu0 }
 0x239   : > { %v15481_v41 = vadd.f32 %v12148_v54, %v11908_v46  ;;  %v3204_v48 = vpop.f32.mrb[7].mxu0  ;;  %v3388_v4 = vmul.f32 %v15474_v21, %v15474_v21 }
 0x23a   : > { %v3347_v8 = vadd.f32 %v15478_v45, %v3346_v0  ;;  %v3386_v23 = vmul.f32 %v15478_v45, %v15478_v45  ;;  %v3416_v24 = vadd.f32 %v3415_v39, %v3385_v11  ;;  %v15486_v19 = vadd.f32 %v3204_v48, %v1513_v30 }
 0x23b   : > { %v3389_v29 = vmul.f32 %v15481_v41, %v15481_v41 }
 0x23c   : > { %v3417_v20 = vadd.f32 %v3416_v24, %v3386_v23  ;;  %v3348_v27 = vadd.f32 %v15486_v19, %v3347_v8  ;;  %v3387_v44 = vmul.f32 %v15486_v19, %v15486_v19  ;;  %v15539_v23 = vld [vmem:[#allocation6 + $0x2c0] sm:$0xff]  }
 0x23d   : > { %18065 = vst [vmem:[#allocation27_spill] sm:$0xff] %v15539_v23  ;;  %12269 = vmatprep.subr.bf16.mxu1 %v15539_v23 }
 0x23e   : > { %v3349_v9 = vadd.f32 %v15474_v21, %v3348_v27  ;;  %v3418_v63 = vadd.f32 %v3417_v20, %v3387_v44  ;;  %v12151_v53 = vpop.f32.mrb[8].mxu0 }
 0x23f   : > { %v15494_v62 = vadd.f32 %v12151_v53, %v11911_v5  ;;  %v3217_v16 = vpop.f32.mrb[9].mxu0 }
 0x240   : > { %v3419_v25 = vadd.f32 %v3418_v63, %v3388_v4  ;;  %v15498_v38 = vadd.f32 %v3217_v16, %v1526_v58  ;;  %v3350_v6 = vadd.f32 %v15481_v41, %v3349_v9  ;;  %v12152_v33 = vpop.f32.mrb[10].mxu0 }
 0x241   : > { %v15501_v17 = vadd.f32 %v12152_v33, %v11912_v50  ;;  %v3220_v34 = vpop.f32.mrb[11].mxu0  ;;  %v3392_v59 = vmul.f32 %v15494_v62, %v15494_v62 }
 0x242   : > { %v3351_v3 = vadd.f32 %v15498_v38, %v3350_v6  ;;  %v3390_v42 = vmul.f32 %v15498_v38, %v15498_v38  ;;  %v3420_v10 = vadd.f32 %v3419_v25, %v3389_v29  ;;  %v15507_v46 = vadd.f32 %v3220_v34, %v15447_v31 }
 0x243   : > { %v3393_v31 = vmul.f32 %v15501_v17, %v15501_v17 }
 0x244   : > { %v3421_v30 = vadd.f32 %v3420_v10, %v3390_v42  ;;  %v3352_v5 = vadd.f32 %v15507_v46, %v3351_v3  ;;  %v3391_v58 = vmul.f32 %v15507_v46, %v15507_v46 }
 0x246   : > { %v3353_v50 = vadd.f32 %v15494_v62, %v3352_v5  ;;  %v3422_v40 = vadd.f32 %v3421_v30, %v3391_v58  ;;  %v12155_v28 = vpop.f32.mrb[12].mxu0 }
 0x247   : > { %v15516_v56 = vadd.f32 %v12155_v28, %v15449_v15  ;;  %v3233_v47 = vpop.f32.mrb[13].mxu0 }
 0x248   : > { %v3423_v35 = vadd.f32 %v3422_v40, %v3392_v59  ;;  %v15521_v49 = vadd.f32 %v3233_v47, %v15451_v14  ;;  %v3354_v32 = vadd.f32 %v15501_v17, %v3353_v50  ;;  %v12156_v55 = vpop.f32.mrb[14].mxu0 }
 0x249   : > { %v15525_v22 = vadd.f32 %v12156_v55, %v15453_v43  ;;  %v3236_v36 = vpop.f32.mrb[15].mxu0  ;;  %v3396_v43 = vmul.f32 %v15516_v56, %v15516_v56 }
 0x24a   : > { %v3355_v15 = vadd.f32 %v15521_v49, %v3354_v32  ;;  %v3394_v37 = vmul.f32 %v15521_v49, %v15521_v49  ;;  %v3424_v61 = vadd.f32 %v3423_v35, %v3393_v31  ;;  %v15531_v52 = vadd.f32 %v3236_v36, %v15455_v57 }
 0x24b   : > { %v3397_v27 = vmul.f32 %v15525_v22, %v15525_v22 }
 0x24c   : > { %v3425_v14 = vadd.f32 %v3424_v61, %v3394_v37  ;;  %v3356_v1 = vadd.f32 %v15531_v52, %v3355_v15  ;;  %v3395_v11 = vmul.f32 %v15531_v52, %v15531_v52 }
 0x24d   : > { %v11967_v39 = vpop.f32.mrb[16].mxu1 }
 0x24e   : > { %v3357_v0 = vadd.f32 %v15516_v56, %v3356_v1  ;;  %v3426_v54 = vadd.f32 %v3425_v14, %v3395_v11  ;;  %v12159_v48 = vpop.f32.mrb[16].mxu0  ;;  %v1832_v8 = vpop.f32.mrb[17].mxu1 }
 0x24f   : > { %v15541_v24 = vadd.f32 %v12159_v48, %v11967_v39  ;;  %v3249_v57 = vpop.f32.mrb[17].mxu0  ;;  %v11968_v20 = vpop.f32.mrb[18].mxu1 }
 0x250   : > { %v3427_v44 = vadd.f32 %v3426_v54, %v3396_v43  ;;  %v15545_v4 = vadd.f32 %v3249_v57, %v1832_v8  ;;  %v3358_v9 = vadd.f32 %v15525_v22, %v3357_v0  ;;  %v12160_v63 = vpop.f32.mrb[18].mxu0  ;;  %v1835_v53 = vpop.f32.mrb[19].mxu1 }
 0x251   : > { %v15549_v18 = vadd.f32 %v12160_v63, %v11968_v20  ;;  %v3252_v16 = vpop.f32.mrb[19].mxu0  ;;  %v3400_v30 = vmul.f32 %v15541_v24, %v15541_v24 }
 0x252   : > { %v3359_v29 = vadd.f32 %v15545_v4, %v3358_v9  ;;  %v3398_v25 = vmul.f32 %v15545_v4, %v15545_v4  ;;  %v3428_v6 = vadd.f32 %v3427_v44, %v3397_v27  ;;  %v15554_v33 = vadd.f32 %v3252_v16, %v1835_v53 }
 0x253   : > { %v3401_v47 = vmul.f32 %v15549_v18, %v15549_v18 }
 0x254   : > { %v3429_v34 = vadd.f32 %v3428_v6, %v3398_v25  ;;  %v3360_v3 = vadd.f32 %v15554_v33, %v3359_v29  ;;  %v3399_v42 = vmul.f32 %v15554_v33, %v15554_v33 }
 0x255   : > { %v11971_v10 = vpop.f32.mrb[20].mxu1 }
 0x256   : > { %v3361_v5 = vadd.f32 %v15541_v24, %v3360_v3  ;;  %v3430_v58 = vadd.f32 %v3429_v34, %v3399_v42  ;;  %v12163_v59 = vpop.f32.mrb[20].mxu0  ;;  %v1848_v50 = vpop.f32.mrb[21].mxu1 }
 0x257   : > { %v15562_v40 = vadd.f32 %v12163_v59, %v11971_v10  ;;  %v3265_v28 = vpop.f32.mrb[21].mxu0  ;;  %v11972_v7 = vpop.f32.mrb[22].mxu1 }
 0x258   : > { %v3431_v31 = vadd.f32 %v3430_v58, %v3400_v30  ;;  %v15566_v35 = vadd.f32 %v3265_v28, %v1848_v50  ;;  %v3362_v32 = vadd.f32 %v15549_v18, %v3361_v5  ;;  %v12164_v55 = vpop.f32.mrb[22].mxu0  ;;  %v1851_v36 = vpop.f32.mrb[23].mxu1 }
 0x259   : > { %v15569_v15 = vadd.f32 %v12164_v55, %v11972_v7  ;;  %v3268_v37 = vpop.f32.mrb[23].mxu0  ;;  %v3404_v48 = vmul.f32 %v15562_v40, %v15562_v40 }
 0x25a   : > { %v3363_v61 = vadd.f32 %v15566_v35, %v3362_v32  ;;  %v3402_v14 = vmul.f32 %v15566_v35, %v15566_v35  ;;  %v3432_v1 = vadd.f32 %v3431_v31, %v3401_v47  ;;  %v15574_v11 = vadd.f32 %v3268_v37, %v1851_v36 }
 0x25b   : > { %v3405_v53 = vmul.f32 %v15569_v15, %v15569_v15 }
 0x25c   : > { %v3433_v39 = vadd.f32 %v3432_v1, %v3402_v14  ;;  %v3364_v43 = vadd.f32 %v15574_v11, %v3363_v61  ;;  %v3403_v0 = vmul.f32 %v15574_v11, %v15574_v11 }
 0x25d   : > { %v11975_v54 = vpop.f32.mrb[24].mxu1 }
 0x25e   : > { %v3365_v8 = vadd.f32 %v15562_v40, %v3364_v43  ;;  %v3434_v57 = vadd.f32 %v3433_v39, %v3403_v0  ;;  %v12167_v20 = vpop.f32.mrb[24].mxu0  ;;  %v1864_v27 = vpop.f32.mrb[25].mxu1 }
 0x25f   : > { %v15582_v44 = vadd.f32 %v12167_v20, %v11975_v54  ;;  %v3281_v9 = vpop.f32.mrb[25].mxu0  ;;  %v11976_v63 = vpop.f32.mrb[26].mxu1 }
 0x260   : > { %v3435_v16 = vadd.f32 %v3434_v57, %v3404_v48  ;;  %v15586_v29 = vadd.f32 %v3281_v9, %v1864_v27  ;;  %v3366_v25 = vadd.f32 %v15569_v15, %v3365_v8  ;;  %v12168_v6 = vpop.f32.mrb[26].mxu0  ;;  %v1867_v34 = vpop.f32.mrb[27].mxu1 }
 0x261   : > { %v15589_v3 = vadd.f32 %v12168_v6, %v11976_v63  ;;  %v3284_v42 = vpop.f32.mrb[27].mxu0  ;;  %v3408_v47 = vmul.f32 %v15582_v44, %v15582_v44 }
 0x262   : > { %v3367_v10 = vadd.f32 %v15586_v29, %v3366_v25  ;;  %v3406_v30 = vmul.f32 %v15586_v29, %v15586_v29  ;;  %v3436_v5 = vadd.f32 %v3435_v16, %v3405_v53  ;;  %v15594_v58 = vadd.f32 %v3284_v42, %v1867_v34 }
 0x263   : > { %v3409_v1 = vmul.f32 %v15589_v3, %v15589_v3 }
 0x264   : > { %v3437_v59 = vadd.f32 %v3436_v5, %v3406_v30  ;;  %v3368_v50 = vadd.f32 %v15594_v58, %v3367_v10  ;;  %v3407_v28 = vmul.f32 %v15594_v58, %v15594_v58 }
 0x265   : > { %v11979_v7 = vpop.f32.mrb[28].mxu1 }
 0x266   : > { %v3369_v31 = vadd.f32 %v15582_v44, %v3368_v50  ;;  %v3438_v32 = vadd.f32 %v3437_v59, %v3407_v28  ;;  %v12171_v55 = vpop.f32.mrb[28].mxu0  ;;  %v1880_v36 = vpop.f32.mrb[29].mxu1 }
 0x267   : > { %v15602_v37 = vadd.f32 %v12171_v55, %v11979_v7  ;;  %v3297_v61 = vpop.f32.mrb[29].mxu0  ;;  %v11980_v14 = vpop.f32.mrb[30].mxu1 }
 0x268   : > { %v3439_v39 = vadd.f32 %v3438_v32, %v3408_v47  ;;  %v15606_v43 = vadd.f32 %v3297_v61, %v1880_v36  ;;  %v3370_v0 = vadd.f32 %v15589_v3, %v3369_v31  ;;  %v12172_v54 = vpop.f32.mrb[30].mxu0  ;;  %v1883_v48 = vpop.f32.mrb[31].mxu1 }
 0x269   : > { %v15609_v8 = vadd.f32 %v12172_v54, %v11980_v14  ;;  %v3300_v57 = vpop.f32.mrb[31].mxu0  ;;  %v3412_v6 = vmul.f32 %v15602_v37, %v15602_v37 }
 0x26a   : > { %v3371_v20 = vadd.f32 %v15606_v43, %v3370_v0  ;;  %v3410_v27 = vmul.f32 %v15606_v43, %v15606_v43  ;;  %v3440_v9 = vadd.f32 %v3439_v39, %v3409_v1  ;;  %v13084_v63 = vadd.f32 %v3300_v57, %v1883_v48 }
 0x26b   : > { %v3413_v10 = vmul.f32 %v15609_v8, %v15609_v8 }
 0x26c   : > { %v3441_v53 = vadd.f32 %v3440_v9, %v3410_v27  ;;  %v3372_v16 = vadd.f32 %v13084_v63, %v3371_v20  ;;  %v3411_v25 = vmul.f32 %v13084_v63, %v13084_v63 }
 0x26e   : > { %v3373_v34 = vadd.f32 %v15602_v37, %v3372_v16  ;;  %v3442_v42 = vadd.f32 %v3441_v53, %v3411_v25 }
 0x270   : > { %v3374_v30 = vadd.f32 %v15609_v8, %v3373_v34  ;;  %v3443_v5 = vadd.f32 %v3442_v42, %v3412_v6 }
 0x272   : > { %v3375_v59 = vrot.slane %v3374_v30, 4  ;;  %v3444_v50 = vadd.f32 %v3443_v5, %v3413_v10 }
 0x274   : > { %v3376_v28 = vadd.f32 %v3375_v59, %v3374_v30  ;;  %v3445_v7 = vrot.slane %v3444_v50, 4 }
 0x276   : > { %v3377_v47 = vrot.slane %v3376_v28, 2  ;;  %v3446_v31 = vadd.f32 %v3445_v7, %v3444_v50 }
 0x278   : > { %v3378_v32 = vadd.f32 %v3377_v47, %v3376_v28  ;;  %v3447_v55 = vrot.slane %v3446_v31, 2 }
 0x27a   : > { %v3379_v36 = vrot.slane %v3378_v32, 1  ;;  %v3448_v61 = vadd.f32 %v3447_v55, %v3446_v31 }
 0x27c   : > { %v3380_v14 = vadd.f32 %v3379_v36, %v3378_v32  ;;  %v3449_v1 = vrot.slane %v3448_v61, 1 }
 0x27e   : > { %v15620_v39 = vmul.f32 0.00390625, %v3380_v14  ;;  %v3450_v0 = vadd.f32 %v3449_v1, %v3448_v61  ;;  %v18066_v14 = vmov 0.0  }
 0x280   : > { %v3451_v54 = vmul.f32 0.00390625, %v3450_v0  ;;  %v3452_v48 = vmul.f32 %v15620_v39, %v15620_v39  ;;  %v3483_v57 = vsub.f32 %v13084_v63, %v15620_v39  ;;  %v3463_v27 = vsub.f32 %v15507_v46, %v15620_v39 }
 0x281   : > { %v3465_v9 = vsub.f32 %v15501_v17, %v15620_v39  ;;  %v3466_v16 = vsub.f32 %v15521_v49, %v15620_v39  ;;  %v3467_v25 = vsub.f32 %v15531_v52, %v15620_v39  ;;  %v3478_v7 = vsub.f32 %v15586_v29, %v15620_v39 }
 0x282   : > { %v3453_v20 = vsub.f32 %v3451_v54, %v3452_v48  ;;  %v3479_v47 = vsub.f32 %v15594_v58, %v15620_v39  ;;  %v3480_v31 = vsub.f32 %v15582_v44, %v15620_v39  ;;  %v3481_v32 = vsub.f32 %v15589_v3, %v15620_v39 }
 0x283   : > { %v3482_v55 = vsub.f32 %v15606_v43, %v15620_v39  ;;  %v3484_v36 = vsub.f32 %v15602_v37, %v15620_v39  ;;  %v3485_v61 = vsub.f32 %v15609_v8, %v15620_v39  ;;  %v15668_v29 = vrot.slane %v18066_v14, 4 }
 0x284   : > { %v3486_v53 = vadd.f32 1e-05, %v3453_v20  ;;  %v3454_v58 = vsub.f32 %v15459_v13, %v15620_v39  ;;  %v3455_v44 = vsub.f32 %v15463_v26, %v15620_v39  ;;  %v3456_v3 = vsub.f32 %v15457_v51, %v15620_v39 }
 0x285   : > { %v3457_v43 = vsub.f32 %v15461_v12, %v15620_v39  ;;  %v3458_v37 = vsub.f32 %v15478_v45, %v15620_v39  ;;  %v3459_v8 = vsub.f32 %v15486_v19, %v15620_v39  ;;  %v3460_v13 = vsub.f32 %v15474_v21, %v15620_v39 }
 0x286   : > { %14103 = vrsqrt.f32 %v3486_v53  ;;  %v3461_v26 = vsub.f32 %v15481_v41, %v15620_v39  ;;  %v18072_v17 = vsub.f32 %v15525_v22, %v15620_v39 }
 0x290   : > { %v15678_v1 = vpop.eup %14103 }
 0x291   : > { %v15689_v0 = vmul.f32 %v15678_v1, %v3483_v57  ;;  %v15692_v51 = vmul.f32 %v15678_v1, %v3478_v7  ;;  %v15695_v12 = vmul.f32 %v15678_v1, %v3479_v47  ;;  %v15698_v45 = vmul.f32 %v15678_v1, %v3480_v31 }
 0x292   : > { %v15701_v19 = vmul.f32 %v15678_v1, %v3481_v32  ;;  %v15704_v21 = vmul.f32 %v15678_v1, %v3482_v55  ;;  %v15707_v41 = vmul.f32 %v15678_v1, %v3484_v36  ;;  %v15710_v54 = vmul.f32 %v15678_v1, %v3485_v61 }
 0x293   : > { %v17898_v48 = vmax.f32 %v15689_v0, 0.0  ;;  %v17899_v57 = vmax.f32 %v15692_v51, 0.0  ;;  %v17900_v20 = vmax.f32 %v15695_v12, 0.0  ;;  %v17901_v53 = vmax.f32 %v15698_v45, 0.0 }
 0x294   : > { %v3462_v7 = vsub.f32 %v15498_v38, %v15620_v39  ;;  %v3464_v47 = vsub.f32 %v15494_v62, %v15620_v39  ;;  %v17902_v31 = vmax.f32 %v15701_v19, 0.0  ;;  %v17903_v32 = vmax.f32 %v15704_v21, 0.0 }
 0x295   : > { %v15724_v55 = vrot.slane %v17898_v48, 4  ;;  %v17905_v36 = vmax.f32 %v15707_v41, 0.0  ;;  %v17904_v61 = vmax.f32 %v15710_v54, 0.0  ;;  %v15730_v14 = vrot.slane %v17899_v57, 4 }
 0x296   : > { %v15734_v38 = vrot.slane %v17900_v20, 4  ;;  %v15738_v62 = vrot.slane %v17901_v53, 4  ;;  %v15742_v48 = vrot.slane %v17902_v31, 4  ;;  %v15746_v28 = vrot.slane %v17903_v32, 4 }
 0x297   : > { %v3488_v50 = vmul.f32 %v15678_v1, %v3454_v58  ;;  %v3489_v57 = vmul.f32 %v15678_v1, %v3455_v44  ;;  %v3490_v59 = vmul.f32 %v15678_v1, %v3456_v3  ;;  %v3491_v20 = vmul.f32 %v15678_v1, %v3457_v43 }
 0x298   : > { %v3492_v5 = vmul.f32 %v15678_v1, %v3458_v37  ;;  %v3493_v53 = vmul.f32 %v15678_v1, %v3459_v8  ;;  %v3494_v30 = vmul.f32 %v15678_v1, %v3460_v13  ;;  %v3495_v31 = vmul.f32 %v15678_v1, %v3461_v26 }
 0x299   : > { %v3520_v10 = vmax.f32 %v3488_v50, 0.0  ;;  %v3521_v42 = vmax.f32 %v3489_v57, 0.0  ;;  %v3522_v32 = vmax.f32 %v3490_v59, 0.0  ;;  %v3523_v34 = vmax.f32 %v3491_v20, 0.0 }
 0x29a   : > { %v3524_v63 = vmax.f32 %v3492_v5, 0.0  ;;  %v3525_v58 = vmax.f32 %v3493_v53, 0.0  ;;  %v3526_v6 = vmax.f32 %v3494_v30, 0.0  ;;  %v3527_v44 = vmax.f32 %v3495_v31, 0.0 }
 0x29b   : > { %v15758_v3 = vrot.slane %v17905_v36, 4  ;;  %v15762_v43 = vrot.slane %v17904_v61, 4  ;;  %v15764_v37 = vrot.slane %v3520_v10, 4  ;;  %v15766_v8 = vpack.c.bf16 %v3521_v42, %v3520_v10 }
 0x29c   : > { %v15768_v50 = vrot.slane %v3521_v42, 4  ;;  %v15770_v59 = vrot.slane %v3522_v32, 4  ;;  %v15772_v5 = vrot.slane %v3523_v34, 4  ;;  %v15774_v30 = vpack.c.bf16 %v3523_v34, %v3522_v32 }
 0x29d   : > { %18067 = vst [vmem:[#allocation14_spill] sm:$0xff] %v15766_v8  ;;  %12197 = vmatprep.mubr.bf16.mxu1 %v15766_v8  ;;  %v15777_v13 = vrot.slane %v3524_v63, 4  ;;  %v15779_v26 = vrot.slane %v3525_v58, 4  ;;  %v15781_v57 = vpack.c.bf16 %v3525_v58, %v3524_v63  ;;  %v15783_v20 = vpack.c.bf16 %v3527_v44, %v3526_v6 }
 0x29e   : > { %18068 = vst [vmem:[#allocation29_spill] sm:$0xff] %v15774_v30  ;;  %12198 = vmatmul.mubr.bf16.gmra.mrb[40].mxu1 %v15774_v30  ;;  %v3496_v42 = vmul.f32 %v15678_v1, %v3462_v7  ;;  %v3497_v34 = vmul.f32 %v15678_v1, %v3463_v27  ;;  %v3498_v10 = vmul.f32 %v15678_v1, %v3464_v47  ;;  %v3634_v61 = vrot.slane %v3526_v6, 4 }
 0x29f   : > { %18069 = vst [vmem:[#allocation15_spill] sm:$0xff] %v15781_v57  ;;  %18070 = vst [vmem:[#allocation30_spill] sm:$0xff] %v15783_v20  ;;  %v3499_v53 = vmul.f32 %v15678_v1, %v3465_v9  ;;  %12201 = vmatprep.mubr.bf16.mxu1 %v15781_v57  ;;  %v3500_v63 = vmul.f32 %v15678_v1, %v3466_v16  ;;  %v3501_v46 = vmul.f32 %v15678_v1, %v3467_v25 }
 0x2a0   : > { %v18071_v27 = vsub.f32 %v15516_v56, %v15620_v39  ;;  %v3503_v9 = vmul.f32 %v15678_v1, %v18072_v17  ;;  %v3528_v47 = vmax.f32 %v3496_v42, 0.0  ;;  %v3529_v31 = vmax.f32 %v3497_v34, 0.0 }
 0x2a1   : > { %v3530_v49 = vmax.f32 %v3498_v10, 0.0  ;;  %v3531_v32 = vmax.f32 %v3499_v53, 0.0  ;;  %v3532_v16 = vmax.f32 %v3500_v63, 0.0  ;;  %v3533_v52 = vmax.f32 %v3501_v46, 0.0 }
 0x2a2   : > { %v3502_v7 = vmul.f32 %v15678_v1, %v18071_v27  ;;  %v3535_v25 = vmax.f32 %v3503_v9, 0.0  ;;  %v3635_v36 = vrot.slane %v3527_v44, 4  ;;  %v15814_v56 = vrot.slane %v3528_v47, 4 }
 0x2a3   : > { %v15816_v27 = vpack.c.bf16 %v3529_v31, %v3528_v47  ;;  %v3637_v60 = vrot.slane %v3529_v31, 4  ;;  %v3638_v22 = vrot.slane %v3530_v49, 4  ;;  %v3639_v57 = vrot.slane %v3531_v32, 4 }
 0x2a4   : > { %v3534_v58 = vmax.f32 %v3502_v7, 0.0  ;;  %v15818_v17 = vpack.c.bf16 %v3531_v32, %v3530_v49  ;;  %v3640_v42 = vrot.slane %v3532_v16, 4  ;;  %v3641_v34 = vrot.slane %v3533_v52, 4 }
 0x2a5   : > { %18073 = vst [vmem:[#allocation16_spill] sm:$0xff] %v15816_v27  ;;  %v15820_v10 = vpack.c.bf16 %v3533_v52, %v3532_v16  ;;  %v18077_v63 = vsub.f32 %v15545_v4, %v15620_v39  ;;  %v18078_v44 = vsub.f32 %v15554_v33, %v15620_v39  ;;  %v18079_v7 = vsub.f32 %v15541_v24, %v15620_v39 }
 0x2a6   : > { %18074 = vst [vmem:[#allocation19_spill] sm:$0xff] %v15818_v17  ;;  %v15822_v53 = vpack.c.bf16 %v3535_v25, %v3534_v58  ;;  %v18080_v47 = vsub.f32 %v15549_v18, %v15620_v39  ;;  %12202 = vmatmul.mubr.bf16.gmra.mrb[44].mxu1 %v15783_v20  ;;  %v18081_v4 = vsub.f32 %v15566_v35, %v15620_v39  ;;  %v3642_v20 = vrot.slane %v3534_v58, 4 }
 0x2a7   : > { %18075 = vst [vmem:[#allocation20_spill] sm:$0xff] %v15820_v10  ;;  %v3504_v6 = vmul.f32 %v15678_v1, %v18077_v63  ;;  %v3505_v46 = vmul.f32 %v15678_v1, %v18078_v44  ;;  %v3506_v9 = vmul.f32 %v15678_v1, %v18079_v7  ;;  %v18082_v33 = vsub.f32 %v15574_v11, %v15620_v39 }
 0x2a8   : > { %18076 = vst [vmem:[#allocation17_spill] sm:$0xff] %v15822_v53  ;;  %v3507_v31 = vmul.f32 %v15678_v1, %v18080_v47  ;;  %v3508_v49 = vmul.f32 %v15678_v1, %v18081_v4  ;;  %v18083_v24 = vsub.f32 %v15562_v40, %v15620_v39  ;;  %v18084_v18 = vsub.f32 %v15569_v15, %v15620_v39 }
 0x2a9   : > { %v3509_v32 = vmul.f32 %v15678_v1, %v18082_v33  ;;  %12205 = vmatprep.mubr.bf16.mxu1 %v15816_v27  ;;  %v3536_v35 = vmax.f32 %v3504_v6, 0.0  ;;  %v3537_v63 = vmax.f32 %v3505_v46, 0.0  ;;  %v3538_v44 = vmax.f32 %v3506_v9, 0.0 }
 0x2aa   : > { %v3510_v16 = vmul.f32 %v15678_v1, %v18083_v24  ;;  %v3511_v52 = vmul.f32 %v15678_v1, %v18084_v18  ;;  %v3539_v7 = vmax.f32 %v3507_v31, 0.0  ;;  %v3540_v47 = vmax.f32 %v3508_v49, 0.0 }
 0x2ab   : > { %v3541_v11 = vmax.f32 %v3509_v32, 0.0  ;;  %v3643_v30 = vrot.slane %v3535_v25, 4  ;;  %v3644_v40 = vrot.slane %v3536_v35, 4  ;;  %v15858_v8 = vpack.c.bf16 %v3537_v63, %v3536_v35 }
 0x2ac   : > { %v3542_v4 = vmax.f32 %v3510_v16, 0.0  ;;  %v3543_v33 = vmax.f32 %v3511_v52, 0.0  ;;  %v3645_v24 = vrot.slane %v3537_v63, 4  ;;  %v3646_v23 = vrot.slane %v3538_v44, 4 }
 0x2ad   : > { %v3647_v15 = vrot.slane %v3539_v7, 4  ;;  %v15860_v39 = vpack.c.bf16 %v3539_v7, %v3538_v44  ;;  %v3648_v1 = vrot.slane %v3540_v47, 4  ;;  %v3649_v18 = vrot.slane %v3541_v11, 4 }
 0x2ae   : > { %v15862_v6 = vpack.c.bf16 %v3541_v11, %v3540_v47  ;;  %v15864_v46 = vpack.c.bf16 %v3543_v33, %v3542_v4  ;;  %v15870_v58 = vsel %vm3652_vm11, %v15764_v37, %v15768_v50  ;;  %v15876_v25 = vsel %vm3652_vm11, %v15668_v29, %v15764_v37  ;;  %12206 = vmatmul.mubr.bf16.gmra.mrb[48].mxu1 %v15818_v17 }
 0x2af   : > { %v3673_v9 = vsel %vm3652_vm11, %v15770_v59, %v15772_v5  ;;  %v3674_v31 = vsel %vm3652_vm11, %v15768_v50, %v15770_v59  ;;  %v3650_v49 = vrot.slane %v3542_v4, 4  ;;  %v3671_v52 = vsel %vm3652_vm11, %v15777_v13, %v15779_v26  ;;  %12209 = vmatprep.mubr.bf16.mxu1 %v15820_v10 }
 0x2b0   : > { %v15888_v16 = vpack.c.bf16 %v3673_v9, %v3674_v31  ;;  %v3651_v35 = vrot.slane %v3543_v33, 4  ;;  %v3672_v63 = vsel %vm3652_vm11, %v15772_v5, %v15777_v13  ;;  %v3669_v50 = vsel %vm3652_vm11, %v3634_v61, %v3635_v36 }
 0x2b1   : > { %v3670_v59 = vsel %vm3652_vm11, %v15779_v26, %v3634_v61  ;;  %v15905_v44 = vpack.c.bf16 %v3671_v52, %v3672_v63  ;;  %v15912_v47 = vsel %vm3652_vm11, %v15814_v56, %v3637_v60  ;;  %v3668_v5 = vsel %vm3652_vm11, %v3635_v36, %v15814_v56 }
 0x2b2   : > { %v15907_v7 = vpack.c.bf16 %v3669_v50, %v3670_v59  ;;  %v15918_v13 = vpack.c.bf16 %v15912_v47, %v3668_v5  ;;  %v3665_v61 = vsel %vm3652_vm11, %v3638_v22, %v3639_v57  ;;  %v3666_v26 = vsel %vm3652_vm11, %v3637_v60, %v3638_v22 }
 0x2b3   : > { %v3663_v11 = vsel %vm3652_vm11, %v3640_v42, %v3641_v34  ;;  %v15926_v4 = vpack.c.bf16 %v3665_v61, %v3666_v26  ;;  %v3664_v33 = vsel %vm3652_vm11, %v3639_v57, %v3640_v42  ;;  %v3661_v36 = vsel %vm3652_vm11, %v3642_v20, %v3643_v30 }
 0x2b4   : > { %v3662_v32 = vsel %vm3652_vm11, %v3641_v34, %v3642_v20  ;;  %v15934_v10 = vpack.c.bf16 %v3663_v11, %v3664_v33  ;;  %v3659_v60 = vsel %vm3652_vm11, %v3644_v40, %v3645_v24  ;;  %v3660_v22 = vsel %vm3652_vm11, %v3643_v30, %v3644_v40 }
 0x2b5   : > { %v15936_v17 = vpack.c.bf16 %v3661_v36, %v3662_v32  ;;  %v15942_v27 = vpack.c.bf16 %v3659_v60, %v3660_v22  ;;  %v3657_v57 = vsel %vm3652_vm11, %v3646_v23, %v3647_v15  ;;  %v3658_v42 = vsel %vm3652_vm11, %v3645_v24, %v3646_v23 }
 0x2b6   : > { %18085 = vst [vmem:[#allocation28_spill] sm:$0xff] %v15934_v10  ;;  %v3655_v20 = vsel %vm3652_vm11, %v3648_v1, %v3649_v18  ;;  %v15950_v34 = vpack.c.bf16 %v3657_v57, %v3658_v42  ;;  %v15956_v10 = vsel %vm3652_vm11, %v3650_v49, %v3651_v35  ;;  %v3654_v30 = vsel %vm3652_vm11, %v3649_v18, %v3650_v49 }
 0x2b7   : > { %18086 = vst [vmem:[#allocation25_spill] sm:$0xff] %v15936_v17  ;;  %18087 = vst [vmem:[#allocation21_spill] sm:$0xff] %v15942_v27  ;;  %v3656_v17 = vsel %vm3652_vm11, %v3647_v15, %v3648_v1  ;;  %v15963_v40 = vsel %vm3652_vm11, %v3651_v35, %v15668_v29  ;;  %v15968_v24 = vpack.c.bf16 %v15956_v10, %v3654_v30  ;;  %12210 = vmatmul.mubr.bf16.gmra.mrb[52].mxu1 %v15822_v53 }
 0x2b8   : > { %18088 = vst [vmem:[#allocation22_spill] sm:$0xff] %v15950_v34  ;;  %v15965_v23 = vpack.c.bf16 %v3655_v20, %v3656_v17  ;;  %v15971_v34 = vpack.c.bf16 %v3674_v31, %v15870_v58  ;;  %v15974_v15 = vpack.c.bf16 %v3672_v63, %v3673_v9  ;;  %v15976_v1 = vpack.c.bf16 %v3670_v59, %v3671_v52 }
 0x2b9   : > { %18090 = vst [vmem:[#allocation24_spill] sm:$0xff] %v15968_v24  ;;  %v15978_v18 = vpack.c.bf16 %v3668_v5, %v3669_v50  ;;  %v15981_v49 = vpack.c.bf16 %v3666_v26, %v15912_v47  ;;  %12213 = vmatprep.mubr.bf16.mxu1 %v15858_v8  ;;  %v15986_v27 = vpack.c.bf16 %v3662_v32, %v3663_v11 }
 0x2ba   : > { %18089 = vst [vmem:[#allocation23_spill] sm:$0xff] %v15965_v23  ;;  %v15984_v23 = vpack.c.bf16 %v3664_v33, %v3665_v61  ;;  %v15988_v24 = vpack.c.bf16 %v3660_v22, %v3661_v36  ;;  %v15990_v31 = vpack.c.bf16 %v3658_v42, %v3659_v60  ;;  %v15992_v53 = vpack.c.bf16 %v3656_v17, %v3657_v57 }
 0x2bb   : > { %v15994_v9 = vpack.c.bf16 %v3654_v30, %v3655_v20  ;;  %v10484_v52 = vpack.c.bf16 %v15963_v40, %v15956_v10  ;;  %v16002_v63 = vsel %vm3652_vm11, %v15762_v43, %v15764_v37  ;;  %v4577_v17 = vsel %vm3652_vm11, %v15730_v14, %v15734_v38 }
 0x2bc   : > { %v10495_v32 = vpack.c.bf16 %v15870_v58, %v16002_v63  ;;  %v4578_v50 = vsel %vm3652_vm11, %v3651_v35, %v15730_v14  ;;  %v4575_v59 = vsel %vm3652_vm11, %v15738_v62, %v15742_v48  ;;  %v4576_v37 = vsel %vm3652_vm11, %v15734_v38, %v15738_v62 }
 0x2bd   : > { %v16017_v5 = vpack.c.bf16 %v4577_v17, %v4578_v50  ;;  %v4573_v61 = vsel %vm3652_vm11, %v15746_v28, %v15724_v55  ;;  %v4574_v14 = vsel %vm3652_vm11, %v15742_v48, %v15746_v28  ;;  %v16031_v35 = vpack.c.bf16 %v4575_v59, %v4576_v37 }
 0x2be   : > { %v16033_v26 = vpack.c.bf16 %v4573_v61, %v4574_v14  ;;  %v16039_v11 = vsel %vm3652_vm11, %v15758_v3, %v15762_v43  ;;  %v4572_v38 = vsel %vm3652_vm11, %v15724_v55, %v15758_v3  ;;  %v18091_v28 = vmax.f32 %v15692_v51, 0.0 }
 0x2bf   : > { %v16046_v62 = vpack.c.bf16 %v16039_v11, %v4572_v38  ;;  %v18092_v48 = vmax.f32 %v15695_v12, 0.0  ;;  %v18093_v36 = vmax.f32 %v15698_v45, 0.0  ;;  %v18094_v60 = vmax.f32 %v15701_v19, 0.0  ;;  %12214 = vmatmul.mubr.bf16.gmra.mrb[56].mxu1 %v15860_v39 }
 0x2c0   : > { %v18095_v57 = vmax.f32 %v15704_v21, 0.0  ;;  %v18096_v42 = vmax.f32 %v15689_v0, 0.0  ;;  %v18097_v3 = vmax.f32 %v15707_v41, 0.0  ;;  %v18098_v51 = vmax.f32 %v15710_v54, 0.0  ;;  %12217 = vmatprep.mubr.bf16.mxu1 %v15862_v6 }
 0x2c1   : > { %v16052_v33 = vpack.c.bf16 %v18092_v48, %v18091_v28  ;;  %v16058_v22 = vpack.c.bf16 %v18094_v60, %v18093_v36  ;;  %v16073_v12 = vpack.c.bf16 %v4578_v50, %v15956_v10  ;;  %v16075_v45 = vpack.c.bf16 %v4576_v37, %v4577_v17  ;;  %v18100_v37 = vld [vmem:[#allocation27_spill] sm:$0xff]  ;;  %v13979_v28 = vld [vmem:[#allocation6 + $0x2e0] sm:$0xff]   ;;  %v13980_v48 = vld [vmem:[#allocation6 + $0x2e8] sm:$0xff]  }
 0x2c2   : > { %v16064_v55 = vpack.c.bf16 %v18096_v42, %v18095_v57  ;;  %v16070_v20 = vpack.c.bf16 %v18098_v51, %v18097_v3  ;;  %v16077_v19 = vpack.c.bf16 %v4574_v14, %v4575_v59  ;;  %v16080_v21 = vpack.c.bf16 %v4572_v38, %v4573_v61  ;;  %v13976_v59 = vld [vmem:[#allocation6 + $0x2c8] sm:$0xff]   ;;  %v13977_v61 = vld [vmem:[#allocation6 + $0x2d0] sm:$0xff]   ;;  %v13978_v14 = vld [vmem:[#allocation6 + $0x2d8] sm:$0xff]  }
 0x2c3   : > { %v10604_v0 = vpack.c.bf16 %v16002_v63, %v16039_v11  ;;  %v16088_v41 = vsel %vm3652_vm11, %v15668_v29, %v15814_v56  ;;  %v16094_v54 = vsel %vm3652_vm11, %v15762_v43, %v15668_v29  ;;  %v10383_v50 = vpack.c.bf16 %v15668_v29, %v15963_v40  ;;  %v13981_v36 = vld [vmem:[#allocation6 + $0x2f0] sm:$0xff]   ;;  %v13982_v60 = vld [vmem:[#allocation6 + $0x2f8] sm:$0xff]   ;;  %v13983_v57 = vld [vmem:[#allocation6 + $0x300] sm:$0xff]  }
 0x2c4   : > { %v10615_v30 = vpack.c.bf16 %v15912_v47, %v16088_v41  ;;  %v10712_v17 = vpack.c.bf16 %v16094_v54, %v16039_v11  ;;  %v16108_v43 = vpack.c.bf16 %v15668_v29, %v15668_v29  ;;  %v18101_v38 = vpack.c.bf16 %v15870_v58, %v15876_v25  ;;  %v18102_v42 = vld [vmem:[#allocation28_spill] sm:$0xff]  ;;  %v18103_v3 = vld [vmem:[#allocation25_spill] sm:$0xff]  ;;  %v13993_v10 = vld [vmem:[#allocation6 + $0x350] sm:$0xff]  }
 0x2c5   : > { %v18104_v51 = vld [vmem:[#allocation21_spill] sm:$0xff]  ;;  %v13994_v40 = vld [vmem:[#allocation6 + $0x358] sm:$0xff]   ;;  %v13995_v58 = vld [vmem:[#allocation6 + $0x360] sm:$0xff]  }
 0x2c6   : > { %v14017_v63 = vld [vmem:[#allocation6 + $0x410] sm:$0xff]   ;;  %v14019_v47 = vld [vmem:[#allocation6 + $0x420] sm:$0xff]   ;;  %v14040_v11 = vld [vmem:[#allocation6 + $0x488] sm:$0xff]  }
 0x2c7   : > { %12218 = vmatmul.mubr.bf16.gmra.mrb[60].mxu1 %v15864_v46  ;;  %v14099_v56 = vld [vmem:[#allocation6 + $0x6a0] sm:$0xff]  }
 0x2c8   : > { %12237 = vmatprep.mubr.msk.bf16.mxu1 %vm14434_vm2, %v10383_v50  ;;  %v18105_v50 = vld [vmem:[#allocation22_spill] sm:$0xff] }
 0x2cf   : > { %12238 = vmatmul.mubr.msk.bf16.vlgmr.msra.gmra.mrb[32].mxu1 %vm14434_vm2, %v16108_v43 }
 0x2d0   : > { %12270 = vmatpush3.bf16.msra.mxu1 %v18100_v37  ;;  %12241 = vmatprep.mubr.msk.bf16.mxu1 %vm14434_vm2, %v16108_v43  ;;  %v18107_v37 = vld [vmem:[#allocation24_spill] sm:$0xff] }
 0x2d1   : > { %12271 = vmatprep.subr.bf16.mxu1 %v13976_v59 }
 0x2d4   : > { %12272 = vmatpush3.bf16.msra.mxu1 %v13976_v59  ;;  %v18106_v59 = vld [vmem:[#allocation23_spill] sm:$0xff] }
 0x2d5   : > { %12273 = vmatprep.subr.bf16.mxu1 %v13977_v61 }
 0x2d7   : > { %12242 = vmatmul.mubr.msk.bf16.gmra.mrb[36].mxu1 %vm14434_vm2, %v16108_v43 }
 0x2d8   : > { %12245 = vmatprep.mubr.msk.bf16.mxu1 %vm14434_vm2, %v18101_v38  ;;  %12274 = vmatpush3.bf16.msra.mxu1 %v13977_v61  ;;  %v13985_v38 = vld [vmem:[#allocation6 + $0x310] sm:$0xff]  }
 0x2d9   : > { %12275 = vmatprep.subr.bf16.mxu1 %v13978_v14 }
 0x2dc   : > { %12276 = vmatpush3.bf16.msra.mxu1 %v13978_v14  ;;  %v13984_v14 = vld [vmem:[#allocation6 + $0x308] sm:$0xff]  }
 0x2dd   : > { %12277 = vmatprep.subr.bf16.mxu1 %v13979_v28 }
 0x2df   : > { %12246 = vmatmul.mubr.msk.bf16.gmra.mrb[40].mxu1 %vm14434_vm2, %v15888_v16 }
 0x2e0   : > { %12249 = vmatprep.mubr.msk.bf16.mxu1 %vm14434_vm2, %v15905_v44  ;;  %12278 = vmatpush3.bf16.msra.mxu1 %v13979_v28  ;;  %v10448_v28 = vpack.c.bf16 %v15876_v25, %v15668_v29  ;;  %v13989_v25 = vld [vmem:[#allocation6 + $0x330] sm:$0xff]  }
 0x2e1   : > { %12279 = vmatprep.subr.bf16.mxu1 %v13980_v48 }
 0x2e4   : > { %12280 = vmatpush3.bf16.msra.mxu1 %v13980_v48  ;;  %v13986_v48 = vld [vmem:[#allocation6 + $0x318] sm:$0xff]  }
 0x2e5   : > { %12281 = vmatprep.subr.bf16.mxu1 %v13981_v36 }
 0x2e7   : > { %12250 = vmatmul.mubr.msk.bf16.gmra.mrb[44].mxu1 %vm14434_vm2, %v15907_v7 }
 0x2e8   : > { %12253 = vmatprep.mubr.msk.bf16.mxu1 %vm14434_vm2, %v15918_v13  ;;  %12282 = vmatpush3.bf16.msra.mxu1 %v13981_v36  ;;  %v13987_v36 = vld [vmem:[#allocation6 + $0x320] sm:$0xff]  }
 0x2e9   : > { %12283 = vmatprep.subr.bf16.mxu1 %v13982_v60 }
 0x2ec   : > { %12284 = vmatpush3.bf16.msra.mxu1 %v13982_v60  ;;  %v13988_v60 = vld [vmem:[#allocation6 + $0x328] sm:$0xff]  }
 0x2ed   : > { %12317 = vmatprep.subr.bf16.mxu1 %v13983_v57 }
 0x2ef   : > { %12254 = vmatmul.mubr.msk.bf16.gmra.mrb[48].mxu1 %vm14434_vm2, %v15926_v4 }
 0x2f0   : > { %12257 = vmatprep.mubr.msk.bf16.mxu1 %vm14434_vm2, %v18102_v42 }
 0x2f7   : > { %12258 = vmatmul.mubr.msk.bf16.gmra.mrb[52].mxu1 %vm14434_vm2, %v18103_v3 }
 0x2f8   : > { %12261 = vmatprep.mubr.msk.bf16.mxu1 %vm14434_vm2, %v18104_v51 }
 0x2ff   : > { %12262 = vmatmul.mubr.msk.bf16.gmra.mrb[56].mxu1 %vm14434_vm2, %v18105_v50 }
 0x300   : > { %12265 = vmatprep.mubr.msk.bf16.mxu1 %vm14434_vm2, %v18106_v59 }
 0x307   : > { %12266 = vmatmul.mubr.msk.bf16.gmra.mrb[60].mxu1 %vm14434_vm2, %v18107_v37 }
 0x308   : > { %12285 = vmatprep.mubr.msk.bf16.mxu1 %vm14463_vm4, %v16108_v43 }
 0x30f   : > { %12286 = vmatmul.mubr.msk.bf16.vlgmr.msra.gmra.mrb[32].mxu1 %vm14463_vm4, %v16108_v43 }
 0x310   : > { %12318 = vmatpush3.bf16.msra.mxu1 %v13983_v57  ;;  %12289 = vmatprep.mubr.msk.bf16.mxu1 %vm14463_vm4, %v16108_v43  ;;  %v13990_v57 = vld [vmem:[#allocation6 + $0x338] sm:$0xff]  }
 0x311   : > { %12319 = vmatprep.subr.bf16.mxu1 %v13984_v14 }
 0x314   : > { %12320 = vmatpush3.bf16.msra.mxu1 %v13984_v14  ;;  %v13991_v14 = vld [vmem:[#allocation6 + $0x340] sm:$0xff]  }
 0x315   : > { %12321 = vmatprep.subr.bf16.mxu1 %v13985_v38 }
 0x317   : > { %12290 = vmatmul.mubr.msk.bf16.gmra.mrb[36].mxu1 %vm14463_vm4, %v10448_v28  ;;  %v18110_v28 = vld [vmem:[#allocation29_spill] sm:$0xff] }
 0x318   : > { %12293 = vmatprep.mubr.msk.bf16.mxu1 %vm14463_vm4, %v15971_v34  ;;  %12322 = vmatpush3.bf16.msra.mxu1 %v13985_v38  ;;  %v13992_v38 = vld [vmem:[#allocation6 + $0x348] sm:$0xff]  }
 0x319   : > { %12323 = vmatprep.subr.bf16.mxu1 %v13986_v48 }
 0x31c   : > { %12324 = vmatpush3.bf16.msra.mxu1 %v13986_v48  ;;  %v18111_v48 = vld [vmem:[#allocation15_spill] sm:$0xff] }
 0x31d   : > { %12325 = vmatprep.subr.bf16.mxu1 %v13987_v36 }
 0x31f   : > { %12294 = vmatmul.mubr.msk.bf16.gmra.mrb[40].mxu1 %vm14463_vm4, %v15974_v15 }
 0x320   : > { %12297 = vmatprep.mubr.msk.bf16.mxu1 %vm14463_vm4, %v15976_v1  ;;  %12326 = vmatpush3.bf16.msra.mxu1 %v13987_v36  ;;  %v14001_v36 = vld [vmem:[#allocation6 + $0x390] sm:$0xff]  }
 0x321   : > { %12327 = vmatprep.subr.bf16.mxu1 %v13988_v60 }
 0x324   : > { %12328 = vmatpush3.bf16.msra.mxu1 %v13988_v60  ;;  %v14002_v60 = vld [vmem:[#allocation6 + $0x398] sm:$0xff]  }
 0x325   : > { %12329 = vmatprep.subr.bf16.mxu1 %v13989_v25 }
 0x327   : > { %12298 = vmatmul.mubr.msk.bf16.gmra.mrb[44].mxu1 %vm14463_vm4, %v15978_v18 }
 0x328   : > { %12301 = vmatprep.mubr.msk.bf16.mxu1 %vm14463_vm4, %v15981_v49  ;;  %12330 = vmatpush3.bf16.msra.mxu1 %v13989_v25  ;;  %v18112_v25 = vld [vmem:[#allocation30_spill] sm:$0xff] }
 0x329   : > { %12331 = vmatprep.subr.bf16.mxu1 %v13990_v57 }
 0x32c   : > { %12332 = vmatpush3.bf16.msra.mxu1 %v13990_v57  ;;  %v18113_v57 = vld [vmem:[#allocation16_spill] sm:$0xff] }
 0x32d   : > { %12365 = vmatprep.subr.bf16.mxu1 %v13991_v14 }
 0x32f   : > { %12302 = vmatmul.mubr.msk.bf16.gmra.mrb[48].mxu1 %vm14463_vm4, %v15984_v23 }
 0x330   : > { %12305 = vmatprep.mubr.msk.bf16.mxu1 %vm14463_vm4, %v15986_v27 }
 0x337   : > { %12306 = vmatmul.mubr.msk.bf16.gmra.mrb[52].mxu1 %vm14463_vm4, %v15988_v24 }
 0x338   : > { %12309 = vmatprep.mubr.msk.bf16.mxu1 %vm14463_vm4, %v15990_v31 }
 0x33f   : > { %12310 = vmatmul.mubr.msk.bf16.gmra.mrb[56].mxu1 %vm14463_vm4, %v15992_v53 }
 0x340   : > { %12313 = vmatprep.mubr.msk.bf16.mxu1 %vm14463_vm4, %v15994_v9 }
 0x347   : > { %12314 = vmatmul.mubr.msk.bf16.gmra.mrb[60].mxu1 %vm14463_vm4, %v10484_v52  ;;  %v18109_v52 = vld [vmem:[#allocation14_spill] sm:$0xff] }
 0x348   : > { %12333 = vmatprep.mubr.msk.bf16.mxu1 %vm14434_vm2, %v10495_v32  ;;  %v14000_v32 = vld [vmem:[#allocation6 + $0x388] sm:$0xff]  }
 0x34f   : > { %12334 = vmatmul.mubr.msk.bf16.vlgmr.msra.gmra.mrb[32].mxu1 %vm14434_vm2, %v15888_v16  ;;  %v13996_v16 = vld [vmem:[#allocation6 + $0x368] sm:$0xff]  }
 0x350   : > { %12337 = vmatprep.mubr.msk.bf16.mxu1 %vm14434_vm2, %v15905_v44  ;;  %12366 = vmatpush3.bf16.msra.mxu1 %v13991_v14  ;;  %v13997_v44 = vld [vmem:[#allocation6 + $0x370] sm:$0xff]   ;;  %v14003_v14 = vld [vmem:[#allocation6 + $0x3a0] sm:$0xff]  }
 0x351   : > { %12367 = vmatprep.subr.bf16.mxu1 %v13992_v38 }
 0x354   : > { %12368 = vmatpush3.bf16.msra.mxu1 %v13992_v38  ;;  %v14004_v38 = vld [vmem:[#allocation6 + $0x3a8] sm:$0xff]  }
 0x355   : > { %12369 = vmatprep.subr.bf16.mxu1 %v13993_v10 }
 0x357   : > { %12338 = vmatmul.mubr.msk.bf16.gmra.mrb[36].mxu1 %vm14434_vm2, %v15907_v7  ;;  %v13998_v7 = vld [vmem:[#allocation6 + $0x378] sm:$0xff]  }
 0x358   : > { %12341 = vmatprep.mubr.msk.bf16.mxu1 %vm14434_vm2, %v15918_v13  ;;  %12370 = vmatpush3.bf16.msra.mxu1 %v13993_v10  ;;  %v13999_v13 = vld [vmem:[#allocation6 + $0x380] sm:$0xff]   ;;  %v18114_v10 = vld [vmem:[#allocation19_spill] sm:$0xff] }
 0x359   : > { %12371 = vmatprep.subr.bf16.mxu1 %v13994_v40 }
 0x35c   : > { %12372 = vmatpush3.bf16.msra.mxu1 %v13994_v40  ;;  %v18115_v40 = vld [vmem:[#allocation20_spill] sm:$0xff] }
 0x35d   : > { %12373 = vmatprep.subr.bf16.mxu1 %v13995_v58 }
 0x35f   : > { %12342 = vmatmul.mubr.msk.bf16.gmra.mrb[40].mxu1 %vm14434_vm2, %v15926_v4 }
 0x360   : > { %12345 = vmatprep.mubr.msk.bf16.mxu1 %vm14434_vm2, %v18102_v42  ;;  %12374 = vmatpush3.bf16.msra.mxu1 %v13995_v58  ;;  %v14005_v58 = vld [vmem:[#allocation6 + $0x3b0] sm:$0xff]  }
 0x361   : > { %12375 = vmatprep.subr.bf16.mxu1 %v13996_v16 }
 0x364   : > { %12376 = vmatpush3.bf16.msra.mxu1 %v13996_v16  ;;  %v14006_v16 = vld [vmem:[#allocation6 + $0x3b8] sm:$0xff]  }
 0x365   : > { %12377 = vmatprep.subr.bf16.mxu1 %v13997_v44 }
 0x367   : > { %12346 = vmatmul.mubr.msk.bf16.gmra.mrb[44].mxu1 %vm14434_vm2, %v18103_v3 }
 0x368   : > { %12349 = vmatprep.mubr.msk.bf16.mxu1 %vm14434_vm2, %v18104_v51  ;;  %12378 = vmatpush3.bf16.msra.mxu1 %v13997_v44  ;;  %v18116_v44 = vld [vmem:[#allocation17_spill] sm:$0xff] }
 0x369   : > { %12379 = vmatprep.subr.bf16.mxu1 %v13998_v7 }
 0x36c   : > { %12380 = vmatpush3.bf16.msra.mxu1 %v13998_v7  ;;  %v14007_v7 = vld [vmem:[#allocation6 + $0x3c0] sm:$0xff]  }
 0x36d   : > { %12413 = vmatprep.subr.bf16.mxu1 %v13999_v13 }
 0x36f   : > { %12350 = vmatmul.mubr.msk.bf16.gmra.mrb[48].mxu1 %vm14434_vm2, %v18105_v50 }
 0x370   : > { %12353 = vmatprep.mubr.msk.bf16.mxu1 %vm14434_vm2, %v18106_v59 }
 0x377   : > { %12354 = vmatmul.mubr.msk.bf16.gmra.mrb[52].mxu1 %vm14434_vm2, %v18107_v37 }
 0x378   : > { %12357 = vmatprep.mubr.msk.bf16.mxu1 %vm14434_vm2, %v16017_v5 }
 0x37f   : > { %12358 = vmatmul.mubr.msk.bf16.gmra.mrb[56].mxu1 %vm14434_vm2, %v16031_v35 }
 0x380   : > { %12361 = vmatprep.mubr.msk.bf16.mxu1 %vm14434_vm2, %v16033_v26 }
 0x387   : > { %12362 = vmatmul.mubr.msk.bf16.gmra.mrb[60].mxu1 %vm14434_vm2, %v16046_v62 }
 0x388   : > { %12381 = vmatprep.mubr.bf16.mxu1 %v18109_v52  ;;  %v14009_v52 = vld [vmem:[#allocation6 + $0x3d0] sm:$0xff]  }
 0x38f   : > { %12382 = vmatmul.mubr.bf16.vlgmr.msra.gmra.mrb[32].mxu1 %v18110_v28  ;;  %v14015_v28 = vld [vmem:[#allocation6 + $0x400] sm:$0xff]  }
 0x390   : > { %12385 = vmatprep.mubr.bf16.mxu1 %v18111_v48  ;;  %12414 = vmatpush3.bf16.msra.mxu1 %v13999_v13  ;;  %v14008_v13 = vld [vmem:[#allocation6 + $0x3c8] sm:$0xff]  }
 0x391   : > { %12415 = vmatprep.subr.bf16.mxu1 %v14000_v32  ;;  %v14016_v48 = vld [vmem:[#allocation6 + $0x408] sm:$0xff]  }
 0x394   : > { %12416 = vmatpush3.bf16.msra.mxu1 %v14000_v32  ;;  %v14010_v32 = vld [vmem:[#allocation6 + $0x3d8] sm:$0xff]  }
 0x395   : > { %12417 = vmatprep.subr.bf16.mxu1 %v14001_v36 }
 0x397   : > { %12386 = vmatmul.mubr.bf16.gmra.mrb[36].mxu1 %v18112_v25 }
 0x398   : > { %12389 = vmatprep.mubr.bf16.mxu1 %v18113_v57  ;;  %12418 = vmatpush3.bf16.msra.mxu1 %v14001_v36 }
 0x399   : > { %12419 = vmatprep.subr.bf16.mxu1 %v14002_v60 }
 0x39c   : > { %12420 = vmatpush3.bf16.msra.mxu1 %v14002_v60 }
 0x39d   : > { %12421 = vmatprep.subr.bf16.mxu1 %v14003_v14 }
 0x39f   : > { %12390 = vmatmul.mubr.bf16.gmra.mrb[40].mxu1 %v18114_v10 }
 0x3a0   : > { %12393 = vmatprep.mubr.bf16.mxu1 %v18115_v40  ;;  %12422 = vmatpush3.bf16.msra.mxu1 %v14003_v14 }
 0x3a1   : > { %12423 = vmatprep.subr.bf16.mxu1 %v14004_v38 }
 0x3a4   : > { %12424 = vmatpush3.bf16.msra.mxu1 %v14004_v38 }
 0x3a5   : > { %12425 = vmatprep.subr.bf16.mxu1 %v14005_v58 }
 0x3a7   : > { %12394 = vmatmul.mubr.bf16.gmra.mrb[44].mxu1 %v18116_v44 }
 0x3a8   : > { %12397 = vmatprep.mubr.bf16.mxu1 %v15858_v8  ;;  %12426 = vmatpush3.bf16.msra.mxu1 %v14005_v58 }
 0x3a9   : > { %12427 = vmatprep.subr.bf16.mxu1 %v14006_v16 }
 0x3ac   : > { %12428 = vmatpush3.bf16.msra.mxu1 %v14006_v16 }
 0x3ad   : > { %12461 = vmatprep.subr.bf16.mxu1 %v14007_v7 }
 0x3af   : > { %12398 = vmatmul.mubr.bf16.gmra.mrb[48].mxu1 %v15860_v39 }
 0x3b0   : > { %12401 = vmatprep.mubr.bf16.mxu1 %v15862_v6 }
 0x3b7   : > { %12402 = vmatmul.mubr.bf16.gmra.mrb[52].mxu1 %v15864_v46 }
 0x3b8   : > { %12405 = vmatprep.mubr.bf16.mxu1 %v16052_v33 }
 0x3bf   : > { %12406 = vmatmul.mubr.bf16.gmra.mrb[56].mxu1 %v16058_v22 }
 0x3c0   : > { %12409 = vmatprep.mubr.bf16.mxu1 %v16064_v55 }
 0x3c7   : > { %12410 = vmatmul.mubr.bf16.gmra.mrb[60].mxu1 %v16070_v20 }
 0x3c8   : > { %12429 = vmatprep.mubr.msk.bf16.mxu1 %vm14463_vm4, %v15971_v34  ;;  %v14011_v34 = vld [vmem:[#allocation6 + $0x3e0] sm:$0xff]  }
 0x3cf   : > { %12430 = vmatmul.mubr.msk.bf16.vlgmr.msra.gmra.mrb[32].mxu1 %vm14463_vm4, %v15974_v15  ;;  %v14012_v15 = vld [vmem:[#allocation6 + $0x3e8] sm:$0xff]  }
 0x3d0   : > { %12433 = vmatprep.mubr.msk.bf16.mxu1 %vm14463_vm4, %v15976_v1  ;;  %12462 = vmatpush3.bf16.msra.mxu1 %v14007_v7  ;;  %v14013_v1 = vld [vmem:[#allocation6 + $0x3f0] sm:$0xff]   ;;  %v14044_v7 = vld [vmem:[#allocation6 + $0x4a8] sm:$0xff]  }
 0x3d1   : > { %12463 = vmatprep.subr.bf16.mxu1 %v14008_v13 }
 0x3d4   : > { %12464 = vmatpush3.bf16.msra.mxu1 %v14008_v13 }
 0x3d5   : > { %12465 = vmatprep.subr.bf16.mxu1 %v14009_v52 }
 0x3d7   : > { %12434 = vmatmul.mubr.msk.bf16.gmra.mrb[36].mxu1 %vm14463_vm4, %v15978_v18  ;;  %v14014_v18 = vld [vmem:[#allocation6 + $0x3f8] sm:$0xff]  }
 0x3d8   : > { %12437 = vmatprep.mubr.msk.bf16.mxu1 %vm14463_vm4, %v15981_v49  ;;  %12466 = vmatpush3.bf16.msra.mxu1 %v14009_v52 }
 0x3d9   : > { %12467 = vmatprep.subr.bf16.mxu1 %v14010_v32 }
 0x3dc   : > { %12468 = vmatpush3.bf16.msra.mxu1 %v14010_v32 }
 0x3dd   : > { %12469 = vmatprep.subr.bf16.mxu1 %v14011_v34 }
 0x3df   : > { %12438 = vmatmul.mubr.msk.bf16.gmra.mrb[40].mxu1 %vm14463_vm4, %v15984_v23 }
 0x3e0   : > { %12441 = vmatprep.mubr.msk.bf16.mxu1 %vm14463_vm4, %v15986_v27  ;;  %12470 = vmatpush3.bf16.msra.mxu1 %v14011_v34 }
 0x3e1   : > { %12471 = vmatprep.subr.bf16.mxu1 %v14012_v15 }
 0x3e4   : > { %12472 = vmatpush3.bf16.msra.mxu1 %v14012_v15 }
 0x3e5   : > { %12473 = vmatprep.subr.bf16.mxu1 %v14013_v1 }
 0x3e7   : > { %12442 = vmatmul.mubr.msk.bf16.gmra.mrb[44].mxu1 %vm14463_vm4, %v15988_v24 }
 0x3e8   : > { %12445 = vmatprep.mubr.msk.bf16.mxu1 %vm14463_vm4, %v15990_v31  ;;  %12474 = vmatpush3.bf16.msra.mxu1 %v14013_v1 }
 0x3e9   : > { %12475 = vmatprep.subr.bf16.mxu1 %v14014_v18 }
 0x3ec   : > { %12476 = vmatpush3.bf16.msra.mxu1 %v14014_v18 }
 0x3ed   : > { %12509 = vmatprep.subr.bf16.mxu1 %v14015_v28 }
 0x3ef   : > { %12446 = vmatmul.mubr.msk.bf16.gmra.mrb[48].mxu1 %vm14463_vm4, %v15992_v53 }
 0x3f0   : > { %12449 = vmatprep.mubr.msk.bf16.mxu1 %vm14463_vm4, %v15994_v9 }
 0x3f7   : > { %12450 = vmatmul.mubr.msk.bf16.gmra.mrb[52].mxu1 %vm14463_vm4, %v16073_v12 }
 0x3f8   : > { %12453 = vmatprep.mubr.msk.bf16.mxu1 %vm14463_vm4, %v16075_v45 }
 0x3ff   : > { %12454 = vmatmul.mubr.msk.bf16.gmra.mrb[56].mxu1 %vm14463_vm4, %v16077_v19 }
 0x400   : > { %12457 = vmatprep.mubr.msk.bf16.mxu1 %vm14463_vm4, %v16080_v21 }
 0x407   : > { %12458 = vmatmul.mubr.msk.bf16.gmra.mrb[60].mxu1 %vm14463_vm4, %v10604_v0  ;;  %v14018_v0 = vld [vmem:[#allocation6 + $0x418] sm:$0xff]  }
 0x408   : > { %12477 = vmatprep.mubr.msk.bf16.mxu1 %vm14434_vm2, %v10615_v30  ;;  %v14021_v30 = vld [vmem:[#allocation6 + $0x430] sm:$0xff]  }
 0x40f   : > { %12478 = vmatmul.mubr.msk.bf16.vlgmr.msra.gmra.mrb[32].mxu1 %vm14434_vm2, %v15926_v4  ;;  %v14020_v4 = vld [vmem:[#allocation6 + $0x428] sm:$0xff]  }
 0x410   : > { %12481 = vmatprep.mubr.msk.bf16.mxu1 %vm14434_vm2, %v18102_v42  ;;  %12510 = vmatpush3.bf16.msra.mxu1 %v14015_v28  ;;  %v14022_v42 = vld [vmem:[#allocation6 + $0x438] sm:$0xff]  }
 0x411   : > { %12511 = vmatprep.subr.bf16.mxu1 %v14016_v48 }
 0x414   : > { %12512 = vmatpush3.bf16.msra.mxu1 %v14016_v48 }
 0x415   : > { %12513 = vmatprep.subr.bf16.mxu1 %v14017_v63 }
 0x417   : > { %12482 = vmatmul.mubr.msk.bf16.gmra.mrb[36].mxu1 %vm14434_vm2, %v18103_v3  ;;  %v14023_v3 = vld [vmem:[#allocation6 + $0x440] sm:$0xff]  }
 0x418   : > { %12485 = vmatprep.mubr.msk.bf16.mxu1 %vm14434_vm2, %v18104_v51  ;;  %12514 = vmatpush3.bf16.msra.mxu1 %v14017_v63  ;;  %v10651_v51 = vpack.c.bf16 %v15668_v29, %v16094_v54 }
 0x419   : > { %12515 = vmatprep.subr.bf16.mxu1 %v14018_v0 }
 0x41c   : > { %12516 = vmatpush3.bf16.msra.mxu1 %v14018_v0 }
 0x41d   : > { %12517 = vmatprep.subr.bf16.mxu1 %v14019_v47 }
 0x41f   : > { %12486 = vmatmul.mubr.msk.bf16.gmra.mrb[40].mxu1 %vm14434_vm2, %v18105_v50  ;;  %v14028_v50 = vld [vmem:[#allocation6 + $0x468] sm:$0xff]  }
 0x420   : > { %12489 = vmatprep.mubr.msk.bf16.mxu1 %vm14434_vm2, %v18106_v59  ;;  %12518 = vmatpush3.bf16.msra.mxu1 %v14019_v47  ;;  %v14029_v59 = vld [vmem:[#allocation6 + $0x470] sm:$0xff]  }
 0x421   : > { %12519 = vmatprep.subr.bf16.mxu1 %v14020_v4 }
 0x424   : > { %12520 = vmatpush3.bf16.msra.mxu1 %v14020_v4 }
 0x425   : > { %12521 = vmatprep.subr.bf16.mxu1 %v14021_v30 }
 0x427   : > { %12490 = vmatmul.mubr.msk.bf16.gmra.mrb[44].mxu1 %vm14434_vm2, %v18107_v37  ;;  %v14030_v37 = vld [vmem:[#allocation6 + $0x478] sm:$0xff]  }
 0x428   : > { %12493 = vmatprep.mubr.msk.bf16.mxu1 %vm14434_vm2, %v16017_v5  ;;  %12522 = vmatpush3.bf16.msra.mxu1 %v14021_v30  ;;  %v14024_v5 = vld [vmem:[#allocation6 + $0x448] sm:$0xff]  }
 0x429   : > { %12523 = vmatprep.subr.bf16.mxu1 %v14022_v42 }
 0x42c   : > { %12524 = vmatpush3.bf16.msra.mxu1 %v14022_v42 }
 0x42d   : > { %12557 = vmatprep.subr.bf16.mxu1 %v14023_v3 }
 0x42f   : > { %12494 = vmatmul.mubr.msk.bf16.gmra.mrb[48].mxu1 %vm14434_vm2, %v16031_v35  ;;  %v14025_v35 = vld [vmem:[#allocation6 + $0x450] sm:$0xff]  }
 0x430   : > { %12497 = vmatprep.mubr.msk.bf16.mxu1 %vm14434_vm2, %v16033_v26  ;;  %v14026_v26 = vld [vmem:[#allocation6 + $0x458] sm:$0xff]  }
 0x437   : > { %12498 = vmatmul.mubr.msk.bf16.gmra.mrb[52].mxu1 %vm14434_vm2, %v16046_v62  ;;  %v14027_v62 = vld [vmem:[#allocation6 + $0x460] sm:$0xff]  }
 0x438   : > { %12501 = vmatprep.mubr.msk.bf16.mxu1 %vm14434_vm2, %v10651_v51  ;;  %v14045_v51 = vld [vmem:[#allocation6 + $0x4b0] sm:$0xff]  }
 0x43f   : > { %12502 = vmatmul.mubr.msk.bf16.gmra.mrb[56].mxu1 %vm14434_vm2, %v16108_v43 }
 0x440   : > { %12505 = vmatprep.mubr.msk.bf16.mxu1 %vm14434_vm2, %v16108_v43 }
 0x447   : > { %12506 = vmatmul.mubr.msk.bf16.gmra.mrb[60].mxu1 %vm14434_vm2, %v16108_v43 }
 0x448   : > { %12525 = vmatprep.mubr.bf16.mxu1 %v18113_v57 }
 0x44f   : > { %12526 = vmatmul.mubr.bf16.vlgmr.msra.gmra.mrb[32].mxu1 %v18114_v10 }
 0x450   : > { %12529 = vmatprep.mubr.bf16.mxu1 %v18115_v40  ;;  %12558 = vmatpush3.bf16.msra.mxu1 %v14023_v3 }
 0x451   : > { %12559 = vmatprep.subr.bf16.mxu1 %v14024_v5 }
 0x454   : > { %12560 = vmatpush3.bf16.msra.mxu1 %v14024_v5 }
 0x455   : > { %12561 = vmatprep.subr.bf16.mxu1 %v14025_v35 }
 0x457   : > { %12530 = vmatmul.mubr.bf16.gmra.mrb[36].mxu1 %v18116_v44 }
 0x458   : > { %12533 = vmatprep.mubr.bf16.mxu1 %v15858_v8  ;;  %12562 = vmatpush3.bf16.msra.mxu1 %v14025_v35  ;;  %v18117_v8 = vmov 0.0|0.0  }
 0x459   : > { %12563 = vmatprep.subr.bf16.mxu1 %v14026_v26 }
 0x45c   : > { %12564 = vmatpush3.bf16.msra.mxu1 %v14026_v26 }
 0x45d   : > { %12565 = vmatprep.subr.bf16.mxu1 %v14027_v62 }
 0x45f   : > { %12534 = vmatmul.mubr.bf16.gmra.mrb[40].mxu1 %v15860_v39  ;;  %v14032_v39 = vld [vmem:[#allocation6 + $0x4c8] sm:$0xff]  }
 0x460   : > { %12537 = vmatprep.mubr.bf16.mxu1 %v15862_v6  ;;  %12566 = vmatpush3.bf16.msra.mxu1 %v14027_v62  ;;  %v14033_v6 = vld [vmem:[#allocation6 + $0x4d0] sm:$0xff]  }
 0x461   : > { %12567 = vmatprep.subr.bf16.mxu1 %v14028_v50 }
 0x464   : > { %12568 = vmatpush3.bf16.msra.mxu1 %v14028_v50 }
 0x465   : > { %12569 = vmatprep.subr.bf16.mxu1 %v14029_v59 }
 0x467   : > { %12538 = vmatmul.mubr.bf16.gmra.mrb[44].mxu1 %v15864_v46  ;;  %v14034_v46 = vld [vmem:[#allocation6 + $0x4d8] sm:$0xff]  }
 0x468   : > { %12541 = vmatprep.mubr.bf16.mxu1 %v16052_v33  ;;  %12570 = vmatpush3.bf16.msra.mxu1 %v14029_v59  ;;  %v14041_v33 = vld [vmem:[#allocation6 + $0x490] sm:$0xff]  }
 0x469   : > { %12571 = vmatprep.subr.bf16.mxu1 %v14030_v37 }
 0x46c   : > { %12572 = vmatpush3.bf16.msra.mxu1 %v14030_v37 }
 0x46f   : > { %12542 = vmatmul.mubr.bf16.gmra.mrb[48].mxu1 %v16058_v22  ;;  %v14042_v22 = vld [vmem:[#allocation6 + $0x498] sm:$0xff]  }
 0x470   : > { %12545 = vmatprep.mubr.bf16.mxu1 %v16064_v55 }
 0x477   : > { %12546 = vmatmul.mubr.bf16.gmra.mrb[52].mxu1 %v16070_v20 }
 0x478   : > { %12549 = vmatprep.mubr.bf16.mxu1 %v18117_v8 }
 0x47f   : > { %12550 = vmatmul.mubr.bf16.gmra.mrb[56].mxu1 %v18117_v8 }
 0x480   : > { %12553 = vmatprep.mubr.bf16.mxu1 %v18117_v8 }
 0x487   : > { %12554 = vmatmul.mubr.bf16.gmra.mrb[60].mxu1 %v18117_v8 }
 0x488   : > { %12573 = vmatprep.mubr.msk.bf16.mxu1 %vm14463_vm4, %v15981_v49  ;;  %v14037_v49 = vld [vmem:[#allocation6 + $0x4f0] sm:$0xff]  }
 0x48f   : > { %12574 = vmatmul.mubr.msk.bf16.vlgmr.msra.gmra.mrb[32].mxu1 %vm14463_vm4, %v15984_v23  ;;  %v14035_v23 = vld [vmem:[#allocation6 + $0x4e0] sm:$0xff]  }
 0x490   : > { %12577 = vmatprep.mubr.msk.bf16.mxu1 %vm14463_vm4, %v15986_v27  ;;  %v10724_v27 = vpack.c.bf16 %v16088_v41, %v15668_v29 }
 0x497   : > { %12578 = vmatmul.mubr.msk.bf16.gmra.mrb[36].mxu1 %vm14463_vm4, %v15988_v24  ;;  %v14036_v24 = vld [vmem:[#allocation6 + $0x4e8] sm:$0xff]  }
 0x498   : > { %12581 = vmatprep.mubr.msk.bf16.mxu1 %vm14463_vm4, %v15990_v31  ;;  %v14038_v31 = vld [vmem:[#allocation6 + $0x4f8] sm:$0xff]  }
 0x49f   : > { %12582 = vmatmul.mubr.msk.bf16.gmra.mrb[40].mxu1 %vm14463_vm4, %v15992_v53  ;;  %v14031_v53 = vld [vmem:[#allocation6 + $0x4c0] sm:$0xff]  }
 0x4a0   : > { %12585 = vmatprep.mubr.msk.bf16.mxu1 %vm14463_vm4, %v15994_v9  ;;  %12605 = vmatprep.subr.bf16.mxu0 %v14031_v53  ;;  %v14039_v9 = vld [vmem:[#allocation6 + $0x480] sm:$0xff]  }
 0x4a1   : > { %12606 = vmatpush3.bf16.msra.mxu0 %v14031_v53 }
 0x4a2   : > { %12607 = vmatprep.subr.bf16.mxu0 %v14032_v39 }
 0x4a5   : > { %12608 = vmatpush3.bf16.msra.mxu0 %v14032_v39 }
 0x4a6   : > { %12609 = vmatprep.subr.bf16.mxu0 %v14033_v6 }
 0x4a7   : > { %12586 = vmatmul.mubr.msk.bf16.gmra.mrb[44].mxu1 %vm14463_vm4, %v16073_v12 }
 0x4a8   : > { %12589 = vmatprep.mubr.msk.bf16.mxu1 %vm14463_vm4, %v16075_v45 }
 0x4a9   : > { %12610 = vmatpush3.bf16.msra.mxu0 %v14033_v6 }
 0x4aa   : > { %12611 = vmatprep.subr.bf16.mxu0 %v14034_v46 }
 0x4ad   : > { %12612 = vmatpush3.bf16.msra.mxu0 %v14034_v46 }
 0x4ae   : > { %12613 = vmatprep.subr.bf16.mxu0 %v14035_v23 }
 0x4af   : > { %12590 = vmatmul.mubr.msk.bf16.gmra.mrb[48].mxu1 %vm14463_vm4, %v16077_v19  ;;  %v14043_v19 = vld [vmem:[#allocation6 + $0x4a0] sm:$0xff]  }
 0x4b0   : > { %12593 = vmatprep.mubr.msk.bf16.mxu1 %vm14463_vm4, %v16080_v21 }
 0x4b1   : > { %12614 = vmatpush3.bf16.msra.mxu0 %v14035_v23 }
 0x4b2   : > { %12615 = vmatprep.subr.bf16.mxu0 %v14036_v24 }
 0x4b5   : > { %12616 = vmatpush3.bf16.msra.mxu0 %v14036_v24 }
 0x4b6   : > { %12617 = vmatprep.subr.bf16.mxu0 %v14037_v49 }
 0x4b7   : > { %12594 = vmatmul.mubr.msk.bf16.gmra.mrb[52].mxu1 %vm14463_vm4, %v10712_v17 }
 0x4b8   : > { %12597 = vmatprep.mubr.msk.bf16.mxu1 %vm14463_vm4, %v16108_v43 }
 0x4b9   : > { %12618 = vmatpush3.bf16.msra.mxu0 %v14037_v49 }
 0x4ba   : > { %12619 = vmatprep.subr.bf16.mxu0 %v14038_v31 }
 0x4bd   : > { %12620 = vmatpush3.bf16.msra.mxu0 %v14038_v31 }
 0x4be   : > { %12653 = vmatprep.subr.bf16.mxu0 %v14039_v9 }
 0x4bf   : > { %12598 = vmatmul.mubr.msk.bf16.gmra.mrb[56].mxu1 %vm14463_vm4, %v16108_v43 }
 0x4c0   : > { %12601 = vmatprep.mubr.msk.bf16.mxu1 %vm14463_vm4, %v16108_v43  ;;  %12622 = vmatmul.mubr.bf16.vlgmr.msra.gmra.mrb[32].mxu0 %v18117_v8 }
 0x4c1   : > { %12654 = vmatpush3.bf16.msra.mxu0 %v14039_v9  ;;  %12625 = vmatprep.mubr.bf16.mxu0 %v18117_v8  ;;  %v14046_v9 = vld [vmem:[#allocation6 + $0x4b8] sm:$0xff]  }
 0x4c2   : > { %12655 = vmatprep.subr.bf16.mxu0 %v14040_v11 }
 0x4c5   : > { %12656 = vmatpush3.bf16.msra.mxu0 %v14040_v11 }
 0x4c6   : > { %12657 = vmatprep.subr.bf16.mxu0 %v14041_v33 }
 0x4c7   : > { %12602 = vmatmul.mubr.msk.bf16.gmra.mrb[60].mxu1 %vm14463_vm4, %v10724_v27 }
 0x4c8   : > { %12626 = vmatmul.mubr.bf16.gmra.mrb[36].mxu0 %v18117_v8 }
 0x4c9   : > { %12658 = vmatpush3.bf16.msra.mxu0 %v14041_v33 }
 0x4ca   : > { %12659 = vmatprep.subr.bf16.mxu0 %v14042_v22 }
 0x4cd   : > { %12660 = vmatpush3.bf16.msra.mxu0 %v14042_v22 }
 0x4ce   : > { %12661 = vmatprep.subr.bf16.mxu0 %v14043_v19 }
 0x4d1   : > { %12662 = vmatpush3.bf16.msra.mxu0 %v14043_v19 }
 0x4d2   : > { %12663 = vmatprep.subr.bf16.mxu0 %v14044_v7 }
 0x4d5   : > { %12664 = vmatpush3.bf16.msra.mxu0 %v14044_v7  ;;  %v16535_v7 = vld [vmem:[#allocation6 + $0x500] sm:$0xff]  }
 0x4d6   : > { %12665 = vmatprep.subr.bf16.mxu0 %v14045_v51 }
 0x4d9   : > { %12666 = vmatpush3.bf16.msra.mxu0 %v14045_v51 }
 0x4da   : > { %12667 = vmatprep.subr.bf16.mxu0 %v14046_v9 }
 0x4dd   : > { %12668 = vmatpush3.bf16.msra.mxu0 %v14046_v9 }
 0x4de   : > { %12701 = vmatprep.subr.bf16.mxu0 %v16535_v7 }
 0x562   : > { %v16445_v55 = vpop.f32.mrb[32].mxu1 }
 0x563   : > { %v16447_v20 = vpop.f32.mrb[33].mxu1  ;;  %v6512_v17 = vmul.f32 %v16445_v55, %v16445_v55 }
 0x564   : > { %v16450_v12 = vpop.f32.mrb[34].mxu1  ;;  %v6510_v21 = vmul.f32 %v16447_v20, %v16447_v20 }
 0x565   : > { %v16452_v45 = vpop.f32.mrb[35].mxu1  ;;  %v6513_v25 = vmul.f32 %v16450_v12, %v16450_v12 }
 0x566   : > { %v6472_v41 = vadd.f32 %v16452_v45, %v16447_v20  ;;  %v6511_v54 = vmul.f32 %v16452_v45, %v16452_v45 }
 0x568   : > { %v6473_v36 = vadd.f32 %v16445_v55, %v6472_v41  ;;  %v6542_v60 = vadd.f32 %v6511_v54, %v6510_v21 }
 0x56a   : > { %v6543_v57 = vadd.f32 %v6542_v60, %v6512_v17  ;;  %v16465_v14 = vpop.f32.mrb[36].mxu1  ;;  %v6474_v38 = vadd.f32 %v16450_v12, %v6473_v36 }
 0x56b   : > { %v16468_v10 = vpop.f32.mrb[37].mxu1  ;;  %v6516_v15 = vmul.f32 %v16465_v14, %v16465_v14 }
 0x56c   : > { %v6475_v40 = vadd.f32 %v6474_v38, %v16468_v10  ;;  %v6514_v58 = vmul.f32 %v16468_v10, %v16468_v10  ;;  %v6544_v16 = vadd.f32 %v6543_v57, %v6513_v25  ;;  %v16473_v44 = vpop.f32.mrb[38].mxu1 }
 0x56d   : > { %v16475_v13 = vpop.f32.mrb[39].mxu1  ;;  %v6517_v28 = vmul.f32 %v16473_v44, %v16473_v44 }
 0x56e   : > { %v6545_v52 = vadd.f32 %v6544_v16, %v6514_v58  ;;  %v6476_v32 = vadd.f32 %v6475_v40, %v16475_v13  ;;  %v6515_v34 = vmul.f32 %v16475_v13, %v16475_v13 }
 0x570   : > { %v6477_v1 = vadd.f32 %v16465_v14, %v6476_v32  ;;  %v6546_v18 = vadd.f32 %v6545_v52, %v6515_v34 }
 0x572   : > { %v6547_v48 = vadd.f32 %v6546_v18, %v6516_v15  ;;  %v16485_v63 = vpop.f32.mrb[40].mxu1  ;;  %v6478_v0 = vadd.f32 %v16473_v44, %v6477_v1 }
 0x573   : > { %v16488_v47 = vpop.f32.mrb[41].mxu1  ;;  %v6520_v50 = vmul.f32 %v16485_v63, %v16485_v63 }
 0x574   : > { %v6479_v4 = vadd.f32 %v6478_v0, %v16488_v47  ;;  %v6518_v30 = vmul.f32 %v16488_v47, %v16488_v47  ;;  %v6548_v42 = vadd.f32 %v6547_v48, %v6517_v28  ;;  %v16493_v3 = vpop.f32.mrb[42].mxu1 }
 0x575   : > { %v16495_v5 = vpop.f32.mrb[43].mxu1  ;;  %v6521_v27 = vmul.f32 %v16493_v3, %v16493_v3 }
 0x576   : > { %v6549_v35 = vadd.f32 %v6548_v42, %v6518_v30  ;;  %v6480_v26 = vadd.f32 %v6479_v4, %v16495_v5  ;;  %v6519_v62 = vmul.f32 %v16495_v5, %v16495_v5 }
 0x578   : > { %v6481_v59 = vadd.f32 %v16485_v63, %v6480_v26  ;;  %v6550_v37 = vadd.f32 %v6549_v35, %v6519_v62 }
 0x57a   : > { %v6551_v53 = vadd.f32 %v6550_v37, %v6520_v50  ;;  %v16505_v39 = vpop.f32.mrb[44].mxu1  ;;  %v6482_v6 = vadd.f32 %v16493_v3, %v6481_v59 }
 0x57b   : > { %v16508_v46 = vpop.f32.mrb[45].mxu1  ;;  %v6524_v21 = vmul.f32 %v16505_v39, %v16505_v39 }
 0x57c   : > { %v6483_v23 = vadd.f32 %v6482_v6, %v16508_v46  ;;  %v6522_v24 = vmul.f32 %v16508_v46, %v16508_v46  ;;  %v6552_v49 = vadd.f32 %v6551_v53, %v6521_v27  ;;  %v16513_v31 = vpop.f32.mrb[46].mxu1 }
 0x57d   : > { %v16515_v11 = vpop.f32.mrb[47].mxu1  ;;  %v6525_v17 = vmul.f32 %v16513_v31, %v16513_v31 }
 0x57e   : > { %v6553_v33 = vadd.f32 %v6552_v49, %v6522_v24  ;;  %v6484_v22 = vadd.f32 %v6483_v23, %v16515_v11  ;;  %v6523_v19 = vmul.f32 %v16515_v11, %v16515_v11 }
 0x580   : > { %v6485_v41 = vadd.f32 %v16505_v39, %v6484_v22  ;;  %v6554_v54 = vadd.f32 %v6553_v33, %v6523_v19 }
 0x582   : > { %v6555_v36 = vadd.f32 %v6554_v54, %v6524_v21  ;;  %v16525_v60 = vpop.f32.mrb[48].mxu1  ;;  %v6486_v25 = vadd.f32 %v16513_v31, %v6485_v41 }
 0x583   : > { %v16528_v57 = vpop.f32.mrb[49].mxu1  ;;  %v6528_v1 = vmul.f32 %v16525_v60, %v16525_v60 }
 0x584   : > { %v6487_v38 = vadd.f32 %v6486_v25, %v16528_v57  ;;  %v6526_v40 = vmul.f32 %v16528_v57, %v16528_v57  ;;  %v6556_v58 = vadd.f32 %v6555_v36, %v6525_v17  ;;  %v16533_v16 = vpop.f32.mrb[50].mxu1 }
 0x585   : > { %v16537_v52 = vpop.f32.mrb[51].mxu1  ;;  %v6529_v48 = vmul.f32 %v16533_v16, %v16533_v16 }
 0x586   : > { %v6557_v32 = vadd.f32 %v6556_v58, %v6526_v40  ;;  %v6488_v34 = vadd.f32 %v6487_v38, %v16537_v52  ;;  %v6527_v15 = vmul.f32 %v16537_v52, %v16537_v52 }
 0x588   : > { %v6489_v18 = vadd.f32 %v16525_v60, %v6488_v34  ;;  %v6558_v28 = vadd.f32 %v6557_v32, %v6527_v15 }
 0x58a   : > { %v6559_v0 = vadd.f32 %v6558_v28, %v6528_v1  ;;  %v16548_v4 = vpop.f32.mrb[52].mxu1  ;;  %v6490_v30 = vadd.f32 %v16533_v16, %v6489_v18 }
 0x58b   : > { %v16551_v42 = vpop.f32.mrb[53].mxu1  ;;  %v6532_v53 = vmul.f32 %v16548_v4, %v16548_v4 }
 0x58c   : > { %v6491_v51 = vadd.f32 %v6490_v30, %v16551_v42  ;;  %v6530_v35 = vmul.f32 %v16551_v42, %v16551_v42  ;;  %v6560_v26 = vadd.f32 %v6559_v0, %v6529_v48  ;;  %v16556_v62 = vpop.f32.mrb[54].mxu1 }
 0x58d   : > { %v16558_v50 = vpop.f32.mrb[55].mxu1  ;;  %v6533_v24 = vmul.f32 %v16556_v62, %v16556_v62 }
 0x58e   : > { %v6561_v59 = vadd.f32 %v6560_v26, %v6530_v35  ;;  %v6492_v37 = vadd.f32 %v6491_v51, %v16558_v50  ;;  %v6531_v27 = vmul.f32 %v16558_v50, %v16558_v50 }
 0x590   : > { %v6493_v6 = vadd.f32 %v16548_v4, %v6492_v37  ;;  %v6562_v23 = vadd.f32 %v6561_v59, %v6531_v27 }
 0x592   : > { %v6563_v49 = vadd.f32 %v6562_v23, %v6532_v53  ;;  %v16568_v9 = vpop.f32.mrb[56].mxu1  ;;  %v6494_v33 = vadd.f32 %v16556_v62, %v6493_v6 }
 0x593   : > { %v16571_v22 = vpop.f32.mrb[57].mxu1  ;;  %v6536_v40 = vmul.f32 %v16568_v9, %v16568_v9 }
 0x594   : > { %v6495_v19 = vadd.f32 %v6494_v33, %v16571_v22  ;;  %v6534_v21 = vmul.f32 %v16571_v22, %v16571_v22  ;;  %v6564_v41 = vadd.f32 %v6563_v49, %v6533_v24  ;;  %v16576_v54 = vpop.f32.mrb[58].mxu1 }
 0x595   : > { %v16578_v17 = vpop.f32.mrb[59].mxu1  ;;  %v6537_v34 = vmul.f32 %v16576_v54, %v16576_v54 }
 0x596   : > { %v6565_v36 = vadd.f32 %v6564_v41, %v6534_v21  ;;  %v6496_v25 = vadd.f32 %v6495_v19, %v16578_v17  ;;  %v6535_v38 = vmul.f32 %v16578_v17, %v16578_v17 }
 0x598   : > { %v6497_v58 = vadd.f32 %v16568_v9, %v6496_v25  ;;  %v6566_v32 = vadd.f32 %v6565_v36, %v6535_v38 }
 0x59a   : > { %v6567_v15 = vadd.f32 %v6566_v32, %v6536_v40  ;;  %v16588_v1 = vpop.f32.mrb[60].mxu1  ;;  %v6498_v18 = vadd.f32 %v16576_v54, %v6497_v58 }
 0x59b   : > { %v16591_v28 = vpop.f32.mrb[61].mxu1  ;;  %v6540_v27 = vmul.f32 %v16588_v1, %v16588_v1 }
 0x59c   : > { %v6499_v48 = vadd.f32 %v6498_v18, %v16591_v28  ;;  %v6538_v0 = vmul.f32 %v16591_v28, %v16591_v28  ;;  %v6568_v30 = vadd.f32 %v6567_v15, %v6537_v34  ;;  %v16596_v51 = vpop.f32.mrb[62].mxu1 }
 0x59d   : > { %v16598_v35 = vpop.f32.mrb[63].mxu1  ;;  %v6541_v23 = vmul.f32 %v16596_v51, %v16596_v51 }
 0x59e   : > { %v6569_v26 = vadd.f32 %v6568_v30, %v6538_v0  ;;  %v6500_v59 = vadd.f32 %v6499_v48, %v16598_v35  ;;  %v6539_v37 = vmul.f32 %v16598_v35, %v16598_v35 }
 0x5a0   : > { %v6501_v53 = vadd.f32 %v16588_v1, %v6500_v59  ;;  %v6570_v6 = vadd.f32 %v6569_v26, %v6539_v37 }
 0x5a2   : > { %v6502_v24 = vadd.f32 %v16596_v51, %v6501_v53  ;;  %v6571_v49 = vadd.f32 %v6570_v6, %v6540_v27 }
 0x5a4   : > { %v6503_v33 = vrot.slane %v6502_v24, 4  ;;  %v6572_v19 = vadd.f32 %v6571_v49, %v6541_v23 }
 0x5a6   : > { %v6504_v21 = vadd.f32 %v6503_v33, %v6502_v24  ;;  %v6573_v41 = vrot.slane %v6572_v19, 4 }
 0x5a8   : > { %v6505_v36 = vrot.slane %v6504_v21, 2  ;;  %v6574_v25 = vadd.f32 %v6573_v41, %v6572_v19 }
 0x5aa   : > { %v6506_v38 = vadd.f32 %v6505_v36, %v6504_v21  ;;  %v6575_v40 = vrot.slane %v6574_v25, 2 }
 0x5ac   : > { %v6507_v58 = vrot.slane %v6506_v38, 1  ;;  %v6576_v32 = vadd.f32 %v6575_v40, %v6574_v25 }
 0x5ae   : > { %v6508_v34 = vadd.f32 %v6507_v58, %v6506_v38  ;;  %v6577_v15 = vrot.slane %v6576_v32, 1 }
 0x5b0   : > { %v16609_v18 = vmul.f32 0.00390625, %v6508_v34  ;;  %v6578_v48 = vadd.f32 %v6577_v15, %v6576_v32 }
 0x5b2   : > { %v6579_v0 = vmul.f32 0.00390625, %v6578_v48  ;;  %v6580_v30 = vmul.f32 %v16609_v18, %v16609_v18  ;;  %v6611_v26 = vsub.f32 %v16598_v35, %v16609_v18  ;;  %v6582_v59 = vsub.f32 %v16447_v20, %v16609_v18 }
 0x5b3   : > { %v6583_v37 = vsub.f32 %v16452_v45, %v16609_v18  ;;  %v6584_v27 = vsub.f32 %v16445_v55, %v16609_v18  ;;  %v6585_v53 = vsub.f32 %v16450_v12, %v16609_v18  ;;  %v6586_v6 = vsub.f32 %v16468_v10, %v16609_v18 }
 0x5b4   : > { %v6581_v23 = vsub.f32 %v6579_v0, %v6580_v30  ;;  %v6587_v24 = vsub.f32 %v16475_v13, %v16609_v18  ;;  %v6588_v35 = vsub.f32 %v16465_v14, %v16609_v18  ;;  %v6589_v20 = vsub.f32 %v16473_v44, %v16609_v18 }
 0x5b5   : > { %v6590_v45 = vsub.f32 %v16488_v47, %v16609_v18  ;;  %v6591_v55 = vsub.f32 %v16495_v5, %v16609_v18  ;;  %v6592_v12 = vsub.f32 %v16485_v63, %v16609_v18  ;;  %v6593_v10 = vsub.f32 %v16493_v3, %v16609_v18 }
 0x5b6   : > { %v6614_v49 = vadd.f32 1e-05, %v6581_v23  ;;  %v6594_v13 = vsub.f32 %v16508_v46, %v16609_v18  ;;  %v6595_v14 = vsub.f32 %v16515_v11, %v16609_v18  ;;  %v6596_v44 = vsub.f32 %v16505_v39, %v16609_v18 }
 0x5b7   : > { %v6597_v47 = vsub.f32 %v16513_v31, %v16609_v18  ;;  %v6598_v5 = vsub.f32 %v16528_v57, %v16609_v18  ;;  %v6599_v63 = vsub.f32 %v16537_v52, %v16609_v18  ;;  %v6600_v3 = vsub.f32 %v16525_v60, %v16609_v18 }
 0x5b8   : > { %14105 = vrsqrt.f32 %v6614_v49  ;;  %v6601_v46 = vsub.f32 %v16533_v16, %v16609_v18  ;;  %v6602_v11 = vsub.f32 %v16551_v42, %v16609_v18  ;;  %v6603_v39 = vsub.f32 %v16558_v50, %v16609_v18 }
 0x5b9   : > { %v6604_v31 = vsub.f32 %v16548_v4, %v16609_v18  ;;  %v6605_v57 = vsub.f32 %v16556_v62, %v16609_v18  ;;  %v6606_v52 = vsub.f32 %v16571_v22, %v16609_v18  ;;  %v6607_v60 = vsub.f32 %v16578_v17, %v16609_v18 }
 0x5ba   : > { %v6608_v16 = vsub.f32 %v16568_v9, %v16609_v18  ;;  %v6609_v42 = vsub.f32 %v16576_v54, %v16609_v18  ;;  %v6610_v50 = vsub.f32 %v16591_v28, %v16609_v18  ;;  %v6612_v4 = vsub.f32 %v16588_v1, %v16609_v18 }
 0x5bb   : > { %v6613_v62 = vsub.f32 %v16596_v51, %v16609_v18 }
 0x5c2   : > { %v14106_v33 = vpop.eup %14105 }
 0x5c3   : > { %v16677_v22 = vmul.f32 %v14106_v33, %v6611_v26  ;;  %v6616_v19 = vmul.f32 %v14106_v33, %v6582_v59  ;;  %v6617_v17 = vmul.f32 %v14106_v33, %v6583_v37  ;;  %v6618_v21 = vmul.f32 %v14106_v33, %v6584_v27 }
 0x5c4   : > { %v6619_v41 = vmul.f32 %v14106_v33, %v6585_v53  ;;  %v6620_v9 = vmul.f32 %v14106_v33, %v6586_v6  ;;  %v6621_v36 = vmul.f32 %v14106_v33, %v6587_v24  ;;  %v16679_v25 = vmul.f32 %v14106_v33, %v6588_v35 }
 0x5c5   : > { %v16681_v54 = vmul.f32 %v14106_v33, %v6589_v20  ;;  %v16683_v28 = vmul.f32 %v14106_v33, %v6590_v45  ;;  %v16685_v38 = vmul.f32 %v14106_v33, %v6591_v55  ;;  %v16687_v1 = vmul.f32 %v14106_v33, %v6592_v12 }
 0x5c6   : > { %v16689_v51 = vmul.f32 %v14106_v33, %v6593_v10  ;;  %v16691_v40 = vmul.f32 %v14106_v33, %v6594_v13  ;;  %v16693_v58 = vmul.f32 %v14106_v33, %v6595_v14  ;;  %v17927_v32 = vmax.f32 %v16677_v22, 0.0 }
 0x5c7   : > { %v16696_v34 = vmul.f32 %v14106_v33, %v6596_v44  ;;  %v16698_v15 = vmul.f32 %v14106_v33, %v6597_v47  ;;  %v16700_v18 = vmul.f32 %v14106_v33, %v6598_v5  ;;  %v16702_v48 = vmul.f32 %v14106_v33, %v6599_v63 }
 0x5c8   : > { %v16704_v0 = vmul.f32 %v14106_v33, %v6600_v3  ;;  %v16706_v30 = vmul.f32 %v14106_v33, %v6601_v46  ;;  %v16708_v26 = vmul.f32 %v14106_v33, %v6602_v11  ;;  %v16710_v59 = vmul.f32 %v14106_v33, %v6603_v39 }
 0x5c9   : > { %v16712_v37 = vmul.f32 %v14106_v33, %v6604_v31  ;;  %v16714_v27 = vmul.f32 %v14106_v33, %v6605_v57  ;;  %v16716_v53 = vmul.f32 %v14106_v33, %v6606_v52  ;;  %v16718_v6 = vmul.f32 %v14106_v33, %v6607_v60 }
 0x5ca   : > { %v16720_v23 = vmul.f32 %v14106_v33, %v6608_v16  ;;  %v16722_v24 = vmul.f32 %v14106_v33, %v6609_v42  ;;  %v16724_v35 = vmul.f32 %v14106_v33, %v6610_v50  ;;  %v16726_v20 = vmul.f32 %v14106_v33, %v6612_v4 }
 0x5cb   : > { %v16728_v45 = vmul.f32 %v14106_v33, %v6613_v62  ;;  %v17933_v55 = vmax.f32 %v16716_v53, 0.0  ;;  %v6648_v12 = vmax.f32 %v6616_v19, 0.0  ;;  %v17932_v10 = vmax.f32 %v16718_v6, 0.0 }
 0x5cc   : > { %v17931_v49 = vmax.f32 %v16720_v23, 0.0  ;;  %v17930_v13 = vmax.f32 %v16722_v24, 0.0  ;;  %v17929_v14 = vmax.f32 %v16724_v35, 0.0  ;;  %v17926_v44 = vmax.f32 %v16726_v20, 0.0 }
 0x5cd   : > { %v17928_v47 = vmax.f32 %v16728_v45, 0.0  ;;  %v6649_v5 = vmax.f32 %v6617_v17, 0.0  ;;  %v16739_v63 = vrot.slane %v17927_v32, 4  ;;  %v16743_v3 = vrot.slane %v17933_v55, 4 }
 0x5ce   : > { %v16747_v46 = vrot.slane %v17932_v10, 4  ;;  %v16751_v11 = vrot.slane %v17931_v49, 4  ;;  %v16755_v39 = vrot.slane %v17930_v13, 4  ;;  %v16759_v31 = vrot.slane %v17929_v14, 4 }
 0x5cf   : > { %v16763_v57 = vrot.slane %v17926_v44, 4  ;;  %v16767_v52 = vrot.slane %v17928_v47, 4  ;;  %v16769_v60 = vpack.c.bf16 %v6649_v5, %v6648_v12  ;;  %v6650_v16 = vmax.f32 %v6618_v21, 0.0 }
 0x5d0   : > { %v6651_v42 = vmax.f32 %v6619_v41, 0.0  ;;  %v6652_v50 = vmax.f32 %v6620_v9, 0.0  ;;  %v16771_v4 = vrot.slane %v6648_v12, 4  ;;  %v6653_v62 = vmax.f32 %v6621_v36, 0.0 }
 0x5d1   : > { %18118 = vst [vmem:[#allocation26_spill] sm:$0xff] %v16769_v60  ;;  %v6654_v33 = vmax.f32 %v16679_v25, 0.0  ;;  %v6655_v19 = vmax.f32 %v16681_v54, 0.0  ;;  %v6753_v17 = vrot.slane %v6649_v5, 4  ;;  %12629 = vmatprep.mubr.bf16.mxu0 %v16769_v60  ;;  %v6754_v44 = vrot.slane %v6650_v16, 4 }
 0x5d2   : > { %v16776_v32 = vpack.c.bf16 %v6651_v42, %v6650_v16  ;;  %v6656_v47 = vmax.f32 %v16683_v28, 0.0  ;;  %v6755_v14 = vrot.slane %v6651_v42, 4  ;;  %v6756_v13 = vrot.slane %v6652_v50, 4 }
 0x5d3   : > { %v6757_v21 = vrot.slane %v6653_v62, 4  ;;  %v16779_v41 = vpack.c.bf16 %v6653_v62, %v6652_v50  ;;  %v6758_v9 = vrot.slane %v6654_v33, 4  ;;  %v16782_v36 = vpack.c.bf16 %v6655_v19, %v6654_v33 }
 0x5d4   : > { %18119 = vst [vmem:[#allocation18_spill] sm:$0xff] %v16776_v32  ;;  %12630 = vmatmul.mubr.bf16.gmra.mrb[40].mxu0 %v16776_v32  ;;  %v6657_v25 = vmax.f32 %v16685_v38, 0.0  ;;  %v6658_v54 = vmax.f32 %v16687_v1, 0.0  ;;  %v6659_v12 = vmax.f32 %v16689_v51, 0.0  ;;  %v6660_v28 = vmax.f32 %v16691_v40, 0.0 }
 0x5d5   : > { %18120 = vst [vmem:[#allocation12_spill] sm:$0xff] %v16779_v41  ;;  %18121 = vst [vmem:[#allocation27_spill] sm:$0xff] %v16782_v36  ;;  %12633 = vmatprep.mubr.bf16.mxu0 %v16779_v41  ;;  %v6661_v5 = vmax.f32 %v16693_v58, 0.0  ;;  %v6662_v16 = vmax.f32 %v16696_v34, 0.0  ;;  %v6759_v42 = vrot.slane %v6655_v19, 4  ;;  %v16791_v50 = vrot.slane %v6656_v47, 4 }
 0x5d6   : > { %v16793_v62 = vpack.c.bf16 %v6657_v25, %v6656_v47  ;;  %v6663_v33 = vmax.f32 %v16698_v15, 0.0  ;;  %v6761_v38 = vrot.slane %v6657_v25, 4  ;;  %v6762_v49 = vrot.slane %v6658_v54, 4 }
 0x5d7   : > { %v6763_v1 = vrot.slane %v6659_v12, 4  ;;  %v16796_v10 = vpack.c.bf16 %v6659_v12, %v6658_v54  ;;  %v6764_v55 = vrot.slane %v6660_v28, 4  ;;  %v6765_v51 = vrot.slane %v6661_v5, 4 }
 0x5d8   : > { %18122 = vst [vmem:[#allocation28_spill] sm:$0xff] %v16793_v62  ;;  %v16798_v8 = vpack.c.bf16 %v6661_v5, %v6660_v28  ;;  %v16800_v40 = vpack.c.bf16 %v6663_v33, %v6662_v16  ;;  %v6664_v58 = vmax.f32 %v16700_v18, 0.0  ;;  %v6665_v34 = vmax.f32 %v16702_v48, 0.0 }
 0x5d9   : > { %18123 = vst [vmem:[#allocation25_spill] sm:$0xff] %v16796_v10  ;;  %v6666_v47 = vmax.f32 %v16704_v0, 0.0  ;;  %v6667_v19 = vmax.f32 %v16706_v30, 0.0  ;;  %v6668_v15 = vmax.f32 %v16708_v26, 0.0  ;;  %v6669_v25 = vmax.f32 %v16710_v59, 0.0 }
 0x5da   : > { %18124 = vst [vmem:[#allocation21_spill] sm:$0xff] %v16798_v8  ;;  %v6670_v54 = vmax.f32 %v16712_v37, 0.0  ;;  %v6671_v12 = vmax.f32 %v16714_v27, 0.0  ;;  %v6766_v28 = vrot.slane %v6662_v16, 4  ;;  %v6767_v5 = vrot.slane %v6663_v33, 4 }
 0x5db   : > { %v6768_v41 = vrot.slane %v6664_v58, 4  ;;  %v16810_v32 = vpack.c.bf16 %v6665_v34, %v6664_v58  ;;  %v6769_v18 = vrot.slane %v6665_v34, 4  ;;  %v6770_v48 = vrot.slane %v6666_v47, 4 }
 0x5dc   : > { %12634 = vmatmul.mubr.bf16.gmra.mrb[44].mxu0 %v16782_v36  ;;  %v6771_v0 = vrot.slane %v6667_v19, 4  ;;  %v16813_v60 = vpack.c.bf16 %v6667_v19, %v6666_v47  ;;  %v6772_v30 = vrot.slane %v6668_v15, 4  ;;  %v6773_v26 = vrot.slane %v6669_v25, 4 }
 0x5dd   : > { %12637 = vmatprep.mubr.bf16.mxu0 %v16793_v62  ;;  %v16816_v59 = vpack.c.bf16 %v6669_v25, %v6668_v15  ;;  %v16818_v37 = vpack.c.bf16 %v6671_v12, %v6670_v54  ;;  %v16823_v27 = vsel %vm3652_vm11, %v16771_v4, %v6753_v17  ;;  %v16829_v16 = vsel %vm3652_vm11, %v15668_v29, %v16771_v4 }
 0x5de   : > { %v6796_v33 = vsel %vm3652_vm11, %v6754_v44, %v6755_v14  ;;  %v6797_v58 = vsel %vm3652_vm11, %v6753_v17, %v6754_v44  ;;  %v6774_v34 = vrot.slane %v6670_v54, 4  ;;  %v6794_v15 = vsel %vm3652_vm11, %v6756_v13, %v6757_v21 }
 0x5df   : > { %v16837_v19 = vpack.c.bf16 %v6796_v33, %v6797_v58  ;;  %v6775_v25 = vrot.slane %v6671_v12, 4  ;;  %v6795_v62 = vsel %vm3652_vm11, %v6755_v14, %v6756_v13  ;;  %v6792_v36 = vsel %vm3652_vm11, %v6758_v9, %v6759_v42 }
 0x5e0   : > { %v6793_v61 = vsel %vm3652_vm11, %v6757_v21, %v6758_v9  ;;  %v16847_v44 = vpack.c.bf16 %v6794_v15, %v6795_v62  ;;  %v16854_v54 = vsel %vm3652_vm11, %v16791_v50, %v6761_v38  ;;  %v6791_v12 = vsel %vm3652_vm11, %v6759_v42, %v16791_v50 }
 0x5e1   : > { %18125 = vst [vmem:[#allocation22_spill] sm:$0xff] %v16837_v19  ;;  %v16849_v17 = vpack.c.bf16 %v6792_v36, %v6793_v61  ;;  %v16860_v13 = vpack.c.bf16 %v16854_v54, %v6791_v12  ;;  %v6788_v14 = vsel %vm3652_vm11, %v6762_v49, %v6763_v1  ;;  %v6789_v21 = vsel %vm3652_vm11, %v6761_v38, %v6762_v49 }
 0x5e2   : > { %18126 = vst [vmem:[#allocation23_spill] sm:$0xff] %v16847_v44  ;;  %v6786_v9 = vsel %vm3652_vm11, %v6764_v55, %v6765_v51  ;;  %v16868_v47 = vpack.c.bf16 %v6788_v14, %v6789_v21  ;;  %v6784_v42 = vsel %vm3652_vm11, %v6766_v28, %v6767_v5  ;;  %v6782_v49 = vsel %vm3652_vm11, %v6768_v41, %v6769_v18 }
 0x5e3   : > { %18127 = vst [vmem:[#allocation24_spill] sm:$0xff] %v16849_v17  ;;  %18128 = vst [vmem:[#allocation14_spill] sm:$0xff] %v16860_v13  ;;  %v6787_v17 = vsel %vm3652_vm11, %v6763_v1, %v6764_v55  ;;  %v6785_v13 = vsel %vm3652_vm11, %v6765_v51, %v6766_v28  ;;  %v6783_v38 = vsel %vm3652_vm11, %v6767_v5, %v6768_v41 }
 0x5e4   : > { %18129 = vst [vmem:[#allocation29_spill] sm:$0xff] %v16868_v47  ;;  %12638 = vmatmul.mubr.bf16.gmra.mrb[48].mxu0 %v16796_v10  ;;  %v16877_v44 = vpack.c.bf16 %v6786_v9, %v6787_v17  ;;  %v16879_v19 = vpack.c.bf16 %v6784_v42, %v6785_v13  ;;  %v16886_v55 = vpack.c.bf16 %v6782_v49, %v6783_v38 }
 0x5e5   : > { %12641 = vmatprep.mubr.bf16.mxu0 %v16798_v8  ;;  %v6780_v1 = vsel %vm3652_vm11, %v6770_v48, %v6771_v0  ;;  %v6781_v51 = vsel %vm3652_vm11, %v6769_v18, %v6770_v48  ;;  %v6778_v28 = vsel %vm3652_vm11, %v6772_v30, %v6773_v26  ;;  %v16900_v41 = vsel %vm3652_vm11, %v6774_v34, %v6775_v25 }
 0x5e6   : > { %18130 = vst [vmem:[#allocation15_spill] sm:$0xff] %v16877_v44  ;;  %18131 = vst [vmem:[#allocation30_spill] sm:$0xff] %v16879_v19  ;;  %v16894_v10 = vpack.c.bf16 %v6780_v1, %v6781_v51  ;;  %v6779_v19 = vsel %vm3652_vm11, %v6771_v0, %v6772_v30  ;;  %v6777_v5 = vsel %vm3652_vm11, %v6773_v26, %v6774_v34 }
 0x5e7   : > { %18132 = vst [vmem:[#allocation16_spill] sm:$0xff] %v16886_v55  ;;  %v16907_v8 = vsel %vm3652_vm11, %v6775_v25, %v15668_v29  ;;  %v16909_v18 = vpack.c.bf16 %v6778_v28, %v6779_v19  ;;  %v16912_v48 = vpack.c.bf16 %v16900_v41, %v6777_v5  ;;  %v16917_v0 = vpack.c.bf16 %v6795_v62, %v6796_v33 }
 0x5e8   : > { %18133 = vst [vmem:[#allocation19_spill] sm:$0xff] %v16894_v10  ;;  %v16915_v10 = vpack.c.bf16 %v6797_v58, %v16823_v27  ;;  %v16919_v30 = vpack.c.bf16 %v6793_v61, %v6794_v15  ;;  %v16921_v55 = vpack.c.bf16 %v6791_v12, %v6792_v36  ;;  %v16924_v26 = vpack.c.bf16 %v6789_v21, %v16854_v54 }
 0x5e9   : > { %18134 = vst [vmem:[#allocation20_spill] sm:$0xff] %v16909_v18  ;;  %18135 = vst [vmem:[#allocation17_spill] sm:$0xff] %v16912_v48  ;;  %v16926_v34 = vpack.c.bf16 %v6787_v17, %v6788_v14  ;;  %v16928_v44 = vpack.c.bf16 %v6785_v13, %v6786_v9  ;;  %v16930_v18 = vpack.c.bf16 %v6783_v38, %v6784_v42  ;;  %v18138_v9 = vmax.f32 %v16720_v23, 0.0 }
 0x5ea   : > { %v16932_v47 = vpack.c.bf16 %v6781_v51, %v6782_v49  ;;  %v16934_v48 = vpack.c.bf16 %v6779_v19, %v6780_v1  ;;  %v16936_v58 = vpack.c.bf16 %v6777_v5, %v6778_v28  ;;  %v10844_v61 = vpack.c.bf16 %v16907_v8, %v16900_v41 }
 0x5eb   : > { %v16944_v36 = vsel %vm3652_vm11, %v16767_v52, %v16771_v4  ;;  %v7700_v33 = vsel %vm3652_vm11, %v16743_v3, %v16747_v46  ;;  %v7701_v19 = vsel %vm3652_vm11, %v6775_v25, %v16743_v3  ;;  %v7698_v15 = vsel %vm3652_vm11, %v16751_v11, %v16755_v39 }
 0x5ec   : > { %v10855_v62 = vpack.c.bf16 %v16823_v27, %v16944_v36  ;;  %12642 = vmatmul.mubr.bf16.gmra.mrb[52].mxu0 %v16800_v40  ;;  %v16960_v4 = vpack.c.bf16 %v7700_v33, %v7701_v19  ;;  %v7699_v17 = vsel %vm3652_vm11, %v16747_v46, %v16751_v11  ;;  %v7696_v12 = vsel %vm3652_vm11, %v16759_v31, %v16739_v63 }
 0x5ed   : > { %v7697_v3 = vsel %vm3652_vm11, %v16755_v39, %v16759_v31  ;;  %12645 = vmatprep.mubr.bf16.mxu0 %v16810_v32  ;;  %v16975_v25 = vpack.c.bf16 %v7698_v15, %v7699_v17  ;;  %v16983_v46 = vsel %vm3652_vm11, %v16763_v57, %v16767_v52  ;;  %v7695_v11 = vsel %vm3652_vm11, %v16739_v63, %v16763_v57 }
 0x5ee   : > { %v16977_v13 = vpack.c.bf16 %v7696_v12, %v7697_v3  ;;  %v16990_v14 = vpack.c.bf16 %v16983_v46, %v7695_v11  ;;  %v18136_v39 = vmax.f32 %v16716_v53, 0.0  ;;  %v18137_v31 = vmax.f32 %v16718_v6, 0.0 }
 0x5ef   : > { %v18139_v42 = vmax.f32 %v16722_v24, 0.0  ;;  %v18140_v38 = vmax.f32 %v16724_v35, 0.0  ;;  %v18141_v1 = vmax.f32 %v16677_v22, 0.0  ;;  %v18142_v57 = vmax.f32 %v16726_v20, 0.0 }
 0x5f0   : > { %v16996_v21 = vpack.c.bf16 %v18137_v31, %v18136_v39  ;;  %v18143_v53 = vmax.f32 %v16728_v45, 0.0  ;;  %v17017_v6 = vpack.c.bf16 %v7701_v19, %v16900_v41  ;;  %v17019_v23 = vpack.c.bf16 %v7699_v17, %v7700_v33  ;;  %v14050_v33 = vld [vmem:[#allocation6 + $0x518] sm:$0xff]   ;;  %v18145_v17 = vld [vmem:[#allocation22_spill] sm:$0xff]  ;;  %v18147_v39 = vld [vmem:[#allocation24_spill] sm:$0xff] }
 0x5f1   : > { %v17002_v49 = vpack.c.bf16 %v18139_v42, %v18138_v9  ;;  %v17008_v63 = vpack.c.bf16 %v18141_v1, %v18140_v38  ;;  %v17021_v24 = vpack.c.bf16 %v7697_v3, %v7698_v15  ;;  %v17023_v28 = vpack.c.bf16 %v7695_v11, %v7696_v12  ;;  %v14052_v15 = vld [vmem:[#allocation6 + $0x528] sm:$0xff]   ;;  %v18146_v12 = vld [vmem:[#allocation23_spill] sm:$0xff]  ;;  %v14053_v3 = vld [vmem:[#allocation6 + $0x530] sm:$0xff]  }
 0x5f2   : > { %v17014_v51 = vpack.c.bf16 %v18143_v53, %v18142_v57  ;;  %v10964_v22 = vpack.c.bf16 %v16944_v36, %v16983_v46  ;;  %v17031_v35 = vsel %vm3652_vm11, %v15668_v29, %v16791_v50  ;;  %v17037_v20 = vsel %vm3652_vm11, %v16767_v52, %v15668_v29  ;;  %v14049_v52 = vld [vmem:[#allocation6 + $0x510] sm:$0xff]   ;;  %v14054_v11 = vld [vmem:[#allocation6 + $0x538] sm:$0xff]   ;;  %v14055_v9 = vld [vmem:[#allocation6 + $0x540] sm:$0xff]  }
 0x5f3   : > { %v10975_v45 = vpack.c.bf16 %v16854_v54, %v17031_v35  ;;  %v11072_v5 = vpack.c.bf16 %v17037_v20, %v16983_v46  ;;  %v10743_v50 = vpack.c.bf16 %v15668_v29, %v16907_v8  ;;  %v18144_v19 = vpack.c.bf16 %v16823_v27, %v16829_v16  ;;  %v18148_v31 = vld [vmem:[#allocation14_spill] sm:$0xff]  ;;  %v18149_v42 = vld [vmem:[#allocation29_spill] sm:$0xff]  ;;  %v18150_v38 = vld [vmem:[#allocation15_spill] sm:$0xff] }
 0x5f4   : > { %12646 = vmatmul.mubr.bf16.gmra.mrb[56].mxu0 %v16813_v60  ;;  %v18151_v1 = vld [vmem:[#allocation30_spill] sm:$0xff]  ;;  %v18152_v57 = vld [vmem:[#allocation16_spill] sm:$0xff]  ;;  %v18153_v53 = vld [vmem:[#allocation19_spill] sm:$0xff] }
 0x5f5   : > { %12649 = vmatprep.mubr.bf16.mxu0 %v16816_v59  ;;  %v14065_v8 = vld [vmem:[#allocation6 + $0x590] sm:$0xff]   ;;  %v14066_v41 = vld [vmem:[#allocation6 + $0x598] sm:$0xff]   ;;  %v14067_v27 = vld [vmem:[#allocation6 + $0x5a0] sm:$0xff]  }
 0x5f6   : > { %v14089_v36 = vld [vmem:[#allocation6 + $0x650] sm:$0xff]   ;;  %v14091_v54 = vld [vmem:[#allocation6 + $0x660] sm:$0xff]  }
 0x5fc   : > { %12650 = vmatmul.mubr.bf16.gmra.mrb[60].mxu0 %v16818_v37 }
 0x5fd   : > { %12669 = vmatprep.mubr.msk.bf16.mxu0 %vm14434_vm2, %v10743_v50  ;;  %v18154_v50 = vld [vmem:[#allocation20_spill] sm:$0xff] }
 0x604   : > { %12670 = vmatmul.mubr.msk.bf16.vlgmr.msra.gmra.mrb[32].mxu0 %vm14434_vm2, %v16108_v43 }
 0x605   : > { %12702 = vmatpush3.bf16.msra.mxu0 %v16535_v7  ;;  %12673 = vmatprep.mubr.msk.bf16.mxu0 %vm14434_vm2, %v16108_v43  ;;  %v14051_v7 = vld [vmem:[#allocation6 + $0x520] sm:$0xff]  }
 0x606   : > { %12703 = vmatprep.subr.bf16.mxu0 %v14048_v2 }
 0x609   : > { %12704 = vmatpush3.bf16.msra.mxu0 %v14048_v2  ;;  %v18155_v2 = vld [vmem:[#allocation17_spill] sm:$0xff] }
 0x60a   : > { %12705 = vmatprep.subr.bf16.mxu0 %v14049_v52 }
 0x60c   : > { %12674 = vmatmul.mubr.msk.bf16.gmra.mrb[36].mxu0 %vm14434_vm2, %v16108_v43 }
 0x60d   : > { %12677 = vmatprep.mubr.msk.bf16.mxu0 %vm14434_vm2, %v18144_v19  ;;  %12706 = vmatpush3.bf16.msra.mxu0 %v14049_v52  ;;  %v14057_v19 = vld [vmem:[#allocation6 + $0x550] sm:$0xff]  }
 0x60e   : > { %12707 = vmatprep.subr.bf16.mxu0 %v14050_v33 }
 0x611   : > { %12708 = vmatpush3.bf16.msra.mxu0 %v14050_v33  ;;  %v14056_v33 = vld [vmem:[#allocation6 + $0x548] sm:$0xff]  }
 0x612   : > { %12709 = vmatprep.subr.bf16.mxu0 %v14051_v7 }
 0x614   : > { %12678 = vmatmul.mubr.msk.bf16.gmra.mrb[40].mxu0 %vm14434_vm2, %v18145_v17 }
 0x615   : > { %12681 = vmatprep.mubr.msk.bf16.mxu0 %vm14434_vm2, %v18146_v12  ;;  %12710 = vmatpush3.bf16.msra.mxu0 %v14051_v7  ;;  %v10808_v7 = vpack.c.bf16 %v16829_v16, %v15668_v29  ;;  %v14061_v16 = vld [vmem:[#allocation6 + $0x570] sm:$0xff]  }
 0x616   : > { %12711 = vmatprep.subr.bf16.mxu0 %v14052_v15 }
 0x619   : > { %12712 = vmatpush3.bf16.msra.mxu0 %v14052_v15  ;;  %v14058_v15 = vld [vmem:[#allocation6 + $0x558] sm:$0xff]  }
 0x61a   : > { %12713 = vmatprep.subr.bf16.mxu0 %v14053_v3 }
 0x61c   : > { %12682 = vmatmul.mubr.msk.bf16.gmra.mrb[44].mxu0 %vm14434_vm2, %v18147_v39 }
 0x61d   : > { %12685 = vmatprep.mubr.msk.bf16.mxu0 %vm14434_vm2, %v18148_v31  ;;  %12714 = vmatpush3.bf16.msra.mxu0 %v14053_v3  ;;  %v14059_v3 = vld [vmem:[#allocation6 + $0x560] sm:$0xff]  }
 0x61e   : > { %12715 = vmatprep.subr.bf16.mxu0 %v14054_v11 }
 0x621   : > { %12716 = vmatpush3.bf16.msra.mxu0 %v14054_v11  ;;  %v14060_v11 = vld [vmem:[#allocation6 + $0x568] sm:$0xff]  }
 0x622   : > { %12749 = vmatprep.subr.bf16.mxu0 %v14055_v9 }
 0x624   : > { %12686 = vmatmul.mubr.msk.bf16.gmra.mrb[48].mxu0 %vm14434_vm2, %v18149_v42 }
 0x625   : > { %12689 = vmatprep.mubr.msk.bf16.mxu0 %vm14434_vm2, %v18150_v38 }
 0x62c   : > { %12690 = vmatmul.mubr.msk.bf16.gmra.mrb[52].mxu0 %vm14434_vm2, %v18151_v1 }
 0x62d   : > { %12693 = vmatprep.mubr.msk.bf16.mxu0 %vm14434_vm2, %v18152_v57 }
 0x634   : > { %12694 = vmatmul.mubr.msk.bf16.gmra.mrb[56].mxu0 %vm14434_vm2, %v18153_v53 }
 0x635   : > { %12697 = vmatprep.mubr.msk.bf16.mxu0 %vm14434_vm2, %v18154_v50 }
 0x63c   : > { %12698 = vmatmul.mubr.msk.bf16.gmra.mrb[60].mxu0 %vm14434_vm2, %v18155_v2 }
 0x63d   : > { %12717 = vmatprep.mubr.msk.bf16.mxu0 %vm14463_vm4, %v16108_v43 }
 0x644   : > { %12718 = vmatmul.mubr.msk.bf16.vlgmr.msra.gmra.mrb[32].mxu0 %vm14463_vm4, %v16108_v43 }
 0x645   : > { %12750 = vmatpush3.bf16.msra.mxu0 %v14055_v9  ;;  %12721 = vmatprep.mubr.msk.bf16.mxu0 %vm14463_vm4, %v16108_v43  ;;  %v14062_v9 = vld [vmem:[#allocation6 + $0x578] sm:$0xff]  }
 0x646   : > { %12751 = vmatprep.subr.bf16.mxu0 %v14056_v33 }
 0x649   : > { %12752 = vmatpush3.bf16.msra.mxu0 %v14056_v33  ;;  %v14063_v33 = vld [vmem:[#allocation6 + $0x580] sm:$0xff]  }
 0x64a   : > { %12753 = vmatprep.subr.bf16.mxu0 %v14057_v19 }
 0x64c   : > { %12722 = vmatmul.mubr.msk.bf16.gmra.mrb[36].mxu0 %vm14463_vm4, %v10808_v7  ;;  %v18158_v7 = vld [vmem:[#allocation18_spill] sm:$0xff] }
 0x64d   : > { %12725 = vmatprep.mubr.msk.bf16.mxu0 %vm14463_vm4, %v16915_v10  ;;  %12754 = vmatpush3.bf16.msra.mxu0 %v14057_v19  ;;  %v14064_v19 = vld [vmem:[#allocation6 + $0x588] sm:$0xff]  }
 0x64e   : > { %12755 = vmatprep.subr.bf16.mxu0 %v14058_v15 }
 0x651   : > { %12756 = vmatpush3.bf16.msra.mxu0 %v14058_v15  ;;  %v18159_v15 = vld [vmem:[#allocation12_spill] sm:$0xff] }
 0x652   : > { %12757 = vmatprep.subr.bf16.mxu0 %v14059_v3 }
 0x654   : > { %12726 = vmatmul.mubr.msk.bf16.gmra.mrb[40].mxu0 %vm14463_vm4, %v16917_v0 }
 0x655   : > { %12729 = vmatprep.mubr.msk.bf16.mxu0 %vm14463_vm4, %v16919_v30  ;;  %12758 = vmatpush3.bf16.msra.mxu0 %v14059_v3  ;;  %v14073_v3 = vld [vmem:[#allocation6 + $0x5d0] sm:$0xff]  }
 0x656   : > { %12759 = vmatprep.subr.bf16.mxu0 %v14060_v11 }
 0x659   : > { %12760 = vmatpush3.bf16.msra.mxu0 %v14060_v11  ;;  %v14074_v11 = vld [vmem:[#allocation6 + $0x5d8] sm:$0xff]  }
 0x65a   : > { %12761 = vmatprep.subr.bf16.mxu0 %v14061_v16 }
 0x65c   : > { %12730 = vmatmul.mubr.msk.bf16.gmra.mrb[44].mxu0 %vm14463_vm4, %v16921_v55 }
 0x65d   : > { %12733 = vmatprep.mubr.msk.bf16.mxu0 %vm14463_vm4, %v16924_v26  ;;  %12762 = vmatpush3.bf16.msra.mxu0 %v14061_v16  ;;  %v18160_v16 = vld [vmem:[#allocation27_spill] sm:$0xff] }
 0x65e   : > { %12763 = vmatprep.subr.bf16.mxu0 %v14062_v9 }
 0x661   : > { %12764 = vmatpush3.bf16.msra.mxu0 %v14062_v9  ;;  %v18161_v9 = vld [vmem:[#allocation28_spill] sm:$0xff] }
 0x662   : > { %12797 = vmatprep.subr.bf16.mxu0 %v14063_v33 }
 0x664   : > { %12734 = vmatmul.mubr.msk.bf16.gmra.mrb[48].mxu0 %vm14463_vm4, %v16926_v34 }
 0x665   : > { %12737 = vmatprep.mubr.msk.bf16.mxu0 %vm14463_vm4, %v16928_v44 }
 0x66c   : > { %12738 = vmatmul.mubr.msk.bf16.gmra.mrb[52].mxu0 %vm14463_vm4, %v16930_v18 }
 0x66d   : > { %12741 = vmatprep.mubr.msk.bf16.mxu0 %vm14463_vm4, %v16932_v47 }
 0x674   : > { %12742 = vmatmul.mubr.msk.bf16.gmra.mrb[56].mxu0 %vm14463_vm4, %v16934_v48 }
 0x675   : > { %12745 = vmatprep.mubr.msk.bf16.mxu0 %vm14463_vm4, %v16936_v58 }
 0x67c   : > { %12746 = vmatmul.mubr.msk.bf16.gmra.mrb[60].mxu0 %vm14463_vm4, %v10844_v61  ;;  %v14068_v61 = vld [vmem:[#allocation6 + $0x5a8] sm:$0xff]  }
 0x67d   : > { %12765 = vmatprep.mubr.msk.bf16.mxu0 %vm14434_vm2, %v10855_v62  ;;  %v14069_v62 = vld [vmem:[#allocation6 + $0x5b0] sm:$0xff]  }
 0x684   : > { %12766 = vmatmul.mubr.msk.bf16.vlgmr.msra.gmra.mrb[32].mxu0 %vm14434_vm2, %v18145_v17  ;;  %v14070_v17 = vld [vmem:[#allocation6 + $0x5b8] sm:$0xff]  }
 0x685   : > { %12769 = vmatprep.mubr.msk.bf16.mxu0 %vm14434_vm2, %v18146_v12  ;;  %12798 = vmatpush3.bf16.msra.mxu0 %v14063_v33  ;;  %v14071_v12 = vld [vmem:[#allocation6 + $0x5c0] sm:$0xff]  }
 0x686   : > { %12799 = vmatprep.subr.bf16.mxu0 %v14064_v19  ;;  %v14075_v33 = vld [vmem:[#allocation6 + $0x5e0] sm:$0xff]  }
 0x689   : > { %12800 = vmatpush3.bf16.msra.mxu0 %v14064_v19  ;;  %v14076_v19 = vld [vmem:[#allocation6 + $0x5e8] sm:$0xff]  }
 0x68a   : > { %12801 = vmatprep.subr.bf16.mxu0 %v14065_v8 }
 0x68c   : > { %12770 = vmatmul.mubr.msk.bf16.gmra.mrb[36].mxu0 %vm14434_vm2, %v18147_v39  ;;  %v18157_v39 = vld [vmem:[#allocation26_spill] sm:$0xff] }
 0x68d   : > { %12773 = vmatprep.mubr.msk.bf16.mxu0 %vm14434_vm2, %v18148_v31  ;;  %12802 = vmatpush3.bf16.msra.mxu0 %v14065_v8  ;;  %v14072_v31 = vld [vmem:[#allocation6 + $0x5c8] sm:$0xff]  }
 0x68e   : > { %12803 = vmatprep.subr.bf16.mxu0 %v14066_v41  ;;  %v18162_v8 = vld [vmem:[#allocation25_spill] sm:$0xff] }
 0x691   : > { %12804 = vmatpush3.bf16.msra.mxu0 %v14066_v41  ;;  %v18163_v41 = vld [vmem:[#allocation21_spill] sm:$0xff] }
 0x692   : > { %12805 = vmatprep.subr.bf16.mxu0 %v14067_v27 }
 0x694   : > { %12774 = vmatmul.mubr.msk.bf16.gmra.mrb[40].mxu0 %vm14434_vm2, %v18149_v42 }
 0x695   : > { %12777 = vmatprep.mubr.msk.bf16.mxu0 %vm14434_vm2, %v18150_v38  ;;  %12806 = vmatpush3.bf16.msra.mxu0 %v14067_v27  ;;  %v14077_v27 = vld [vmem:[#allocation6 + $0x5f0] sm:$0xff]  }
 0x696   : > { %12807 = vmatprep.subr.bf16.mxu0 %v14068_v61 }
 0x699   : > { %12808 = vmatpush3.bf16.msra.mxu0 %v14068_v61  ;;  %v14078_v61 = vld [vmem:[#allocation6 + $0x5f8] sm:$0xff]  }
 0x69a   : > { %12809 = vmatprep.subr.bf16.mxu0 %v14069_v62 }
 0x69c   : > { %12778 = vmatmul.mubr.msk.bf16.gmra.mrb[44].mxu0 %vm14434_vm2, %v18151_v1 }
 0x69d   : > { %12781 = vmatprep.mubr.msk.bf16.mxu0 %vm14434_vm2, %v18152_v57  ;;  %12810 = vmatpush3.bf16.msra.mxu0 %v14069_v62  ;;  %v14079_v62 = vld [vmem:[#allocation6 + $0x600] sm:$0xff]  }
 0x69e   : > { %12811 = vmatprep.subr.bf16.mxu0 %v14070_v17 }
 0x6a1   : > { %12812 = vmatpush3.bf16.msra.mxu0 %v14070_v17  ;;  %v14080_v17 = vld [vmem:[#allocation6 + $0x608] sm:$0xff]  }
 0x6a2   : > { %12845 = vmatprep.subr.bf16.mxu0 %v14071_v12 }
 0x6a4   : > { %12782 = vmatmul.mubr.msk.bf16.gmra.mrb[48].mxu0 %vm14434_vm2, %v18153_v53 }
 0x6a5   : > { %12785 = vmatprep.mubr.msk.bf16.mxu0 %vm14434_vm2, %v18154_v50 }
 0x6ac   : > { %12786 = vmatmul.mubr.msk.bf16.gmra.mrb[52].mxu0 %vm14434_vm2, %v18155_v2 }
 0x6ad   : > { %12789 = vmatprep.mubr.msk.bf16.mxu0 %vm14434_vm2, %v16960_v4 }
 0x6b4   : > { %12790 = vmatmul.mubr.msk.bf16.gmra.mrb[56].mxu0 %vm14434_vm2, %v16975_v25 }
 0x6b5   : > { %12793 = vmatprep.mubr.msk.bf16.mxu0 %vm14434_vm2, %v16977_v13 }
 0x6bc   : > { %12794 = vmatmul.mubr.msk.bf16.gmra.mrb[60].mxu0 %vm14434_vm2, %v16990_v14 }
 0x6bd   : > { %12813 = vmatprep.mubr.bf16.mxu0 %v18157_v39  ;;  %v14082_v39 = vld [vmem:[#allocation6 + $0x618] sm:$0xff]  }
 0x6c4   : > { %12814 = vmatmul.mubr.bf16.vlgmr.msra.gmra.mrb[32].mxu0 %v18158_v7  ;;  %v14088_v7 = vld [vmem:[#allocation6 + $0x648] sm:$0xff]  }
 0x6c5   : > { %12817 = vmatprep.mubr.bf16.mxu0 %v18159_v15  ;;  %12846 = vmatpush3.bf16.msra.mxu0 %v14071_v12  ;;  %v14081_v12 = vld [vmem:[#allocation6 + $0x610] sm:$0xff]  }
 0x6c6   : > { %12847 = vmatprep.subr.bf16.mxu0 %v14072_v31 }
 0x6c9   : > { %12848 = vmatpush3.bf16.msra.mxu0 %v14072_v31  ;;  %v14087_v31 = vld [vmem:[#allocation6 + $0x640] sm:$0xff]  }
 0x6ca   : > { %12849 = vmatprep.subr.bf16.mxu0 %v14073_v3 }
 0x6cc   : > { %12818 = vmatmul.mubr.bf16.gmra.mrb[36].mxu0 %v18160_v16 }
 0x6cd   : > { %12821 = vmatprep.mubr.bf16.mxu0 %v18161_v9  ;;  %12850 = vmatpush3.bf16.msra.mxu0 %v14073_v3 }
 0x6ce   : > { %12851 = vmatprep.subr.bf16.mxu0 %v14074_v11 }
 0x6d1   : > { %12852 = vmatpush3.bf16.msra.mxu0 %v14074_v11 }
 0x6d2   : > { %12853 = vmatprep.subr.bf16.mxu0 %v14075_v33 }
 0x6d4   : > { %12822 = vmatmul.mubr.bf16.gmra.mrb[40].mxu0 %v18162_v8 }
 0x6d5   : > { %12825 = vmatprep.mubr.bf16.mxu0 %v18163_v41  ;;  %12854 = vmatpush3.bf16.msra.mxu0 %v14075_v33 }
 0x6d6   : > { %12855 = vmatprep.subr.bf16.mxu0 %v14076_v19 }
 0x6d9   : > { %12856 = vmatpush3.bf16.msra.mxu0 %v14076_v19 }
 0x6da   : > { %12857 = vmatprep.subr.bf16.mxu0 %v14077_v27 }
 0x6dc   : > { %12826 = vmatmul.mubr.bf16.gmra.mrb[44].mxu0 %v16800_v40 }
 0x6dd   : > { %12829 = vmatprep.mubr.bf16.mxu0 %v16810_v32  ;;  %12858 = vmatpush3.bf16.msra.mxu0 %v14077_v27 }
 0x6de   : > { %12859 = vmatprep.subr.bf16.mxu0 %v14078_v61 }
 0x6e1   : > { %12860 = vmatpush3.bf16.msra.mxu0 %v14078_v61 }
 0x6e2   : > { %12893 = vmatprep.subr.bf16.mxu0 %v14079_v62 }
 0x6e4   : > { %12830 = vmatmul.mubr.bf16.gmra.mrb[48].mxu0 %v16813_v60 }
 0x6e5   : > { %12833 = vmatprep.mubr.bf16.mxu0 %v16816_v59 }
 0x6ec   : > { %12834 = vmatmul.mubr.bf16.gmra.mrb[52].mxu0 %v16818_v37 }
 0x6ed   : > { %12837 = vmatprep.mubr.bf16.mxu0 %v16996_v21 }
 0x6f4   : > { %12838 = vmatmul.mubr.bf16.gmra.mrb[56].mxu0 %v17002_v49 }
 0x6f5   : > { %12841 = vmatprep.mubr.bf16.mxu0 %v17008_v63 }
 0x6fc   : > { %12842 = vmatmul.mubr.bf16.gmra.mrb[60].mxu0 %v17014_v51 }
 0x6fd   : > { %12861 = vmatprep.mubr.msk.bf16.mxu0 %vm14463_vm4, %v16915_v10  ;;  %v14083_v10 = vld [vmem:[#allocation6 + $0x620] sm:$0xff]  }
 0x704   : > { %12862 = vmatmul.mubr.msk.bf16.vlgmr.msra.gmra.mrb[32].mxu0 %vm14463_vm4, %v16917_v0  ;;  %v14084_v0 = vld [vmem:[#allocation6 + $0x628] sm:$0xff]  }
 0x705   : > { %12865 = vmatprep.mubr.msk.bf16.mxu0 %vm14463_vm4, %v16919_v30  ;;  %12894 = vmatpush3.bf16.msra.mxu0 %v14079_v62  ;;  %v14086_v30 = vld [vmem:[#allocation6 + $0x638] sm:$0xff]  }
 0x706   : > { %12895 = vmatprep.subr.bf16.mxu0 %v14080_v17 }
 0x709   : > { %12896 = vmatpush3.bf16.msra.mxu0 %v14080_v17 }
 0x70a   : > { %12897 = vmatprep.subr.bf16.mxu0 %v14081_v12 }
 0x70c   : > { %12866 = vmatmul.mubr.msk.bf16.gmra.mrb[36].mxu0 %vm14463_vm4, %v16921_v55  ;;  %v14085_v55 = vld [vmem:[#allocation6 + $0x630] sm:$0xff]  }
 0x70d   : > { %12869 = vmatprep.mubr.msk.bf16.mxu0 %vm14463_vm4, %v16924_v26  ;;  %12898 = vmatpush3.bf16.msra.mxu0 %v14081_v12 }
 0x70e   : > { %12899 = vmatprep.subr.bf16.mxu0 %v14082_v39 }
 0x711   : > { %12900 = vmatpush3.bf16.msra.mxu0 %v14082_v39 }
 0x712   : > { %12901 = vmatprep.subr.bf16.mxu0 %v14083_v10 }
 0x714   : > { %12870 = vmatmul.mubr.msk.bf16.gmra.mrb[40].mxu0 %vm14463_vm4, %v16926_v34 }
 0x715   : > { %12873 = vmatprep.mubr.msk.bf16.mxu0 %vm14463_vm4, %v16928_v44  ;;  %12902 = vmatpush3.bf16.msra.mxu0 %v14083_v10 }
 0x716   : > { %12903 = vmatprep.subr.bf16.mxu0 %v14084_v0 }
 0x719   : > { %12904 = vmatpush3.bf16.msra.mxu0 %v14084_v0 }
 0x71a   : > { %12905 = vmatprep.subr.bf16.mxu0 %v14085_v55 }
 0x71c   : > { %12874 = vmatmul.mubr.msk.bf16.gmra.mrb[44].mxu0 %vm14463_vm4, %v16930_v18 }
 0x71d   : > { %12877 = vmatprep.mubr.msk.bf16.mxu0 %vm14463_vm4, %v16932_v47  ;;  %12906 = vmatpush3.bf16.msra.mxu0 %v14085_v55 }
 0x71e   : > { %12907 = vmatprep.subr.bf16.mxu0 %v14086_v30 }
 0x721   : > { %12908 = vmatpush3.bf16.msra.mxu0 %v14086_v30 }
 0x722   : > { %12941 = vmatprep.subr.bf16.mxu0 %v14087_v31 }
 0x724   : > { %12878 = vmatmul.mubr.msk.bf16.gmra.mrb[48].mxu0 %vm14463_vm4, %v16934_v48 }
 0x725   : > { %12881 = vmatprep.mubr.msk.bf16.mxu0 %vm14463_vm4, %v16936_v58 }
 0x72c   : > { %12882 = vmatmul.mubr.msk.bf16.gmra.mrb[52].mxu0 %vm14463_vm4, %v17017_v6 }
 0x72d   : > { %12885 = vmatprep.mubr.msk.bf16.mxu0 %vm14463_vm4, %v17019_v23 }
 0x734   : > { %12886 = vmatmul.mubr.msk.bf16.gmra.mrb[56].mxu0 %vm14463_vm4, %v17021_v24 }
 0x735   : > { %12889 = vmatprep.mubr.msk.bf16.mxu0 %vm14463_vm4, %v17023_v28 }
 0x73c   : > { %12890 = vmatmul.mubr.msk.bf16.gmra.mrb[60].mxu0 %vm14463_vm4, %v10964_v22  ;;  %v14090_v22 = vld [vmem:[#allocation6 + $0x658] sm:$0xff]  }
 0x73d   : > { %12909 = vmatprep.mubr.msk.bf16.mxu0 %vm14434_vm2, %v10975_v45  ;;  %v14092_v45 = vld [vmem:[#allocation6 + $0x668] sm:$0xff]  }
 0x744   : > { %12910 = vmatmul.mubr.msk.bf16.vlgmr.msra.gmra.mrb[32].mxu0 %vm14434_vm2, %v18149_v42  ;;  %v14093_v42 = vld [vmem:[#allocation6 + $0x670] sm:$0xff]  }
 0x745   : > { %12913 = vmatprep.mubr.msk.bf16.mxu0 %vm14434_vm2, %v18150_v38  ;;  %12942 = vmatpush3.bf16.msra.mxu0 %v14087_v31  ;;  %v14094_v38 = vld [vmem:[#allocation6 + $0x678] sm:$0xff]  }
 0x746   : > { %12943 = vmatprep.subr.bf16.mxu0 %v14088_v7 }
 0x749   : > { %12944 = vmatpush3.bf16.msra.mxu0 %v14088_v7 }
 0x74a   : > { %12945 = vmatprep.subr.bf16.mxu0 %v14089_v36 }
 0x74c   : > { %12914 = vmatmul.mubr.msk.bf16.gmra.mrb[36].mxu0 %vm14434_vm2, %v18151_v1  ;;  %v14095_v1 = vld [vmem:[#allocation6 + $0x680] sm:$0xff]  }
 0x74d   : > { %12917 = vmatprep.mubr.msk.bf16.mxu0 %vm14434_vm2, %v18152_v57  ;;  %12946 = vmatpush3.bf16.msra.mxu0 %v14089_v36  ;;  %v11011_v57 = vpack.c.bf16 %v15668_v29, %v17037_v20 }
 0x74e   : > { %12947 = vmatprep.subr.bf16.mxu0 %v14090_v22 }
 0x751   : > { %12948 = vmatpush3.bf16.msra.mxu0 %v14090_v22 }
 0x752   : > { %12949 = vmatprep.subr.bf16.mxu0 %v14091_v54 }
 0x754   : > { %12918 = vmatmul.mubr.msk.bf16.gmra.mrb[40].mxu0 %vm14434_vm2, %v18153_v53  ;;  %v14101_v53 = vld [vmem:[#allocation6 + $0x6b0] sm:$0xff]  }
 0x755   : > { %12921 = vmatprep.mubr.msk.bf16.mxu0 %vm14434_vm2, %v18154_v50  ;;  %12950 = vmatpush3.bf16.msra.mxu0 %v14091_v54  ;;  %v14102_v50 = vld [vmem:[#allocation6 + $0x6b8] sm:$0xff]  }
 0x756   : > { %12951 = vmatprep.subr.bf16.mxu0 %v14092_v45 }
 0x759   : > { %12952 = vmatpush3.bf16.msra.mxu0 %v14092_v45 }
 0x75a   : > { %12953 = vmatprep.subr.bf16.mxu0 %v14093_v42 }
 0x75c   : > { %12922 = vmatmul.mubr.msk.bf16.gmra.mrb[44].mxu0 %vm14434_vm2, %v18155_v2 }
 0x75d   : > { %12925 = vmatprep.mubr.msk.bf16.mxu0 %vm14434_vm2, %v16960_v4  ;;  %12954 = vmatpush3.bf16.msra.mxu0 %v14093_v42  ;;  %v14096_v4 = vld [vmem:[#allocation6 + $0x688] sm:$0xff]  }
 0x75e   : > { %12955 = vmatprep.subr.bf16.mxu0 %v14094_v38 }
 0x761   : > { %12956 = vmatpush3.bf16.msra.mxu0 %v14094_v38 }
 0x762   : > { %12989 = vmatprep.subr.bf16.mxu0 %v14095_v1 }
 0x764   : > { %12926 = vmatmul.mubr.msk.bf16.gmra.mrb[48].mxu0 %vm14434_vm2, %v16975_v25  ;;  %v14097_v25 = vld [vmem:[#allocation6 + $0x690] sm:$0xff]  }
 0x765   : > { %12929 = vmatprep.mubr.msk.bf16.mxu0 %vm14434_vm2, %v16977_v13  ;;  %v14098_v13 = vld [vmem:[#allocation6 + $0x698] sm:$0xff]  }
 0x76c   : > { %12930 = vmatmul.mubr.msk.bf16.gmra.mrb[52].mxu0 %vm14434_vm2, %v16990_v14  ;;  %v14100_v14 = vld [vmem:[#allocation6 + $0x6a8] sm:$0xff]  }
 0x76d   : > { %12933 = vmatprep.mubr.msk.bf16.mxu0 %vm14434_vm2, %v11011_v57 }
 0x774   : > { %12934 = vmatmul.mubr.msk.bf16.gmra.mrb[56].mxu0 %vm14434_vm2, %v16108_v43 }
 0x775   : > { %12937 = vmatprep.mubr.msk.bf16.mxu0 %vm14434_vm2, %v16108_v43 }
 0x77c   : > { %12938 = vmatmul.mubr.msk.bf16.gmra.mrb[60].mxu0 %vm14434_vm2, %v16108_v43 }
 0x77d   : > { %12957 = vmatprep.mubr.bf16.mxu0 %v18161_v9 }
 0x784   : > { %12958 = vmatmul.mubr.bf16.vlgmr.msra.gmra.mrb[32].mxu0 %v18162_v8 }
 0x785   : > { %12961 = vmatprep.mubr.bf16.mxu0 %v18163_v41  ;;  %12990 = vmatpush3.bf16.msra.mxu0 %v14095_v1 }
 0x786   : > { %12991 = vmatprep.subr.bf16.mxu0 %v14096_v4 }
 0x789   : > { %12992 = vmatpush3.bf16.msra.mxu0 %v14096_v4 }
 0x78a   : > { %12993 = vmatprep.subr.bf16.mxu0 %v14097_v25 }
 0x78c   : > { %12962 = vmatmul.mubr.bf16.gmra.mrb[36].mxu0 %v16800_v40 }
 0x78d   : > { %12965 = vmatprep.mubr.bf16.mxu0 %v16810_v32  ;;  %12994 = vmatpush3.bf16.msra.mxu0 %v14097_v25  ;;  %v18164_v32 = vmov 0.0|0.0  }
 0x78e   : > { %12995 = vmatprep.subr.bf16.mxu0 %v14098_v13 }
 0x791   : > { %12996 = vmatpush3.bf16.msra.mxu0 %v14098_v13 }
 0x792   : > { %12997 = vmatprep.subr.bf16.mxu0 %v14099_v56 }
 0x794   : > { %12966 = vmatmul.mubr.bf16.gmra.mrb[40].mxu0 %v16813_v60  ;;  %v11084_v60 = vpack.c.bf16 %v17031_v35, %v15668_v29 }
 0x795   : > { %12969 = vmatprep.mubr.bf16.mxu0 %v16816_v59  ;;  %12998 = vmatpush3.bf16.msra.mxu0 %v14099_v56 }
 0x796   : > { %12999 = vmatprep.subr.bf16.mxu0 %v14100_v14 }
 0x799   : > { %13000 = vmatpush3.bf16.msra.mxu0 %v14100_v14 }
 0x79a   : > { %13001 = vmatprep.subr.bf16.mxu0 %v14101_v53 }
 0x79c   : > { %12970 = vmatmul.mubr.bf16.gmra.mrb[44].mxu0 %v16818_v37 }
 0x79d   : > { %12973 = vmatprep.mubr.bf16.mxu0 %v16996_v21  ;;  %13002 = vmatpush3.bf16.msra.mxu0 %v14101_v53 }
 0x79e   : > { %13003 = vmatprep.subr.bf16.mxu0 %v14102_v50 }
 0x7a1   : > { %13004 = vmatpush3.bf16.msra.mxu0 %v14102_v50 }
 0x7a4   : > { %12974 = vmatmul.mubr.bf16.gmra.mrb[48].mxu0 %v17002_v49 }
 0x7a5   : > { %12977 = vmatprep.mubr.bf16.mxu0 %v17008_v63 }
 0x7ac   : > { %12978 = vmatmul.mubr.bf16.gmra.mrb[52].mxu0 %v17014_v51 }
 0x7ad   : > { %12981 = vmatprep.mubr.bf16.mxu0 %v18164_v32 }
 0x7b4   : > { %12982 = vmatmul.mubr.bf16.gmra.mrb[56].mxu0 %v18164_v32 }
 0x7b5   : > { %12985 = vmatprep.mubr.bf16.mxu0 %v18164_v32 }
 0x7bc   : > { %12986 = vmatmul.mubr.bf16.gmra.mrb[60].mxu0 %v18164_v32 }
 0x7bd   : > { %13005 = vmatprep.mubr.msk.bf16.mxu0 %vm14463_vm4, %v16924_v26 }
 0x7c4   : > { %13006 = vmatmul.mubr.msk.bf16.vlgmr.msra.gmra.mrb[32].mxu0 %vm14463_vm4, %v16926_v34 }
 0x7c5   : > { %13009 = vmatprep.mubr.msk.bf16.mxu0 %vm14463_vm4, %v16928_v44 }
 0x7cc   : > { %13010 = vmatmul.mubr.msk.bf16.gmra.mrb[36].mxu0 %vm14463_vm4, %v16930_v18 }
 0x7cd   : > { %13013 = vmatprep.mubr.msk.bf16.mxu0 %vm14463_vm4, %v16932_v47 }
 0x7d4   : > { %13014 = vmatmul.mubr.msk.bf16.gmra.mrb[40].mxu0 %vm14463_vm4, %v16934_v48 }
 0x7d5   : > { %13017 = vmatprep.mubr.msk.bf16.mxu0 %vm14463_vm4, %v16936_v58 }
 0x7dc   : > { %13018 = vmatmul.mubr.msk.bf16.gmra.mrb[44].mxu0 %vm14463_vm4, %v17017_v6 }
 0x7dd   : > { %13021 = vmatprep.mubr.msk.bf16.mxu0 %vm14463_vm4, %v17019_v23 }
 0x7e4   : > { %13022 = vmatmul.mubr.msk.bf16.gmra.mrb[48].mxu0 %vm14463_vm4, %v17021_v24 }
 0x7e5   : > { %13025 = vmatprep.mubr.msk.bf16.mxu0 %vm14463_vm4, %v17023_v28 }
 0x7ec   : > { %13026 = vmatmul.mubr.msk.bf16.gmra.mrb[52].mxu0 %vm14463_vm4, %v11072_v5 }
 0x7ed   : > { %13029 = vmatprep.mubr.msk.bf16.mxu0 %vm14463_vm4, %v16108_v43 }
 0x7f4   : > { %13030 = vmatmul.mubr.msk.bf16.gmra.mrb[56].mxu0 %vm14463_vm4, %v16108_v43 }
 0x7f5   : > { %13033 = vmatprep.mubr.msk.bf16.mxu0 %vm14463_vm4, %v16108_v43 }
 0x7fc   : > { %13034 = vmatmul.mubr.msk.bf16.gmra.mrb[60].mxu0 %vm14463_vm4, %v11084_v60 }
 0x897   : > { %v17383_v40 = vpop.f32.mrb[32].mxu0 }
 0x898   : > { %v17385_v59 = vpop.f32.mrb[33].mxu0  ;;  %v9634_v18 = vmul.f32 %v17383_v40, %v17383_v40 }
 0x899   : > { %v17387_v37 = vpop.f32.mrb[34].mxu0  ;;  %v9632_v44 = vmul.f32 %v17385_v59, %v17385_v59 }
 0x89a   : > { %v17389_v47 = vpop.f32.mrb[35].mxu0  ;;  %v9635_v34 = vmul.f32 %v17387_v37, %v17387_v37 }
 0x89b   : > { %v9594_v43 = vadd.f32 %v17389_v47, %v17385_v59  ;;  %v9633_v29 = vmul.f32 %v17389_v47, %v17389_v47 }
 0x89d   : > { %v9595_v48 = vadd.f32 %v17383_v40, %v9594_v43  ;;  %v9664_v26 = vadd.f32 %v9633_v29, %v9632_v44 }
 0x89f   : > { %v9665_v58 = vadd.f32 %v9664_v26, %v9634_v18  ;;  %v17402_v46 = vpop.f32.mrb[36].mxu0  ;;  %v9596_v21 = vadd.f32 %v17387_v37, %v9595_v48 }
 0x8a0   : > { %v17405_v49 = vpop.f32.mrb[37].mxu0  ;;  %v9638_v5 = vmul.f32 %v17402_v46, %v17402_v46 }
 0x8a1   : > { %v9597_v63 = vadd.f32 %v9596_v21, %v17405_v49  ;;  %v9636_v51 = vmul.f32 %v17405_v49, %v17405_v49  ;;  %v9666_v6 = vadd.f32 %v9665_v58, %v9635_v34  ;;  %v17410_v23 = vpop.f32.mrb[38].mxu0 }
 0x8a2   : > { %v17412_v24 = vpop.f32.mrb[39].mxu0  ;;  %v9639_v15 = vmul.f32 %v17410_v23, %v17410_v23 }
 0x8a3   : > { %v9667_v28 = vadd.f32 %v9666_v6, %v9636_v51  ;;  %v9598_v35 = vadd.f32 %v9597_v63, %v17412_v24  ;;  %v9637_v20 = vmul.f32 %v17412_v24, %v17412_v24 }
 0x8a5   : > { %v9599_v2 = vadd.f32 %v17402_v46, %v9598_v35  ;;  %v9668_v52 = vadd.f32 %v9667_v28, %v9637_v20 }
 0x8a7   : > { %v9669_v3 = vadd.f32 %v9668_v52, %v9638_v5  ;;  %v17422_v11 = vpop.f32.mrb[40].mxu0  ;;  %v9600_v16 = vadd.f32 %v17410_v23, %v9599_v2 }
 0x8a8   : > { %v17425_v9 = vpop.f32.mrb[41].mxu0  ;;  %v9642_v12 = vmul.f32 %v17422_v11, %v17422_v11 }
 0x8a9   : > { %v9601_v33 = vadd.f32 %v9600_v16, %v17425_v9  ;;  %v9640_v19 = vmul.f32 %v17425_v9, %v17425_v9  ;;  %v9670_v8 = vadd.f32 %v9669_v3, %v9639_v15  ;;  %v17430_v41 = vpop.f32.mrb[42].mxu0 }
 0x8aa   : > { %v17432_v27 = vpop.f32.mrb[43].mxu0  ;;  %v9643_v0 = vmul.f32 %v17430_v41, %v17430_v41 }
 0x8ab   : > { %v9671_v61 = vadd.f32 %v9670_v8, %v9640_v19  ;;  %v9602_v62 = vadd.f32 %v9601_v33, %v17432_v27  ;;  %v9641_v17 = vmul.f32 %v17432_v27, %v17432_v27 }
 0x8ad   : > { %v9603_v39 = vadd.f32 %v17422_v11, %v9602_v62  ;;  %v9672_v10 = vadd.f32 %v9671_v61, %v9641_v17 }
 0x8af   : > { %v9673_v55 = vadd.f32 %v9672_v10, %v9642_v12  ;;  %v17442_v30 = vpop.f32.mrb[44].mxu0  ;;  %v9604_v31 = vadd.f32 %v17430_v41, %v9603_v39 }
 0x8b0   : > { %v17445_v7 = vpop.f32.mrb[45].mxu0  ;;  %v9646_v4 = vmul.f32 %v17442_v30, %v17442_v30 }
 0x8b1   : > { %v9605_v36 = vadd.f32 %v9604_v31, %v17445_v7  ;;  %v9644_v22 = vmul.f32 %v17445_v7, %v17445_v7  ;;  %v9674_v54 = vadd.f32 %v9673_v55, %v9643_v0  ;;  %v17450_v45 = vpop.f32.mrb[46].mxu0 }
 0x8b2   : > { %v17452_v42 = vpop.f32.mrb[47].mxu0  ;;  %v9647_v56 = vmul.f32 %v17450_v45, %v17450_v45 }
 0x8b3   : > { %v9675_v38 = vadd.f32 %v9674_v54, %v9644_v22  ;;  %v9606_v1 = vadd.f32 %v9605_v36, %v17452_v42  ;;  %v9645_v57 = vmul.f32 %v17452_v42, %v17452_v42 }
 0x8b5   : > { %v9607_v25 = vadd.f32 %v17442_v30, %v9606_v1  ;;  %v9676_v13 = vadd.f32 %v9675_v38, %v9645_v57 }
 0x8b7   : > { %v9677_v14 = vadd.f32 %v9676_v13, %v9646_v4  ;;  %v17462_v53 = vpop.f32.mrb[48].mxu0  ;;  %v9608_v50 = vadd.f32 %v17450_v45, %v9607_v25 }
 0x8b8   : > { %v17465_v32 = vpop.f32.mrb[49].mxu0  ;;  %v9650_v58 = vmul.f32 %v17462_v53, %v17462_v53 }
 0x8b9   : > { %v9609_v60 = vadd.f32 %v9608_v50, %v17465_v32  ;;  %v9648_v44 = vmul.f32 %v17465_v32, %v17465_v32  ;;  %v9678_v43 = vadd.f32 %v9677_v14, %v9647_v56  ;;  %v17470_v29 = vpop.f32.mrb[50].mxu0 }
 0x8ba   : > { %v17472_v18 = vpop.f32.mrb[51].mxu0  ;;  %v9651_v51 = vmul.f32 %v17470_v29, %v17470_v29 }
 0x8bb   : > { %v9679_v48 = vadd.f32 %v9678_v43, %v9648_v44  ;;  %v9610_v26 = vadd.f32 %v9609_v60, %v17472_v18  ;;  %v9649_v34 = vmul.f32 %v17472_v18, %v17472_v18 }
 0x8bd   : > { %v9611_v21 = vadd.f32 %v17462_v53, %v9610_v26  ;;  %v9680_v63 = vadd.f32 %v9679_v48, %v9649_v34 }
 0x8bf   : > { %v9681_v6 = vadd.f32 %v9680_v63, %v9650_v58  ;;  %v17482_v28 = vpop.f32.mrb[52].mxu0  ;;  %v9612_v35 = vadd.f32 %v17470_v29, %v9611_v21 }
 0x8c0   : > { %v17485_v20 = vpop.f32.mrb[53].mxu0  ;;  %v9654_v8 = vmul.f32 %v17482_v28, %v17482_v28 }
 0x8c1   : > { %v9613_v5 = vadd.f32 %v9612_v35, %v17485_v20  ;;  %v9652_v2 = vmul.f32 %v17485_v20, %v17485_v20  ;;  %v9682_v52 = vadd.f32 %v9681_v6, %v9651_v51  ;;  %v17490_v15 = vpop.f32.mrb[54].mxu0 }
 0x8c2   : > { %v17492_v3 = vpop.f32.mrb[55].mxu0  ;;  %v9655_v17 = vmul.f32 %v17490_v15, %v17490_v15 }
 0x8c3   : > { %v9683_v16 = vadd.f32 %v9682_v52, %v9652_v2  ;;  %v9614_v33 = vadd.f32 %v9613_v5, %v17492_v3  ;;  %v9653_v19 = vmul.f32 %v17492_v3, %v17492_v3 }
 0x8c5   : > { %v9615_v61 = vadd.f32 %v17482_v28, %v9614_v33  ;;  %v9684_v62 = vadd.f32 %v9683_v16, %v9653_v19 }
 0x8c7   : > { %v9685_v12 = vadd.f32 %v9684_v62, %v9654_v8  ;;  %v17502_v39 = vpop.f32.mrb[56].mxu0  ;;  %v9616_v10 = vadd.f32 %v17490_v15, %v9615_v61 }
 0x8c8   : > { %v17505_v0 = vpop.f32.mrb[57].mxu0  ;;  %v9658_v4 = vmul.f32 %v17502_v39, %v17502_v39 }
 0x8c9   : > { %v9617_v55 = vadd.f32 %v9616_v10, %v17505_v0  ;;  %v9656_v31 = vmul.f32 %v17505_v0, %v17505_v0  ;;  %v9686_v36 = vadd.f32 %v9685_v12, %v9655_v17  ;;  %v17510_v22 = vpop.f32.mrb[58].mxu0 }
 0x8ca   : > { %v17512_v54 = vpop.f32.mrb[59].mxu0  ;;  %v9659_v56 = vmul.f32 %v17510_v22, %v17510_v22 }
 0x8cb   : > { %v9687_v38 = vadd.f32 %v9686_v36, %v9656_v31  ;;  %v9618_v1 = vadd.f32 %v9617_v55, %v17512_v54  ;;  %v9657_v57 = vmul.f32 %v17512_v54, %v17512_v54 }
 0x8cd   : > { %v9619_v25 = vadd.f32 %v17502_v39, %v9618_v1  ;;  %v9688_v13 = vadd.f32 %v9687_v38, %v9657_v57 }
 0x8cf   : > { %v9689_v14 = vadd.f32 %v9688_v13, %v9658_v4  ;;  %v17522_v50 = vpop.f32.mrb[60].mxu0  ;;  %v9620_v60 = vadd.f32 %v17510_v22, %v9619_v25 }
 0x8d0   : > { %v17525_v44 = vpop.f32.mrb[61].mxu0  ;;  %v9662_v6 = vmul.f32 %v17522_v50, %v17522_v50 }
 0x8d1   : > { %v9621_v43 = vadd.f32 %v9620_v60, %v17525_v44  ;;  %v9660_v48 = vmul.f32 %v17525_v44, %v17525_v44  ;;  %v9690_v26 = vadd.f32 %v9689_v14, %v9659_v56  ;;  %v17530_v34 = vpop.f32.mrb[62].mxu0 }
 0x8d2   : > { %v17532_v58 = vpop.f32.mrb[63].mxu0  ;;  %v9663_v2 = vmul.f32 %v17530_v34, %v17530_v34 }
 0x8d3   : > { %v9691_v21 = vadd.f32 %v9690_v26, %v9660_v48  ;;  %v9622_v63 = vadd.f32 %v9621_v43, %v17532_v58  ;;  %v9661_v51 = vmul.f32 %v17532_v58, %v17532_v58 }
 0x8d5   : > { %v9623_v35 = vadd.f32 %v17522_v50, %v9622_v63  ;;  %v9692_v5 = vadd.f32 %v9691_v21, %v9661_v51 }
 0x8d7   : > { %v9624_v52 = vadd.f32 %v17530_v34, %v9623_v35  ;;  %v9693_v16 = vadd.f32 %v9692_v5, %v9662_v6 }
 0x8d9   : > { %v9625_v33 = vrot.slane %v9624_v52, 4  ;;  %v9694_v19 = vadd.f32 %v9693_v16, %v9663_v2 }
 0x8db   : > { %v9626_v8 = vadd.f32 %v9625_v33, %v9624_v52  ;;  %v9695_v61 = vrot.slane %v9694_v19, 4 }
 0x8dd   : > { %v9627_v62 = vrot.slane %v9626_v8, 2  ;;  %v9696_v17 = vadd.f32 %v9695_v61, %v9694_v19 }
 0x8df   : > { %v9628_v12 = vadd.f32 %v9627_v62, %v9626_v8  ;;  %v9697_v10 = vrot.slane %v9696_v17, 2 }
 0x8e1   : > { %v9629_v55 = vrot.slane %v9628_v12, 1  ;;  %v9698_v31 = vadd.f32 %v9697_v10, %v9696_v17 }
 0x8e3   : > { %v9630_v36 = vadd.f32 %v9629_v55, %v9628_v12  ;;  %v9699_v38 = vrot.slane %v9698_v31, 1 }
 0x8e5   : > { %v17543_v1 = vmul.f32 0.00390625, %v9630_v36  ;;  %v9700_v57 = vadd.f32 %v9699_v38, %v9698_v31 }
 0x8e7   : > { %v9701_v4 = vmul.f32 0.00390625, %v9700_v57  ;;  %v9702_v25 = vmul.f32 %v17543_v1, %v17543_v1  ;;  %v9733_v13 = vsub.f32 %v17532_v58, %v17543_v1  ;;  %v9704_v56 = vsub.f32 %v17385_v59, %v17543_v1 }
 0x8e8   : > { %v9705_v14 = vsub.f32 %v17389_v47, %v17543_v1  ;;  %v9706_v60 = vsub.f32 %v17383_v40, %v17543_v1  ;;  %v9707_v43 = vsub.f32 %v17387_v37, %v17543_v1  ;;  %v9708_v48 = vsub.f32 %v17405_v49, %v17543_v1 }
 0x8e9   : > { %v9703_v26 = vsub.f32 %v9701_v4, %v9702_v25  ;;  %v9709_v21 = vsub.f32 %v17412_v24, %v17543_v1  ;;  %v9710_v58 = vsub.f32 %v17402_v46, %v17543_v1  ;;  %v9711_v59 = vsub.f32 %v17410_v23, %v17543_v1 }
 0x8ea   : > { %v9712_v47 = vsub.f32 %v17425_v9, %v17543_v1  ;;  %v9713_v40 = vsub.f32 %v17432_v27, %v17543_v1  ;;  %v9714_v37 = vsub.f32 %v17422_v11, %v17543_v1  ;;  %v9715_v49 = vsub.f32 %v17430_v41, %v17543_v1 }
 0x8eb   : > { %v9736_v63 = vadd.f32 1e-05, %v9703_v26  ;;  %v9716_v24 = vsub.f32 %v17445_v7, %v17543_v1  ;;  %v9717_v46 = vsub.f32 %v17452_v42, %v17543_v1  ;;  %v9718_v23 = vsub.f32 %v17442_v30, %v17543_v1 }
 0x8ec   : > { %v9719_v9 = vsub.f32 %v17450_v45, %v17543_v1  ;;  %v9720_v27 = vsub.f32 %v17465_v32, %v17543_v1  ;;  %v9721_v11 = vsub.f32 %v17472_v18, %v17543_v1  ;;  %v9722_v41 = vsub.f32 %v17462_v53, %v17543_v1 }
 0x8ed   : > { %14107 = vrsqrt.f32 %v9736_v63  ;;  %v9723_v7 = vsub.f32 %v17470_v29, %v17543_v1  ;;  %v9724_v42 = vsub.f32 %v17485_v20, %v17543_v1  ;;  %v9725_v30 = vsub.f32 %v17492_v3, %v17543_v1 }
 0x8ee   : > { %v9726_v45 = vsub.f32 %v17482_v28, %v17543_v1  ;;  %v9727_v32 = vsub.f32 %v17490_v15, %v17543_v1  ;;  %v9728_v53 = vsub.f32 %v17505_v0, %v17543_v1  ;;  %v9729_v18 = vsub.f32 %v17512_v54, %v17543_v1 }
 0x8ef   : > { %v9730_v29 = vsub.f32 %v17502_v39, %v17543_v1  ;;  %v9731_v20 = vsub.f32 %v17510_v22, %v17543_v1  ;;  %v9732_v3 = vsub.f32 %v17525_v44, %v17543_v1  ;;  %v9734_v28 = vsub.f32 %v17522_v50, %v17543_v1  ;;  %v9831_v39 = vld [vmem:[%s14419_s3 + $0xe8] sm:$0xff] }
 0x8f0   : > { %v9735_v15 = vsub.f32 %v17530_v34, %v17543_v1 }
 0x8f7   : > { %v14108_v51 = vpop.eup %14107 }
 0x8f8   : > { %v9767_v0 = vmul.f32 %v14108_v51, %v9733_v13  ;;  %v17611_v6 = vmul.f32 %v14108_v51, %v9704_v56  ;;  %v17613_v54 = vmul.f32 %v14108_v51, %v9705_v14  ;;  %v17615_v35 = vmul.f32 %v14108_v51, %v9706_v60 }
 0x8f9   : > { %v17618_v5 = vmul.f32 %v14108_v51, %v9707_v43  ;;  %v17620_v22 = vmul.f32 %v14108_v51, %v9708_v48  ;;  %v17622_v44 = vmul.f32 %v14108_v51, %v9709_v21  ;;  %v17624_v2 = vmul.f32 %v14108_v51, %v9710_v58 }
 0x8fa   : > { %v9799_v50 = vmax.f32 %v9767_v0, 0.0  ;;  %v17626_v34 = vmul.f32 %v14108_v51, %v9711_v59  ;;  %v17628_v52 = vmul.f32 %v14108_v51, %v9712_v47  ;;  %v17630_v16 = vmul.f32 %v14108_v51, %v9713_v40 }
 0x8fb   : > { %v17632_v33 = vmul.f32 %v14108_v51, %v9714_v37  ;;  %v17634_v19 = vmul.f32 %v14108_v51, %v9715_v49  ;;  %v17636_v8 = vmul.f32 %v14108_v51, %v9716_v24  ;;  %v17638_v61 = vmul.f32 %v14108_v51, %v9717_v46  ;;  %v9804_v46 = vld [vmem:[%s14419_s3 + $0x10] sm:$0xff] }
 0x8fc   : > { %v9863_v62 = vadd.f32 %v9831_v39, %v9799_v50  ;;  %v17640_v17 = vmul.f32 %v14108_v51, %v9718_v23  ;;  %v17642_v12 = vmul.f32 %v14108_v51, %v9719_v9  ;;  %v17644_v10 = vmul.f32 %v14108_v51, %v9720_v27  ;;  %v9802_v23 = vld [vmem:[%s14419_s3] sm:$0xff]  ;;  %v9803_v9 = vld [vmem:[%s14419_s3 + $0x8] sm:$0xff]  ;;  %v9813_v39 = vld [vmem:[%s14419_s3 + $0x58] sm:$0xff] }
 0x8fd   : > { %v17646_v55 = vmul.f32 %v14108_v51, %v9721_v11  ;;  %v17648_v31 = vmul.f32 %v14108_v51, %v9722_v41  ;;  %v17650_v36 = vmul.f32 %v14108_v51, %v9723_v7  ;;  %v17652_v38 = vmul.f32 %v14108_v51, %v9724_v42  ;;  %v9805_v42 = vld [vmem:[%s14419_s3 + $0x18] sm:$0xff] }
 0x8fe   : > { %9895 = vst [vmem:[%s17656_s15 + $0xe8] sm:$0xff] %v9863_v62  ;;  %v17659_v1 = vmul.f32 %v14108_v51, %v9725_v30  ;;  %v17661_v57 = vmul.f32 %v14108_v51, %v9726_v45  ;;  %v17663_v4 = vmul.f32 %v14108_v51, %v9727_v32  ;;  %v17665_v25 = vmul.f32 %v14108_v51, %v9728_v53  ;;  %v9808_v30 = vld [vmem:[%s14419_s3 + $0x30] sm:$0xff]  ;;  %v9806_v45 = vld [vmem:[%s14419_s3 + $0x20] sm:$0xff]  ;;  %v9807_v32 = vld [vmem:[%s14419_s3 + $0x28] sm:$0xff] }
 0x8ff   : > { %v17667_v13 = vmul.f32 %v14108_v51, %v9729_v18  ;;  %v17669_v56 = vmul.f32 %v14108_v51, %v9730_v29  ;;  %v17671_v14 = vmul.f32 %v14108_v51, %v9731_v20  ;;  %v17673_v60 = vmul.f32 %v14108_v51, %v9732_v3  ;;  %v9809_v3 = vld [vmem:[%s14419_s3 + $0x38] sm:$0xff]  ;;  %v9820_v62 = vld [vmem:[%s14419_s3 + $0x90] sm:$0xff]  ;;  %v9823_v29 = vld [vmem:[%s14419_s3 + $0xa8] sm:$0xff] }
 0x900   : > { %v17675_v43 = vmul.f32 %v14108_v51, %v9734_v28  ;;  %v17677_v48 = vmul.f32 %v14108_v51, %v9735_v15  ;;  %v9770_v26 = vmax.f32 %v17611_v6, 0.0  ;;  %v9771_v21 = vmax.f32 %v17613_v54, 0.0  ;;  %v9812_v28 = vld [vmem:[%s14419_s3 + $0x50] sm:$0xff]  ;;  %v9810_v15 = vld [vmem:[%s14419_s3 + $0x40] sm:$0xff]  ;;  %v9811_v51 = vld [vmem:[%s14419_s3 + $0x48] sm:$0xff] }
 0x901   : > { %v9772_v58 = vmax.f32 %v17615_v35, 0.0  ;;  %v9773_v59 = vmax.f32 %v17618_v5, 0.0  ;;  %v9774_v47 = vmax.f32 %v17620_v22, 0.0  ;;  %v9775_v40 = vmax.f32 %v17622_v44, 0.0  ;;  %v9816_v5 = vld [vmem:[%s14419_s3 + $0x70] sm:$0xff]  ;;  %v9814_v22 = vld [vmem:[%s14419_s3 + $0x60] sm:$0xff] }
 0x902   : > { %v9776_v37 = vmax.f32 %v17624_v2, 0.0  ;;  %v9777_v49 = vmax.f32 %v17626_v34, 0.0  ;;  %v9778_v63 = vmax.f32 %v17628_v52, 0.0  ;;  %v9779_v24 = vmax.f32 %v17630_v16, 0.0  ;;  %v9817_v52 = vld [vmem:[%s14419_s3 + $0x78] sm:$0xff]  ;;  %v9815_v16 = vld [vmem:[%s14419_s3 + $0x68] sm:$0xff] }
 0x903   : > { %v9780_v27 = vmax.f32 %v17632_v33, 0.0  ;;  %v9781_v11 = vmax.f32 %v17634_v19, 0.0  ;;  %v9782_v41 = vmax.f32 %v17636_v8, 0.0  ;;  %v9783_v7 = vmax.f32 %v17638_v61, 0.0  ;;  %v9819_v33 = vld [vmem:[%s14419_s3 + $0x88] sm:$0xff]  ;;  %v9824_v19 = vld [vmem:[%s14419_s3 + $0xb0] sm:$0xff] }
 0x904   : > { %v9784_v53 = vmax.f32 %v17640_v17, 0.0  ;;  %v9785_v18 = vmax.f32 %v17642_v12, 0.0  ;;  %v9788_v0 = vmax.f32 %v17648_v31, 0.0  ;;  %v9792_v44 = vmax.f32 %v17661_v57, 0.0  ;;  %v9818_v17 = vld [vmem:[%s14419_s3 + $0x80] sm:$0xff]  ;;  %v9821_v31 = vld [vmem:[%s14419_s3 + $0x98] sm:$0xff] }
 0x905   : > { %v9834_v34 = vadd.f32 %v9802_v23, %v9770_v26  ;;  %v9835_v50 = vadd.f32 %v9803_v9, %v9771_v21  ;;  %v9836_v2 = vadd.f32 %v9804_v46, %v9772_v58  ;;  %v9822_v8 = vld [vmem:[%s14419_s3 + $0xa0] sm:$0xff]  ;;  %v9837_v35 = vadd.f32 %v9805_v42, %v9773_v59  ;;  %v9825_v20 = vld [vmem:[%s14419_s3 + $0xb8] sm:$0xff]  ;;  %v9828_v57 = vld [vmem:[%s14419_s3 + $0xd0] sm:$0xff] }
 0x906   : > { %v9838_v61 = vadd.f32 %v9806_v45, %v9774_v47  ;;  %v9839_v54 = vadd.f32 %v9807_v32, %v9775_v40  ;;  %v9840_v6 = vadd.f32 %v9808_v30, %v9776_v37  ;;  %v9841_v26 = vadd.f32 %v9809_v3, %v9777_v49  ;;  %v9826_v59 = vld [vmem:[%s14419_s3 + $0xc0] sm:$0xff]  ;;  %v9829_v47 = vld [vmem:[%s14419_s3 + $0xd8] sm:$0xff]  ;;  %v9827_v40 = vld [vmem:[%s14419_s3 + $0xc8] sm:$0xff] }
 0x907   : > { %v9842_v21 = vadd.f32 %v9810_v15, %v9778_v63  ;;  %v9843_v58 = vadd.f32 %v9811_v51, %v9779_v24  ;;  %v9844_v46 = vadd.f32 %v9812_v28, %v9780_v27  ;;  %9866 = vst [vmem:[%s17656_s15] sm:$0xff] %v9834_v34  ;;  %9867 = vst [vmem:[%s17656_s15 + $0x8] sm:$0xff] %v9835_v50  ;;  %v9832_v24 = vld [vmem:[%s14419_s3 + $0xf0] sm:$0xff]  ;;  %v9830_v9 = vld [vmem:[%s14419_s3 + $0xe0] sm:$0xff]  ;;  %v18166_v42 = vmax.f32 %v17646_v55, 0.0 }
 0x908   : > { %9868 = vst [vmem:[%s17656_s15 + $0x10] sm:$0xff] %v9836_v2  ;;  %v9845_v37 = vadd.f32 %v9813_v39, %v9781_v11  ;;  %v9846_v23 = vadd.f32 %v9814_v22, %v9782_v41  ;;  %v9847_v49 = vadd.f32 %v9815_v16, %v9783_v7  ;;  %v9848_v63 = vadd.f32 %v9816_v5, %v9784_v53  ;;  %v9833_v27 = vld [vmem:[%s14419_s3 + $0xf8] sm:$0xff] }
 0x909   : > { %9869 = vst [vmem:[%s17656_s15 + $0x18] sm:$0xff] %v9837_v35  ;;  %9870 = vst [vmem:[%s17656_s15 + $0x20] sm:$0xff] %v9838_v61  ;;  %v9849_v11 = vadd.f32 %v9817_v52, %v9785_v18  ;;  %v18165_v41 = vmax.f32 %v17644_v10, 0.0  ;;  %v9851_v30 = vadd.f32 %v9819_v33, %v18166_v42  ;;  %v9852_v45 = vadd.f32 %v9820_v62, %v9788_v0 }
 0x90a   : > { %9871 = vst [vmem:[%s17656_s15 + $0x28] sm:$0xff] %v9839_v54  ;;  %9872 = vst [vmem:[%s17656_s15 + $0x30] sm:$0xff] %v9840_v6  ;;  %v18167_v32 = vmax.f32 %v17650_v36, 0.0  ;;  %v18168_v53 = vmax.f32 %v17652_v38, 0.0  ;;  %v18169_v18 = vmax.f32 %v17659_v1, 0.0  ;;  %v9856_v3 = vadd.f32 %v9824_v19, %v9792_v44 }
 0x90b   : > { %v9850_v7 = vadd.f32 %v9818_v17, %v18165_v41  ;;  %9873 = vst [vmem:[%s17656_s15 + $0x38] sm:$0xff] %v9841_v26  ;;  %9874 = vst [vmem:[%s17656_s15 + $0x40] sm:$0xff] %v9842_v21  ;;  %v18170_v28 = vmax.f32 %v17663_v4, 0.0  ;;  %v18171_v15 = vmax.f32 %v17665_v25, 0.0  ;;  %v18172_v51 = vmax.f32 %v17667_v13, 0.0 }
 0x90c   : > { %9875 = vst [vmem:[%s17656_s15 + $0x48] sm:$0xff] %v9843_v58  ;;  %9876 = vst [vmem:[%s17656_s15 + $0x50] sm:$0xff] %v9844_v46  ;;  %v9853_v12 = vadd.f32 %v9821_v31, %v18167_v32  ;;  %v9854_v10 = vadd.f32 %v9822_v8, %v18168_v53  ;;  %v9855_v55 = vadd.f32 %v9823_v29, %v18169_v18  ;;  %v18173_v29 = vmax.f32 %v17669_v56, 0.0 }
 0x90d   : > { %9877 = vst [vmem:[%s17656_s15 + $0x58] sm:$0xff] %v9845_v37  ;;  %9878 = vst [vmem:[%s17656_s15 + $0x60] sm:$0xff] %v9846_v23  ;;  %v9857_v36 = vadd.f32 %v9825_v20, %v18170_v28  ;;  %v9858_v38 = vadd.f32 %v9826_v59, %v18171_v15  ;;  %v9859_v1 = vadd.f32 %v9827_v40, %v18172_v51  ;;  %v18174_v4 = vmax.f32 %v17671_v14, 0.0 }
 0x90e   : > { %9879 = vst [vmem:[%s17656_s15 + $0x68] sm:$0xff] %v9847_v49  ;;  %9880 = vst [vmem:[%s17656_s15 + $0x70] sm:$0xff] %v9848_v63  ;;  %v9860_v0 = vadd.f32 %v9828_v57, %v18173_v29  ;;  %v18175_v13 = vmax.f32 %v17673_v60, 0.0  ;;  %v18176_v20 = vmax.f32 %v17675_v43, 0.0  ;;  %v18177_v54 = vmax.f32 %v17677_v48, 0.0 }
 0x90f   : > { %9881 = vst [vmem:[%s17656_s15 + $0x78] sm:$0xff] %v9849_v11  ;;  %9882 = vst [vmem:[%s17656_s15 + $0x80] sm:$0xff] %v9850_v7  ;;  %v9861_v25 = vadd.f32 %v9829_v47, %v18174_v4 }
 0x910   : > { %9883 = vst [vmem:[%s17656_s15 + $0x88] sm:$0xff] %v9851_v30  ;;  %9884 = vst [vmem:[%s17656_s15 + $0x90] sm:$0xff] %v9852_v45  ;;  %v9862_v56 = vadd.f32 %v9830_v9, %v18175_v13  ;;  %v9864_v6 = vadd.f32 %v9832_v24, %v18176_v20  ;;  %v9865_v35 = vadd.f32 %v9833_v27, %v18177_v54 }
 0x911   : > { %9885 = vst [vmem:[%s17656_s15 + $0x98] sm:$0xff] %v9853_v12  ;;  %9886 = vst [vmem:[%s17656_s15 + $0xa0] sm:$0xff] %v9854_v10 }
 0x912   : > { %9887 = vst [vmem:[%s17656_s15 + $0xa8] sm:$0xff] %v9855_v55  ;;  %9888 = vst [vmem:[%s17656_s15 + $0xb0] sm:$0xff] %v9856_v3 }
 0x913   : > { %9889 = vst [vmem:[%s17656_s15 + $0xb8] sm:$0xff] %v9857_v36  ;;  %9890 = vst [vmem:[%s17656_s15 + $0xc0] sm:$0xff] %v9858_v38 }
 0x914   : > { %9891 = vst [vmem:[%s17656_s15 + $0xc8] sm:$0xff] %v9859_v1  ;;  %9892 = vst [vmem:[%s17656_s15 + $0xd0] sm:$0xff] %v9860_v0 }
 0x915   : > { %9893 = vst [vmem:[%s17656_s15 + $0xd8] sm:$0xff] %v9861_v25  ;;  %9894 = vst [vmem:[%s17656_s15 + $0xe0] sm:$0xff] %v9862_v56 }
 0x916   : > { %9896 = vst [vmem:[%s17656_s15 + $0xf0] sm:$0xff] %v9864_v6  ;;  %9897 = vst [vmem:[%s17656_s15 + $0xf8] sm:$0xff] %v9865_v35 }
 0x917   : > { %14188 = shalt.err (!%p14185_p7)
}
 0x918   : > { %s14189_s18 = scalar_lea.hbm %s17787_s28, 4096  ;;  %s14193_s20 = scalar_lea.hbm %s17857_s2, 8192 }
 0x919   : > { %p14190_p9 = scmp.ne.s32.totalorder %s17787_s28, %s14189_s18  ;;  %p14194_p5 = scmp.lt.u32.totalorder %s17787_s28, %s17857_s2 }
 0x91a   : > { %p14195_p11 = scmp.lt.u32.totalorder %s14193_s20, %s14189_s18  ;;  %p14197_p4 = scmp.lt.u32.totalorder %s14189_s18, %s17787_s28 }
 0x91b   : > { %p14191_p2 = pnand %p14190_p9, %p14365_p12 }
 0x91c   : > { %p14196_p1 = por %p14195_p11, %p14194_p5 }
 0x91d   : > { %p14192_p0 = pneg %p14191_p2 }
 0x91e   : > { %p14198_p6 = por %p14197_p4, %p14196_p1 }
 0x920   : > { %p14199_p8 = pnand %p14198_p6, %p14192_p0 }
 0x922   : > { %14202 = shalt.err (!%p14199_p8)
}
 0x923   : > { %s14257_s30 = smov 128   ;;  %s14258_s3 = smov 8  }
 0x924   : > { %13827 = dma.vmem_to_hbm [thread:$0]  (%p14365_p12), %s17791_s27, 4096, %s17787_s28, %s9899_s13, %s14257_s30, %s14257_s30, %s14258_s3  }
 0x925 PF: > { %s9927_s15 = sand.u32 1, %s14233_s9   ;;  %p18178_p10 = scmp.ne.s32.totalorder %s17958_s16, 0 }
 0x926   : > { %p18179_p13 = scmp.ge.s32.totalorder %s14245_s12, 2  ;;  %s9928_s17 = scalar_lea.sflag [#allocation5], %s9927_s15 }
 0x928   : > { %p13838_p3 = pnand %p18179_p13, %p18178_p10 }
 0x92a   : > { %14228 = dma.done.wait (!%p13838_p3), %s9928_s17, 4096  }
 0x92b   : > { %14230 = vsyncadd (!%p13838_p3), %s9928_s17, 4294963200  ;;  %p16_p7 = scmp.ge.s32.totalorder %s14330_s21, 4   ;;  %s18180_s9 = smov %s14237_s10 }
 0x92c   : > { %s18181_s10 = smov %s14241_s11  ;;  %s18182_s11 = smov %s14361_s8 }
 0x92d   : > { %s18183_s12 = smov %s14330_s21  ;;  %18 = sbr.rel (!%p16_p7) target bundleno = 6 (0x6), region = 108 }
 0x934   :  { %9933 = vsyncpa [#allocation4], 1 }
 0x935   :  { %9935 = vsyncpa [#allocation4 + $0x1], 1 }
 0x936   :  { %9936 = vsyncpa [#allocation7], 1 }
 0x937   :  { %9937 = vsyncpa [#allocation5], 1 }
 0x938   :  { %9939 = vsyncpa [#allocation5 + $0x1], 1 }

</bundles_post_ra>
